<compile_context>
chip_gen: v7x
topology: tpu7x:2x2x1
jax: 0.10.0
libtpu: 0.0.40
codegen_flags: <defaults>
</compile_context>

<pallas_src>
import jax
import jax.numpy as jnp
from jax.experimental import pallas as pl
from jax.experimental.pallas import tpu as pltpu

# ----- model hyper-parameters (scaled down but structurally faithful) -----
B = 2          # batch
N = 8          # window_size
K = 4          # n_features
OUT = 4        # out_dim
KS = 7         # conv kernel_size
HID = 32       # gru_hid_dim == forecast_hid_dim == recon_hid_dim (300 in paper)
FC_LAYERS = 3  # forecast_n_layers
ALPHA = 0.2    # leaky-relu negative slope
PAD = (KS - 1) // 2

H2 = 2 * HID
H3 = 3 * HID
TCH = ((H3 + 127) // 128) * 128   # 128: per-timestep decoder chunk, vreg-aligned


# ---------------------------------------------------------------------------
# Fused Pallas kernel
# ---------------------------------------------------------------------------
def _leaky(v):
    return jnp.where(v >= 0.0, v, ALPHA * v)


def _gatv2(x, wl, wr, bl, a, bias):
    """GATv2 attention over the rows of x (nodes, feat) -> (nodes, feat).

    lin(concat(v_i, v_j)) == v_i @ Wl + v_j @ Wr + b_lin (no n x n x 2F tensor).
    """
    L = jnp.dot(x, wl, preferred_element_type=jnp.float32) + bl        # (n, E)
    R = jnp.dot(x, wr, preferred_element_type=jnp.float32)             # (n, E)
    z = _leaky(L[:, None, :] + R[None, :, :])                          # (n, n, E)
    e = jnp.sum(z * a[None, :, :], axis=-1) + bias                     # (n, n)
    m = jnp.max(e, axis=-1, keepdims=True)
    p = jnp.exp(e - m)
    attn = p / jnp.sum(p, axis=-1, keepdims=True)                      # softmax over j
    return jax.nn.sigmoid(jnp.dot(attn, x, preferred_element_type=jnp.float32))


def mtad_gat_kernel(
    xim_ref,                                              # (B*N, KS*K) pre-built im2col (b-major rows)
    conv_w_ref, conv_b_ref,                               # (KS*K, K), (1, K)
    perm_ref,                                             # (N*B, B*N) b-major -> time-major row permutation
    fwl_ref, fwr_ref, fbl_ref, fa_ref, fbias_ref,         # feature GAT
    twl_ref, twr_ref, tbl_ref, ta_ref, tbias_ref,         # temporal GAT
    enc_wih_ref, enc_bih_ref, enc_whh_ref, enc_bhh_ref,   # encoder GRU, gates fused [r|z|n]
    fc_wh_ref, fc_bh_ref, fc_wo_ref, fc_bo_ref,           # forecasting MLP
    dec_weff_ref, dec_bih_ref, dec_whh_ref, dec_bhh_ref,  # decoder GRU, gates fused, time-major cols
    rec_w_ref, rec_b_ref,                                 # recon output linear
    preds_ref, recons_ref,                                # outputs (B, OUT), (N*B, OUT)
    xg_s,                                                 # (N*B, 3H) scratch: encoder input projections
):
    # ---- Conv1d (same padding) + ReLU: ONE im2col matmul for the whole batch.
    xc = jnp.maximum(
        jnp.dot(xim_ref[...], conv_w_ref[...], preferred_element_type=jnp.float32)
        + conv_b_ref[...], 0.0)                                                  # (B*N, K)

    fwl, fwr, fbl, fa, fbias = (fwl_ref[...], fwr_ref[...], fbl_ref[...],
                                fa_ref[...], fbias_ref[...])
    twl, twr, tbl, ta, tbias = (twl_ref[...], twr_ref[...], tbl_ref[...],
                                ta_ref[...], tbias_ref[...])

    # ---- GATs: unrolled over B=2 (tile-aligned 8-row slices of xc).
    hcat_parts = []
    for b in range(B):
        xc_b = xc[b * N:(b + 1) * N, :]                                          # (N, K)
        # Feature-oriented GAT: nodes are the K features (node vec = its window).
        h_feat = _gatv2(xc_b.T, fwl, fwr, fbl, fa, fbias).T                      # (N, K)
        # Time-oriented GAT: nodes are the N timestamps.
        h_temp = _gatv2(xc_b, twl, twr, tbl, ta, tbias)                          # (N, K)
        hcat_parts.append(jnp.concatenate([xc_b, h_feat, h_temp], axis=-1))      # (N, 3K)
    hcat = jnp.concatenate(hcat_parts, axis=0)                                   # (B*N, 3K), b-major

    # ---- Encoder GRU input projections: ONE fused matmul (all gates, timesteps,
    #      batches), then a tiny constant permutation matmul to time-major order
    #      and a single slab store into the (N*B, 3H) scratch.
    xg = (jnp.dot(hcat, enc_wih_ref[...], preferred_element_type=jnp.float32)
          + enc_bih_ref[...])                                                    # (B*N, 3H)
    xg_s[...] = jnp.dot(perm_ref[...], xg, preferred_element_type=jnp.float32)   # (N*B, 3H), t-major

    # ---- Encoder GRU (PyTorch gate order r, z, n); batch in matmul rows; one
    #      fused (B,H)@(H,3H) recurrent matmul per step; sigmoid over r|z lanes.
    enc_whh = enc_whh_ref[...]
    enc_bhh = enc_bhh_ref[...]
    h = jnp.zeros((B, HID), jnp.float32)
    for t in range(N):
        gx = xg_s[t * B:(t + 1) * B, :]                                          # (B, 3H) slab
        gh = jnp.dot(h, enc_whh, preferred_element_type=jnp.float32) + enc_bhh   # (B, 3H)
        rz = jax.nn.sigmoid(gx[:, :H2] + gh[:, :H2])
        r, zg = rz[:, :HID], rz[:, HID:]
        n = jnp.tanh(gx[:, H2:] + r * gh[:, H2:])
        h = (1.0 - zg) * n + zg * h
    h_end = h                                                                    # (B, HID)

    # ---- Forecasting MLP (dropout == identity in eval mode).
    y = h_end
    for i in range(FC_LAYERS):
        y = jnp.maximum(jnp.dot(y, fc_wh_ref[i], preferred_element_type=jnp.float32)
                        + fc_bh_ref[i], 0.0)
    preds_ref[...] = (jnp.dot(y, fc_wo_ref[...], preferred_element_type=jnp.float32)
                      + fc_bo_ref[...])

    # ---- Reconstruction: decoder GRU + hoisted output linear.
    # repeat_interleave(N).view(B,N,HID) quirk folded into dec_weff (wrapper), so
    # ALL decoder input projections are ONE wide matmul; columns are time-major
    # with a 128-aligned [r|z|n] chunk per timestep.
    xd = (jnp.dot(h_end, dec_weff_ref[...], preferred_element_type=jnp.float32)
          + dec_bih_ref[...])                                                    # (B, N*TCH)
    dec_whh = dec_whh_ref[...]
    dec_bhh = dec_bhh_ref[...]
    hd = jnp.zeros((B, HID), jnp.float32)
    hd_steps = []
    for t in range(N):
        gx = xd[:, t * TCH:t * TCH + H3]                                         # aligned (B, 3H) chunk
        gh = jnp.dot(hd, dec_whh, preferred_element_type=jnp.float32) + dec_bhh
        rz = jax.nn.sigmoid(gx[:, :H2] + gh[:, :H2])
        r, zg = rz[:, :HID], rz[:, HID:]
        n = jnp.tanh(gx[:, H2:] + r * gh[:, H2:])
        hd = (1.0 - zg) * n + zg * hd
        hd_steps.append(hd)

    # Recon linear hoisted out of the loop: one matmul + one store.
    hd_all = jnp.concatenate(hd_steps, axis=0)                                   # (N*B, HID)
    recons_ref[...] = (jnp.dot(hd_all, rec_w_ref[...], preferred_element_type=jnp.float32)
                       + rec_b_ref[...])                                         # (N*B, OUT)


# ---------------------------------------------------------------------------
# Parameters (deterministic synthetic init, PyTorch tensor layouts)
# ---------------------------------------------------------------------------
def init_params(key):
    ks = jax.random.split(key, 40)
    s = 0.1
    nrm = lambda k, shp: (jax.random.normal(k, shp, jnp.float32) * s)
    p = {}
    # ConvLayer: Conv1d(K, K, kernel_size=KS)
    p["conv_w"] = nrm(ks[0], (K, K, KS))
    p["conv_b"] = nrm(ks[1], (K,))
    # FeatureAttentionLayer (GATv2): embed = 2*N, lin: 2*N -> 2*N, bias (K,K)
    Ef = 2 * N
    p["fgat_lin_w"] = nrm(ks[2], (Ef, 2 * N))
    p["fgat_lin_b"] = nrm(ks[3], (Ef,))
    p["fgat_a"] = nrm(ks[4], (Ef,))
    p["fgat_bias"] = nrm(ks[5], (K, K))
    # TemporalAttentionLayer (GATv2): embed = 2*K, lin: 2*K -> 2*K, bias (N,N)
    Et = 2 * K
    p["tgat_lin_w"] = nrm(ks[6], (Et, 2 * K))
    p["tgat_lin_b"] = nrm(ks[7], (Et,))
    p["tgat_a"] = nrm(ks[8], (Et,))
    p["tgat_bias"] = nrm(ks[9], (N, N))
    # GRU encoder: in = 3*K, hid = HID, 1 layer
    p["gru_w_ih"] = nrm(ks[10], (3 * HID, 3 * K))
    p["gru_w_hh"] = nrm(ks[11], (3 * HID, HID))
    p["gru_b_ih"] = nrm(ks[12], (3 * HID,))
    p["gru_b_hh"] = nrm(ks[13], (3 * HID,))
    # Forecasting_Model: [Lin(HID,HID)] + (FC_LAYERS-1)*[Lin(HID,HID)] + [Lin(HID,OUT)]
    fc = []
    dims = [(HID, HID)] + [(HID, HID)] * (FC_LAYERS - 1) + [(OUT, HID)]
    for i, (o, iin) in enumerate(dims):
        fc.append((nrm(ks[14 + 2 * i], (o, iin)), nrm(ks[15 + 2 * i], (o,))))
    p["fc_layers"] = fc
    # ReconstructionModel: GRU decoder (HID -> HID, 1 layer) + Linear(HID, OUT)
    p["rec_w_ih"] = nrm(ks[30], (3 * HID, HID))
    p["rec_w_hh"] = nrm(ks[31], (3 * HID, HID))
    p["rec_b_ih"] = nrm(ks[32], (3 * HID,))
    p["rec_b_hh"] = nrm(ks[33], (3 * HID,))
    p["rec_fc_w"] = nrm(ks[34], (OUT, HID))
    p["rec_fc_b"] = nrm(ks[35], (OUT,))
    return p


def preprocess_params(p):
    """One-time repack of PyTorch-layout params into kernel-ready tensors."""
    f32 = jnp.float32
    prep = {}
    # Conv im2col weight: rows ordered (tap, in_channel), cols = out channel.
    prep["conv_w"] = jnp.transpose(p["conv_w"], (2, 1, 0)).reshape(KS * K, K).astype(f32)
    prep["conv_b"] = p["conv_b"].reshape(1, K).astype(f32)
    # b-major -> time-major row permutation (folded into a tiny matmul in-kernel
    # so the encoder step loads one contiguous (B,3H) slab without a transpose).
    q = jnp.arange(N * B)
    src = (q % B) * N + q // B
    prep["perm"] = (src[:, None] == jnp.arange(B * N)[None, :]).astype(f32)      # (N*B, B*N)
    # Feature GAT (nodes = K features, node vec = window of length N).
    Ef = p["fgat_lin_w"].shape[0]
    prep["fgat_wl"] = p["fgat_lin_w"][:, :N].T.astype(f32)          # (N, Ef)
    prep["fgat_wr"] = p["fgat_lin_w"][:, N:].T.astype(f32)          # (N, Ef)
    prep["fgat_bl"] = p["fgat_lin_b"].reshape(1, Ef).astype(f32)
    prep["fgat_a"] = p["fgat_a"].reshape(1, Ef).astype(f32)
    prep["fgat_bias"] = p["fgat_bias"].astype(f32)                  # (K, K)
    # Temporal GAT (nodes = N timestamps, node vec = K features).
    Et = p["tgat_lin_w"].shape[0]
    prep["tgat_wl"] = p["tgat_lin_w"][:, :K].T.astype(f32)          # (K, Et)
    prep["tgat_wr"] = p["tgat_lin_w"][:, K:].T.astype(f32)          # (K, Et)
    prep["tgat_bl"] = p["tgat_lin_b"].reshape(1, Et).astype(f32)
    prep["tgat_a"] = p["tgat_a"].reshape(1, Et).astype(f32)
    prep["tgat_bias"] = p["tgat_bias"].astype(f32)                  # (N, N)
    # Encoder GRU: FUSED gate weights, PyTorch gate order [r | z | n] along cols.
    prep["enc_wih"] = p["gru_w_ih"].T.astype(f32)                   # (3K, 3H)
    prep["enc_bih"] = p["gru_b_ih"].reshape(1, H3).astype(f32)
    prep["enc_whh"] = p["gru_w_hh"].T.astype(f32)                   # (HID, 3H)
    prep["enc_bhh"] = p["gru_b_hh"].reshape(1, H3).astype(f32)
    # Forecasting MLP: stack the FC_LAYERS hidden linears, keep output linear apart.
    prep["fc_wh"] = jnp.stack([w.T for w, _ in p["fc_layers"][:-1]]).astype(f32)  # (FC_LAYERS, HID, HID)
    prep["fc_bh"] = jnp.stack([b.reshape(1, HID) for _, b in p["fc_layers"][:-1]]).astype(f32)
    prep["fc_wo"] = p["fc_layers"][-1][0].T.astype(f32)                            # (HID, OUT)
    prep["fc_bo"] = p["fc_layers"][-1][1].reshape(1, OUT).astype(f32)
    # Decoder GRU: fold the reference's
    #     h_rep = h_end.repeat_interleave(N, dim=1).view(B, N, HID)
    # quirk (h_rep[b,t,k] = h_end[b, (t*HID+k)//N]) into effective input weights,
    # laid out time-major with a 128-aligned [r|z|n] chunk per timestep:
    #     xd[b, t*TCH + g*HID + h] = (u_t @ W_ih_g^T + b_ih_g)[b, h]
    t_idx = jnp.arange(N)[:, None]
    k_idx = jnp.arange(HID)[None, :]
    src_k = (t_idx * HID + k_idx) // N                               # (N, HID)
    sel = (src_k[None, :, :] == jnp.arange(HID)[:, None, None]).astype(f32)   # (HID_src, N, HID_k)
    w_ih_t = jnp.transpose(p["rec_w_ih"].reshape(3, HID, HID), (0, 2, 1))     # (3, HID_k, HID_out)
    w_eff = jnp.einsum("ptk,gkh->ptgh", sel, w_ih_t).reshape(HID, N, H3)      # (HID_src, N, 3H)
    w_eff = jnp.pad(w_eff, ((0, 0), (0, 0), (0, TCH - H3)))
    prep["dec_weff"] = w_eff.reshape(HID, N * TCH).astype(f32)                # (HID, N*TCH)
    b_ih = jnp.pad(p["rec_b_ih"].reshape(1, H3), ((0, 0), (0, TCH - H3)))
    prep["dec_bih"] = jnp.tile(b_ih, (1, N)).astype(f32)                      # (1, N*TCH)
    prep["dec_whh"] = p["rec_w_hh"].T.astype(f32)                             # (HID, 3H)
    prep["dec_bhh"] = p["rec_b_hh"].reshape(1, H3).astype(f32)
    prep["rec_w"] = p["rec_fc_w"].T.astype(f32)                               # (HID, OUT)
    prep["rec_b"] = p["rec_fc_b"].reshape(1, OUT).astype(f32)
    return prep


# ---------------------------------------------------------------------------
# Full MTAD-GAT forward: one fused pallas_call
# ---------------------------------------------------------------------------
def mtad_gat_forward(x, prep):
    """x: (B, N, K) -> (predictions (B, OUT), recons (B, N, OUT))."""
    # Same-padding + im2col are layout plumbing: build them wrapper-side so the
    # kernel's conv is a single dense matmul (no overlapping sublane slices).
    xp = jnp.pad(x, ((0, 0), (PAD, PAD), (0, 0)))
    xim = jnp.concatenate([xp[:, j:j + N, :] for j in range(KS)],
                          axis=-1).reshape(B * N, KS * K)            # (B*N, KS*K), b-major rows
    out_shape = (jax.ShapeDtypeStruct((B, OUT), jnp.float32),
                 jax.ShapeDtypeStruct((N * B, OUT), jnp.float32))
    preds, rec_flat = pl.pallas_call(
        mtad_gat_kernel,
        out_shape=out_shape,
        scratch_shapes=[
            pltpu.VMEM((N * B, H3), jnp.float32),   # encoder gate input projections, time-major
        ],
    )(xim,
      prep["conv_w"], prep["conv_b"], prep["perm"],
      prep["fgat_wl"], prep["fgat_wr"], prep["fgat_bl"], prep["fgat_a"], prep["fgat_bias"],
      prep["tgat_wl"], prep["tgat_wr"], prep["tgat_bl"], prep["tgat_a"], prep["tgat_bias"],
      prep["enc_wih"], prep["enc_bih"], prep["enc_whh"], prep["enc_bhh"],
      prep["fc_wh"], prep["fc_bh"], prep["fc_wo"], prep["fc_bo"],
      prep["dec_weff"], prep["dec_bih"], prep["dec_whh"], prep["dec_bhh"],
      prep["rec_w"], prep["rec_b"])
    # rows of rec_flat are ordered (t, b)
    recons = jnp.transpose(rec_flat.reshape(N, B, OUT), (1, 0, 2))
    return preds, recons


if __name__ == "__main__":
    key = jax.random.PRNGKey(0)
    kx, kp = jax.random.split(key)
    x = jax.random.normal(kx, (B, N, K), jnp.float32)
    params = init_params(kp)
    prep = preprocess_params(params)          # one-time weight repacking (hoisted)

    fwd = jax.jit(mtad_gat_forward)
    preds, recons = fwd(x, prep)
    jax.block_until_ready((preds, recons))

    assert preds.shape == (B, OUT), preds.shape
    assert recons.shape == (B, N, OUT), recons.shape
    assert bool(jnp.all(jnp.isfinite(preds))) and bool(jnp.all(jnp.isfinite(recons)))
    print("KERNEL_OK")
</pallas_src>

<mosaic_0001>
module attributes {stable_mosaic.version = 11 : i64} {
  func.func @mtad_gat_kernel(%arg0: memref<16x28xf32, #tpu.memory_space<vmem>>, %arg1: memref<28x4xf32, #tpu.memory_space<vmem>>, %arg2: memref<1x4xf32, #tpu.memory_space<vmem>>, %arg3: memref<16x16xf32, #tpu.memory_space<vmem>>, %arg4: memref<8x16xf32, #tpu.memory_space<vmem>>, %arg5: memref<8x16xf32, #tpu.memory_space<vmem>>, %arg6: memref<1x16xf32, #tpu.memory_space<vmem>>, %arg7: memref<1x16xf32, #tpu.memory_space<vmem>>, %arg8: memref<4x4xf32, #tpu.memory_space<vmem>>, %arg9: memref<4x8xf32, #tpu.memory_space<vmem>>, %arg10: memref<4x8xf32, #tpu.memory_space<vmem>>, %arg11: memref<1x8xf32, #tpu.memory_space<vmem>>, %arg12: memref<1x8xf32, #tpu.memory_space<vmem>>, %arg13: memref<8x8xf32, #tpu.memory_space<vmem>>, %arg14: memref<12x96xf32, #tpu.memory_space<vmem>>, %arg15: memref<1x96xf32, #tpu.memory_space<vmem>>, %arg16: memref<32x96xf32, #tpu.memory_space<vmem>>, %arg17: memref<1x96xf32, #tpu.memory_space<vmem>>, %arg18: memref<3x32x32xf32, #tpu.memory_space<vmem>>, %arg19: memref<3x1x32xf32, #tpu.memory_space<vmem>>, %arg20: memref<32x4xf32, #tpu.memory_space<vmem>>, %arg21: memref<1x4xf32, #tpu.memory_space<vmem>>, %arg22: memref<32x1024xf32, #tpu.memory_space<vmem>>, %arg23: memref<1x1024xf32, #tpu.memory_space<vmem>>, %arg24: memref<32x96xf32, #tpu.memory_space<vmem>>, %arg25: memref<1x96xf32, #tpu.memory_space<vmem>>, %arg26: memref<32x4xf32, #tpu.memory_space<vmem>>, %arg27: memref<1x4xf32, #tpu.memory_space<vmem>>, %arg28: memref<2x4xf32, #tpu.memory_space<vmem>>, %arg29: memref<16x4xf32, #tpu.memory_space<vmem>>, %arg30: memref<16x96xf32, #tpu.memory_space<vmem>>) attributes {dimension_semantics = [], scalar_prefetch = 0 : i64, scratch_operands = 1 : i64, tpu.core_type = #tpu.core_type<tc>} {
    %c0 = arith.constant 0 : index
    %c0_0 = arith.constant 0 : index
    %0 = vector.load %arg0[%c0, %c0_0] : memref<16x28xf32, #tpu.memory_space<vmem>>, vector<16x28xf32>
    %c0_1 = arith.constant 0 : index
    %c0_2 = arith.constant 0 : index
    %1 = vector.load %arg1[%c0_1, %c0_2] : memref<28x4xf32, #tpu.memory_space<vmem>>, vector<28x4xf32>
    %cst = arith.constant dense<0.000000e+00> : vector<16x4xf32>
    %2 = tpu.matmul %0, %1, %cst {dimension_numbers = #tpu.dot_dimension_numbers<[1], [0], [0], [1], [0, 0, 1, 1], [], []>} : vector<16x28xf32>, vector<28x4xf32>, vector<16x4xf32> -> vector<16x4xf32>
    %c0_3 = arith.constant 0 : index
    %c0_4 = arith.constant 0 : index
    %3 = vector.load %arg2[%c0_3, %c0_4] : memref<1x4xf32, #tpu.memory_space<vmem>>, vector<1x4xf32>
    %4 = vector.broadcast %3 : vector<1x4xf32> to vector<16x4xf32>
    %5 = arith.addf %2, %4 : vector<16x4xf32>
    %cst_5 = arith.constant 0.000000e+00 : f32
    %6 = vector.broadcast %cst_5 : f32 to vector<16x4xf32>
    %7 = arith.maximumf %5, %6 : vector<16x4xf32>
    %c0_6 = arith.constant 0 : index
    %c0_7 = arith.constant 0 : index
    %8 = vector.load %arg4[%c0_6, %c0_7] : memref<8x16xf32, #tpu.memory_space<vmem>>, vector<8x16xf32>
    %c0_8 = arith.constant 0 : index
    %c0_9 = arith.constant 0 : index
    %9 = vector.load %arg5[%c0_8, %c0_9] : memref<8x16xf32, #tpu.memory_space<vmem>>, vector<8x16xf32>
    %c0_10 = arith.constant 0 : index
    %c0_11 = arith.constant 0 : index
    %10 = vector.load %arg6[%c0_10, %c0_11] : memref<1x16xf32, #tpu.memory_space<vmem>>, vector<1x16xf32>
    %c0_12 = arith.constant 0 : index
    %c0_13 = arith.constant 0 : index
    %11 = vector.load %arg7[%c0_12, %c0_13] : memref<1x16xf32, #tpu.memory_space<vmem>>, vector<1x16xf32>
    %c0_14 = arith.constant 0 : index
    %c0_15 = arith.constant 0 : index
    %12 = vector.load %arg8[%c0_14, %c0_15] : memref<4x4xf32, #tpu.memory_space<vmem>>, vector<4x4xf32>
    %c0_16 = arith.constant 0 : index
    %c0_17 = arith.constant 0 : index
    %13 = vector.load %arg9[%c0_16, %c0_17] : memref<4x8xf32, #tpu.memory_space<vmem>>, vector<4x8xf32>
    %c0_18 = arith.constant 0 : index
    %c0_19 = arith.constant 0 : index
    %14 = vector.load %arg10[%c0_18, %c0_19] : memref<4x8xf32, #tpu.memory_space<vmem>>, vector<4x8xf32>
    %c0_20 = arith.constant 0 : index
    %c0_21 = arith.constant 0 : index
    %15 = vector.load %arg11[%c0_20, %c0_21] : memref<1x8xf32, #tpu.memory_space<vmem>>, vector<1x8xf32>
    %c0_22 = arith.constant 0 : index
    %c0_23 = arith.constant 0 : index
    %16 = vector.load %arg12[%c0_22, %c0_23] : memref<1x8xf32, #tpu.memory_space<vmem>>, vector<1x8xf32>
    %c0_24 = arith.constant 0 : index
    %c0_25 = arith.constant 0 : index
    %17 = vector.load %arg13[%c0_24, %c0_25] : memref<8x8xf32, #tpu.memory_space<vmem>>, vector<8x8xf32>
    %18 = vector.extract_strided_slice %7 {offsets = [0, 0], sizes = [8, 4], strides = [1, 1]} : vector<16x4xf32> to vector<8x4xf32>
    %19 = tpu.transpose %18, [1, 0] : vector<8x4xf32> -> vector<4x8xf32>
    %cst_26 = arith.constant dense<0.000000e+00> : vector<4x16xf32>
    %20 = tpu.matmul %19, %8, %cst_26 {dimension_numbers = #tpu.dot_dimension_numbers<[1], [0], [0], [1], [0, 0, 1, 1], [], []>} : vector<4x8xf32>, vector<8x16xf32>, vector<4x16xf32> -> vector<4x16xf32>
    %21 = vector.broadcast %10 : vector<1x16xf32> to vector<4x16xf32>
    %22 = arith.addf %20, %21 : vector<4x16xf32>
    %cst_27 = arith.constant dense<0.000000e+00> : vector<4x16xf32>
    %23 = tpu.matmul %19, %9, %cst_27 {dimension_numbers = #tpu.dot_dimension_numbers<[1], [0], [0], [1], [0, 0, 1, 1], [], []>} : vector<4x8xf32>, vector<8x16xf32>, vector<4x16xf32> -> vector<4x16xf32>
    %24 = vector.shape_cast %22 : vector<4x16xf32> to vector<4x1x16xf32>
    %25 = vector.shape_cast %23 : vector<4x16xf32> to vector<1x4x16xf32>
    %26 = vector.broadcast %24 : vector<4x1x16xf32> to vector<4x4x16xf32>
    %27 = vector.broadcast %25 : vector<1x4x16xf32> to vector<4x4x16xf32>
    %28 = arith.addf %26, %27 : vector<4x4x16xf32>
    %cst_28 = arith.constant 0.000000e+00 : f32
    %29 = vector.broadcast %cst_28 : f32 to vector<4x4x16xf32>
    %30 = arith.cmpf oge, %28, %29 : vector<4x4x16xf32>
    %cst_29 = arith.constant 2.000000e-01 : f32
    %31 = vector.broadcast %cst_29 : f32 to vector<4x4x16xf32>
    %32 = arith.mulf %31, %28 : vector<4x4x16xf32>
    %33 = arith.select %30, %28, %32 : vector<4x4x16xi1>, vector<4x4x16xf32>
    %34 = vector.shape_cast %11 : vector<1x16xf32> to vector<1x1x16xf32>
    %35 = vector.broadcast %34 : vector<1x1x16xf32> to vector<4x4x16xf32>
    %36 = arith.mulf %33, %35 : vector<4x4x16xf32>
    %cst_30 = arith.constant dense<0.000000e+00> : vector<4x4xf32>
    %37 = vector.multi_reduction <add>, %36, %cst_30 [2] : vector<4x4x16xf32> to vector<4x4xf32>
    %38 = arith.addf %37, %12 : vector<4x4xf32>
    %cst_31 = arith.constant dense<0xFF800000> : vector<4xf32>
    %39 = vector.multi_reduction <maximumf>, %38, %cst_31 [1] : vector<4x4xf32> to vector<4xf32>
    %40 = vector.shape_cast %39 : vector<4xf32> to vector<4x1xf32>
    %41 = vector.broadcast %40 : vector<4x1xf32> to vector<4x4xf32>
    %42 = arith.subf %38, %41 : vector<4x4xf32>
    %43 = math.exp %42 : vector<4x4xf32>
    %cst_32 = arith.constant dense<0.000000e+00> : vector<4xf32>
    %44 = vector.multi_reduction <add>, %43, %cst_32 [1] : vector<4x4xf32> to vector<4xf32>
    %45 = vector.shape_cast %44 : vector<4xf32> to vector<4x1xf32>
    %46 = vector.broadcast %45 : vector<4x1xf32> to vector<4x4xf32>
    %47 = arith.divf %43, %46 : vector<4x4xf32>
    %cst_33 = arith.constant dense<0.000000e+00> : vector<4x8xf32>
    %48 = tpu.matmul %47, %19, %cst_33 {dimension_numbers = #tpu.dot_dimension_numbers<[1], [0], [0], [1], [0, 0, 1, 1], [], []>} : vector<4x4xf32>, vector<4x8xf32>, vector<4x8xf32> -> vector<4x8xf32>
    %49 = arith.negf %48 : vector<4x8xf32>
    %50 = math.exp %49 : vector<4x8xf32>
    %cst_34 = arith.constant 1.000000e+00 : f32
    %51 = vector.broadcast %cst_34 : f32 to vector<4x8xf32>
    %52 = arith.addf %51, %50 : vector<4x8xf32>
    %53 = arith.divf %51, %52 : vector<4x8xf32>
    %54 = tpu.transpose %53, [1, 0] : vector<4x8xf32> -> vector<8x4xf32>
    %cst_35 = arith.constant dense<0.000000e+00> : vector<8x8xf32>
    %55 = tpu.matmul %18, %13, %cst_35 {dimension_numbers = #tpu.dot_dimension_numbers<[1], [0], [0], [1], [0, 0, 1, 1], [], []>} : vector<8x4xf32>, vector<4x8xf32>, vector<8x8xf32> -> vector<8x8xf32>
    %56 = vector.broadcast %15 : vector<1x8xf32> to vector<8x8xf32>
    %57 = arith.addf %55, %56 : vector<8x8xf32>
    %cst_36 = arith.constant dense<0.000000e+00> : vector<8x8xf32>
    %58 = tpu.matmul %18, %14, %cst_36 {dimension_numbers = #tpu.dot_dimension_numbers<[1], [0], [0], [1], [0, 0, 1, 1], [], []>} : vector<8x4xf32>, vector<4x8xf32>, vector<8x8xf32> -> vector<8x8xf32>
    %59 = vector.shape_cast %57 : vector<8x8xf32> to vector<8x1x8xf32>
    %60 = vector.shape_cast %58 : vector<8x8xf32> to vector<1x8x8xf32>
    %61 = vector.broadcast %59 : vector<8x1x8xf32> to vector<8x8x8xf32>
    %62 = vector.broadcast %60 : vector<1x8x8xf32> to vector<8x8x8xf32>
    %63 = arith.addf %61, %62 : vector<8x8x8xf32>
    %cst_37 = arith.constant 0.000000e+00 : f32
    %64 = vector.broadcast %cst_37 : f32 to vector<8x8x8xf32>
    %65 = arith.cmpf oge, %63, %64 : vector<8x8x8xf32>
    %cst_38 = arith.constant 2.000000e-01 : f32
    %66 = vector.broadcast %cst_38 : f32 to vector<8x8x8xf32>
    %67 = arith.mulf %66, %63 : vector<8x8x8xf32>
    %68 = arith.select %65, %63, %67 : vector<8x8x8xi1>, vector<8x8x8xf32>
    %69 = vector.shape_cast %16 : vector<1x8xf32> to vector<1x1x8xf32>
    %70 = vector.broadcast %69 : vector<1x1x8xf32> to vector<8x8x8xf32>
    %71 = arith.mulf %68, %70 : vector<8x8x8xf32>
    %cst_39 = arith.constant dense<0.000000e+00> : vector<8x8xf32>
    %72 = vector.multi_reduction <add>, %71, %cst_39 [2] : vector<8x8x8xf32> to vector<8x8xf32>
    %73 = arith.addf %72, %17 : vector<8x8xf32>
    %cst_40 = arith.constant dense<0xFF800000> : vector<8xf32>
    %74 = vector.multi_reduction <maximumf>, %73, %cst_40 [1] : vector<8x8xf32> to vector<8xf32>
    %75 = vector.shape_cast %74 : vector<8xf32> to vector<8x1xf32>
    %76 = vector.broadcast %75 : vector<8x1xf32> to vector<8x8xf32>
    %77 = arith.subf %73, %76 : vector<8x8xf32>
    %78 = math.exp %77 : vector<8x8xf32>
    %cst_41 = arith.constant dense<0.000000e+00> : vector<8xf32>
    %79 = vector.multi_reduction <add>, %78, %cst_41 [1] : vector<8x8xf32> to vector<8xf32>
    %80 = vector.shape_cast %79 : vector<8xf32> to vector<8x1xf32>
    %81 = vector.broadcast %80 : vector<8x1xf32> to vector<8x8xf32>
    %82 = arith.divf %78, %81 : vector<8x8xf32>
    %cst_42 = arith.constant dense<0.000000e+00> : vector<8x4xf32>
    %83 = tpu.matmul %82, %18, %cst_42 {dimension_numbers = #tpu.dot_dimension_numbers<[1], [0], [0], [1], [0, 0, 1, 1], [], []>} : vector<8x8xf32>, vector<8x4xf32>, vector<8x4xf32> -> vector<8x4xf32>
    %84 = arith.negf %83 : vector<8x4xf32>
    %85 = math.exp %84 : vector<8x4xf32>
    %cst_43 = arith.constant 1.000000e+00 : f32
    %86 = vector.broadcast %cst_43 : f32 to vector<8x4xf32>
    %87 = arith.addf %86, %85 : vector<8x4xf32>
    %88 = arith.divf %86, %87 : vector<8x4xf32>
    %89 = tpu.concatenate %18, %54, %88 in 1 : vector<8x4xf32>, vector<8x4xf32>, vector<8x4xf32> -> vector<8x12xf32>
    %90 = vector.extract_strided_slice %7 {offsets = [8, 0], sizes = [8, 4], strides = [1, 1]} : vector<16x4xf32> to vector<8x4xf32>
    %91 = tpu.transpose %90, [1, 0] : vector<8x4xf32> -> vector<4x8xf32>
    %cst_44 = arith.constant dense<0.000000e+00> : vector<4x16xf32>
    %92 = tpu.matmul %91, %8, %cst_44 {dimension_numbers = #tpu.dot_dimension_numbers<[1], [0], [0], [1], [0, 0, 1, 1], [], []>} : vector<4x8xf32>, vector<8x16xf32>, vector<4x16xf32> -> vector<4x16xf32>
    %93 = vector.broadcast %10 : vector<1x16xf32> to vector<4x16xf32>
    %94 = arith.addf %92, %93 : vector<4x16xf32>
    %cst_45 = arith.constant dense<0.000000e+00> : vector<4x16xf32>
    %95 = tpu.matmul %91, %9, %cst_45 {dimension_numbers = #tpu.dot_dimension_numbers<[1], [0], [0], [1], [0, 0, 1, 1], [], []>} : vector<4x8xf32>, vector<8x16xf32>, vector<4x16xf32> -> vector<4x16xf32>
    %96 = vector.shape_cast %94 : vector<4x16xf32> to vector<4x1x16xf32>
    %97 = vector.shape_cast %95 : vector<4x16xf32> to vector<1x4x16xf32>
    %98 = vector.broadcast %96 : vector<4x1x16xf32> to vector<4x4x16xf32>
    %99 = vector.broadcast %97 : vector<1x4x16xf32> to vector<4x4x16xf32>
    %100 = arith.addf %98, %99 : vector<4x4x16xf32>
    %cst_46 = arith.constant 0.000000e+00 : f32
    %101 = vector.broadcast %cst_46 : f32 to vector<4x4x16xf32>
    %102 = arith.cmpf oge, %100, %101 : vector<4x4x16xf32>
    %cst_47 = arith.constant 2.000000e-01 : f32
    %103 = vector.broadcast %cst_47 : f32 to vector<4x4x16xf32>
    %104 = arith.mulf %103, %100 : vector<4x4x16xf32>
    %105 = arith.select %102, %100, %104 : vector<4x4x16xi1>, vector<4x4x16xf32>
    %106 = vector.shape_cast %11 : vector<1x16xf32> to vector<1x1x16xf32>
    %107 = vector.broadcast %106 : vector<1x1x16xf32> to vector<4x4x16xf32>
    %108 = arith.mulf %105, %107 : vector<4x4x16xf32>
    %cst_48 = arith.constant dense<0.000000e+00> : vector<4x4xf32>
    %109 = vector.multi_reduction <add>, %108, %cst_48 [2] : vector<4x4x16xf32> to vector<4x4xf32>
    %110 = arith.addf %109, %12 : vector<4x4xf32>
    %cst_49 = arith.constant dense<0xFF800000> : vector<4xf32>
    %111 = vector.multi_reduction <maximumf>, %110, %cst_49 [1] : vector<4x4xf32> to vector<4xf32>
    %112 = vector.shape_cast %111 : vector<4xf32> to vector<4x1xf32>
    %113 = vector.broadcast %112 : vector<4x1xf32> to vector<4x4xf32>
    %114 = arith.subf %110, %113 : vector<4x4xf32>
    %115 = math.exp %114 : vector<4x4xf32>
    %cst_50 = arith.constant dense<0.000000e+00> : vector<4xf32>
    %116 = vector.multi_reduction <add>, %115, %cst_50 [1] : vector<4x4xf32> to vector<4xf32>
    %117 = vector.shape_cast %116 : vector<4xf32> to vector<4x1xf32>
    %118 = vector.broadcast %117 : vector<4x1xf32> to vector<4x4xf32>
    %119 = arith.divf %115, %118 : vector<4x4xf32>
    %cst_51 = arith.constant dense<0.000000e+00> : vector<4x8xf32>
    %120 = tpu.matmul %119, %91, %cst_51 {dimension_numbers = #tpu.dot_dimension_numbers<[1], [0], [0], [1], [0, 0, 1, 1], [], []>} : vector<4x4xf32>, vector<4x8xf32>, vector<4x8xf32> -> vector<4x8xf32>
    %121 = arith.negf %120 : vector<4x8xf32>
    %122 = math.exp %121 : vector<4x8xf32>
    %cst_52 = arith.constant 1.000000e+00 : f32
    %123 = vector.broadcast %cst_52 : f32 to vector<4x8xf32>
    %124 = arith.addf %123, %122 : vector<4x8xf32>
    %125 = arith.divf %123, %124 : vector<4x8xf32>
    %126 = tpu.transpose %125, [1, 0] : vector<4x8xf32> -> vector<8x4xf32>
    %cst_53 = arith.constant dense<0.000000e+00> : vector<8x8xf32>
    %127 = tpu.matmul %90, %13, %cst_53 {dimension_numbers = #tpu.dot_dimension_numbers<[1], [0], [0], [1], [0, 0, 1, 1], [], []>} : vector<8x4xf32>, vector<4x8xf32>, vector<8x8xf32> -> vector<8x8xf32>
    %128 = vector.broadcast %15 : vector<1x8xf32> to vector<8x8xf32>
    %129 = arith.addf %127, %128 : vector<8x8xf32>
    %cst_54 = arith.constant dense<0.000000e+00> : vector<8x8xf32>
    %130 = tpu.matmul %90, %14, %cst_54 {dimension_numbers = #tpu.dot_dimension_numbers<[1], [0], [0], [1], [0, 0, 1, 1], [], []>} : vector<8x4xf32>, vector<4x8xf32>, vector<8x8xf32> -> vector<8x8xf32>
    %131 = vector.shape_cast %129 : vector<8x8xf32> to vector<8x1x8xf32>
    %132 = vector.shape_cast %130 : vector<8x8xf32> to vector<1x8x8xf32>
    %133 = vector.broadcast %131 : vector<8x1x8xf32> to vector<8x8x8xf32>
    %134 = vector.broadcast %132 : vector<1x8x8xf32> to vector<8x8x8xf32>
    %135 = arith.addf %133, %134 : vector<8x8x8xf32>
    %cst_55 = arith.constant 0.000000e+00 : f32
    %136 = vector.broadcast %cst_55 : f32 to vector<8x8x8xf32>
    %137 = arith.cmpf oge, %135, %136 : vector<8x8x8xf32>
    %cst_56 = arith.constant 2.000000e-01 : f32
    %138 = vector.broadcast %cst_56 : f32 to vector<8x8x8xf32>
    %139 = arith.mulf %138, %135 : vector<8x8x8xf32>
    %140 = arith.select %137, %135, %139 : vector<8x8x8xi1>, vector<8x8x8xf32>
    %141 = vector.shape_cast %16 : vector<1x8xf32> to vector<1x1x8xf32>
    %142 = vector.broadcast %141 : vector<1x1x8xf32> to vector<8x8x8xf32>
    %143 = arith.mulf %140, %142 : vector<8x8x8xf32>
    %cst_57 = arith.constant dense<0.000000e+00> : vector<8x8xf32>
    %144 = vector.multi_reduction <add>, %143, %cst_57 [2] : vector<8x8x8xf32> to vector<8x8xf32>
    %145 = arith.addf %144, %17 : vector<8x8xf32>
    %cst_58 = arith.constant dense<0xFF800000> : vector<8xf32>
    %146 = vector.multi_reduction <maximumf>, %145, %cst_58 [1] : vector<8x8xf32> to vector<8xf32>
    %147 = vector.shape_cast %146 : vector<8xf32> to vector<8x1xf32>
    %148 = vector.broadcast %147 : vector<8x1xf32> to vector<8x8xf32>
    %149 = arith.subf %145, %148 : vector<8x8xf32>
    %150 = math.exp %149 : vector<8x8xf32>
    %cst_59 = arith.constant dense<0.000000e+00> : vector<8xf32>
    %151 = vector.multi_reduction <add>, %150, %cst_59 [1] : vector<8x8xf32> to vector<8xf32>
    %152 = vector.shape_cast %151 : vector<8xf32> to vector<8x1xf32>
    %153 = vector.broadcast %152 : vector<8x1xf32> to vector<8x8xf32>
    %154 = arith.divf %150, %153 : vector<8x8xf32>
    %cst_60 = arith.constant dense<0.000000e+00> : vector<8x4xf32>
    %155 = tpu.matmul %154, %90, %cst_60 {dimension_numbers = #tpu.dot_dimension_numbers<[1], [0], [0], [1], [0, 0, 1, 1], [], []>} : vector<8x8xf32>, vector<8x4xf32>, vector<8x4xf32> -> vector<8x4xf32>
    %156 = arith.negf %155 : vector<8x4xf32>
    %157 = math.exp %156 : vector<8x4xf32>
    %cst_61 = arith.constant 1.000000e+00 : f32
    %158 = vector.broadcast %cst_61 : f32 to vector<8x4xf32>
    %159 = arith.addf %158, %157 : vector<8x4xf32>
    %160 = arith.divf %158, %159 : vector<8x4xf32>
    %161 = tpu.concatenate %90, %126, %160 in 1 : vector<8x4xf32>, vector<8x4xf32>, vector<8x4xf32> -> vector<8x12xf32>
    %162 = tpu.concatenate %89, %161 in 0 : vector<8x12xf32>, vector<8x12xf32> -> vector<16x12xf32>
    %c0_62 = arith.constant 0 : index
    %c0_63 = arith.constant 0 : index
    %163 = vector.load %arg14[%c0_62, %c0_63] : memref<12x96xf32, #tpu.memory_space<vmem>>, vector<12x96xf32>
    %cst_64 = arith.constant dense<0.000000e+00> : vector<16x96xf32>
    %164 = tpu.matmul %162, %163, %cst_64 {dimension_numbers = #tpu.dot_dimension_numbers<[1], [0], [0], [1], [0, 0, 1, 1], [], []>} : vector<16x12xf32>, vector<12x96xf32>, vector<16x96xf32> -> vector<16x96xf32>
    %c0_65 = arith.constant 0 : index
    %c0_66 = arith.constant 0 : index
    %165 = vector.load %arg15[%c0_65, %c0_66] : memref<1x96xf32, #tpu.memory_space<vmem>>, vector<1x96xf32>
    %166 = vector.broadcast %165 : vector<1x96xf32> to vector<16x96xf32>
    %167 = arith.addf %164, %166 : vector<16x96xf32>
    %c0_67 = arith.constant 0 : index
    %c0_68 = arith.constant 0 : index
    %168 = vector.load %arg3[%c0_67, %c0_68] : memref<16x16xf32, #tpu.memory_space<vmem>>, vector<16x16xf32>
    %cst_69 = arith.constant dense<0.000000e+00> : vector<16x96xf32>
    %169 = tpu.matmul %168, %167, %cst_69 {dimension_numbers = #tpu.dot_dimension_numbers<[1], [0], [0], [1], [0, 0, 1, 1], [], []>} : vector<16x16xf32>, vector<16x96xf32>, vector<16x96xf32> -> vector<16x96xf32>
    %c0_70 = arith.constant 0 : index
    %c0_71 = arith.constant 0 : index
    %170 = vector.load %arg30[%c0_70, %c0_71] : memref<16x96xf32, #tpu.memory_space<vmem>>, vector<16x96xf32>
    tpu.vector_store %arg30[%c0_70, %c0_71], %169 {strides = array<i32>} : memref<16x96xf32, #tpu.memory_space<vmem>>, vector<16x96xf32>,
    %c0_72 = arith.constant 0 : index
    %c0_73 = arith.constant 0 : index
    %171 = vector.load %arg16[%c0_72, %c0_73] : memref<32x96xf32, #tpu.memory_space<vmem>>, vector<32x96xf32>
    %c0_74 = arith.constant 0 : index
    %c0_75 = arith.constant 0 : index
    %172 = vector.load %arg17[%c0_74, %c0_75] : memref<1x96xf32, #tpu.memory_space<vmem>>, vector<1x96xf32>
    %cst_76 = arith.constant 0.000000e+00 : f32
    %173 = vector.broadcast %cst_76 : f32 to vector<2x32xf32>
    %c0_77 = arith.constant 0 : index
    %c0_78 = arith.constant 0 : index
    %174 = vector.load %arg30[%c0_77, %c0_78] : memref<16x96xf32, #tpu.memory_space<vmem>>, vector<2x96xf32>
    %cst_79 = arith.constant dense<0.000000e+00> : vector<2x96xf32>
    %175 = tpu.matmul %173, %171, %cst_79 {dimension_numbers = #tpu.dot_dimension_numbers<[1], [0], [0], [1], [0, 0, 1, 1], [], []>} : vector<2x32xf32>, vector<32x96xf32>, vector<2x96xf32> -> vector<2x96xf32>
    %176 = vector.broadcast %172 : vector<1x96xf32> to vector<2x96xf32>
    %177 = arith.addf %175, %176 : vector<2x96xf32>
    %178 = vector.extract_strided_slice %174 {offsets = [0, 0], sizes = [2, 64], strides = [1, 1]} : vector<2x96xf32> to vector<2x64xf32>
    %179 = vector.extract_strided_slice %177 {offsets = [0, 0], sizes = [2, 64], strides = [1, 1]} : vector<2x96xf32> to vector<2x64xf32>
    %180 = arith.addf %178, %179 : vector<2x64xf32>
    %181 = arith.negf %180 : vector<2x64xf32>
    %182 = math.exp %181 : vector<2x64xf32>
    %cst_80 = arith.constant 1.000000e+00 : f32
    %183 = vector.broadcast %cst_80 : f32 to vector<2x64xf32>
    %184 = arith.addf %183, %182 : vector<2x64xf32>
    %185 = arith.divf %183, %184 : vector<2x64xf32>
    %186 = vector.extract_strided_slice %185 {offsets = [0, 0], sizes = [2, 32], strides = [1, 1]} : vector<2x64xf32> to vector<2x32xf32>
    %187 = vector.extract_strided_slice %185 {offsets = [0, 32], sizes = [2, 32], strides = [1, 1]} : vector<2x64xf32> to vector<2x32xf32>
    %188 = vector.extract_strided_slice %174 {offsets = [0, 64], sizes = [2, 32], strides = [1, 1]} : vector<2x96xf32> to vector<2x32xf32>
    %189 = vector.extract_strided_slice %177 {offsets = [0, 64], sizes = [2, 32], strides = [1, 1]} : vector<2x96xf32> to vector<2x32xf32>
    %190 = arith.mulf %186, %189 : vector<2x32xf32>
    %191 = arith.addf %188, %190 : vector<2x32xf32>
    %192 = math.tanh %191 : vector<2x32xf32>
    %cst_81 = arith.constant 1.000000e+00 : f32
    %193 = vector.broadcast %cst_81 : f32 to vector<2x32xf32>
    %194 = arith.subf %193, %187 : vector<2x32xf32>
    %195 = arith.mulf %194, %192 : vector<2x32xf32>
    %196 = arith.mulf %187, %173 : vector<2x32xf32>
    %197 = arith.addf %195, %196 : vector<2x32xf32>
    %c2 = arith.constant 2 : index
    %c0_82 = arith.constant 0 : index
    %198 = vector.load %arg30[%c2, %c0_82] : memref<16x96xf32, #tpu.memory_space<vmem>>, vector<2x96xf32>
    %cst_83 = arith.constant dense<0.000000e+00> : vector<2x96xf32>
    %199 = tpu.matmul %197, %171, %cst_83 {dimension_numbers = #tpu.dot_dimension_numbers<[1], [0], [0], [1], [0, 0, 1, 1], [], []>} : vector<2x32xf32>, vector<32x96xf32>, vector<2x96xf32> -> vector<2x96xf32>
    %200 = vector.broadcast %172 : vector<1x96xf32> to vector<2x96xf32>
    %201 = arith.addf %199, %200 : vector<2x96xf32>
    %202 = vector.extract_strided_slice %198 {offsets = [0, 0], sizes = [2, 64], strides = [1, 1]} : vector<2x96xf32> to vector<2x64xf32>
    %203 = vector.extract_strided_slice %201 {offsets = [0, 0], sizes = [2, 64], strides = [1, 1]} : vector<2x96xf32> to vector<2x64xf32>
    %204 = arith.addf %202, %203 : vector<2x64xf32>
    %205 = arith.negf %204 : vector<2x64xf32>
    %206 = math.exp %205 : vector<2x64xf32>
    %cst_84 = arith.constant 1.000000e+00 : f32
    %207 = vector.broadcast %cst_84 : f32 to vector<2x64xf32>
    %208 = arith.addf %207, %206 : vector<2x64xf32>
    %209 = arith.divf %207, %208 : vector<2x64xf32>
    %210 = vector.extract_strided_slice %209 {offsets = [0, 0], sizes = [2, 32], strides = [1, 1]} : vector<2x64xf32> to vector<2x32xf32>
    %211 = vector.extract_strided_slice %209 {offsets = [0, 32], sizes = [2, 32], strides = [1, 1]} : vector<2x64xf32> to vector<2x32xf32>
    %212 = vector.extract_strided_slice %198 {offsets = [0, 64], sizes = [2, 32], strides = [1, 1]} : vector<2x96xf32> to vector<2x32xf32>
    %213 = vector.extract_strided_slice %201 {offsets = [0, 64], sizes = [2, 32], strides = [1, 1]} : vector<2x96xf32> to vector<2x32xf32>
    %214 = arith.mulf %210, %213 : vector<2x32xf32>
    %215 = arith.addf %212, %214 : vector<2x32xf32>
    %216 = math.tanh %215 : vector<2x32xf32>
    %cst_85 = arith.constant 1.000000e+00 : f32
    %217 = vector.broadcast %cst_85 : f32 to vector<2x32xf32>
    %218 = arith.subf %217, %211 : vector<2x32xf32>
    %219 = arith.mulf %218, %216 : vector<2x32xf32>
    %220 = arith.mulf %211, %197 : vector<2x32xf32>
    %221 = arith.addf %219, %220 : vector<2x32xf32>
    %c4 = arith.constant 4 : index
    %c0_86 = arith.constant 0 : index
    %222 = vector.load %arg30[%c4, %c0_86] : memref<16x96xf32, #tpu.memory_space<vmem>>, vector<2x96xf32>
    %cst_87 = arith.constant dense<0.000000e+00> : vector<2x96xf32>
    %223 = tpu.matmul %221, %171, %cst_87 {dimension_numbers = #tpu.dot_dimension_numbers<[1], [0], [0], [1], [0, 0, 1, 1], [], []>} : vector<2x32xf32>, vector<32x96xf32>, vector<2x96xf32> -> vector<2x96xf32>
    %224 = vector.broadcast %172 : vector<1x96xf32> to vector<2x96xf32>
    %225 = arith.addf %223, %224 : vector<2x96xf32>
    %226 = vector.extract_strided_slice %222 {offsets = [0, 0], sizes = [2, 64], strides = [1, 1]} : vector<2x96xf32> to vector<2x64xf32>
    %227 = vector.extract_strided_slice %225 {offsets = [0, 0], sizes = [2, 64], strides = [1, 1]} : vector<2x96xf32> to vector<2x64xf32>
    %228 = arith.addf %226, %227 : vector<2x64xf32>
    %229 = arith.negf %228 : vector<2x64xf32>
    %230 = math.exp %229 : vector<2x64xf32>
    %cst_88 = arith.constant 1.000000e+00 : f32
    %231 = vector.broadcast %cst_88 : f32 to vector<2x64xf32>
    %232 = arith.addf %231, %230 : vector<2x64xf32>
    %233 = arith.divf %231, %232 : vector<2x64xf32>
    %234 = vector.extract_strided_slice %233 {offsets = [0, 0], sizes = [2, 32], strides = [1, 1]} : vector<2x64xf32> to vector<2x32xf32>
    %235 = vector.extract_strided_slice %233 {offsets = [0, 32], sizes = [2, 32], strides = [1, 1]} : vector<2x64xf32> to vector<2x32xf32>
    %236 = vector.extract_strided_slice %222 {offsets = [0, 64], sizes = [2, 32], strides = [1, 1]} : vector<2x96xf32> to vector<2x32xf32>
    %237 = vector.extract_strided_slice %225 {offsets = [0, 64], sizes = [2, 32], strides = [1, 1]} : vector<2x96xf32> to vector<2x32xf32>
    %238 = arith.mulf %234, %237 : vector<2x32xf32>
    %239 = arith.addf %236, %238 : vector<2x32xf32>
    %240 = math.tanh %239 : vector<2x32xf32>
    %cst_89 = arith.constant 1.000000e+00 : f32
    %241 = vector.broadcast %cst_89 : f32 to vector<2x32xf32>
    %242 = arith.subf %241, %235 : vector<2x32xf32>
    %243 = arith.mulf %242, %240 : vector<2x32xf32>
    %244 = arith.mulf %235, %221 : vector<2x32xf32>
    %245 = arith.addf %243, %244 : vector<2x32xf32>
    %c6 = arith.constant 6 : index
    %c0_90 = arith.constant 0 : index
    %246 = vector.load %arg30[%c6, %c0_90] : memref<16x96xf32, #tpu.memory_space<vmem>>, vector<2x96xf32>
    %cst_91 = arith.constant dense<0.000000e+00> : vector<2x96xf32>
    %247 = tpu.matmul %245, %171, %cst_91 {dimension_numbers = #tpu.dot_dimension_numbers<[1], [0], [0], [1], [0, 0, 1, 1], [], []>} : vector<2x32xf32>, vector<32x96xf32>, vector<2x96xf32> -> vector<2x96xf32>
    %248 = vector.broadcast %172 : vector<1x96xf32> to vector<2x96xf32>
    %249 = arith.addf %247, %248 : vector<2x96xf32>
    %250 = vector.extract_strided_slice %246 {offsets = [0, 0], sizes = [2, 64], strides = [1, 1]} : vector<2x96xf32> to vector<2x64xf32>
    %251 = vector.extract_strided_slice %249 {offsets = [0, 0], sizes = [2, 64], strides = [1, 1]} : vector<2x96xf32> to vector<2x64xf32>
    %252 = arith.addf %250, %251 : vector<2x64xf32>
    %253 = arith.negf %252 : vector<2x64xf32>
    %254 = math.exp %253 : vector<2x64xf32>
    %cst_92 = arith.constant 1.000000e+00 : f32
    %255 = vector.broadcast %cst_92 : f32 to vector<2x64xf32>
    %256 = arith.addf %255, %254 : vector<2x64xf32>
    %257 = arith.divf %255, %256 : vector<2x64xf32>
    %258 = vector.extract_strided_slice %257 {offsets = [0, 0], sizes = [2, 32], strides = [1, 1]} : vector<2x64xf32> to vector<2x32xf32>
    %259 = vector.extract_strided_slice %257 {offsets = [0, 32], sizes = [2, 32], strides = [1, 1]} : vector<2x64xf32> to vector<2x32xf32>
    %260 = vector.extract_strided_slice %246 {offsets = [0, 64], sizes = [2, 32], strides = [1, 1]} : vector<2x96xf32> to vector<2x32xf32>
    %261 = vector.extract_strided_slice %249 {offsets = [0, 64], sizes = [2, 32], strides = [1, 1]} : vector<2x96xf32> to vector<2x32xf32>
    %262 = arith.mulf %258, %261 : vector<2x32xf32>
    %263 = arith.addf %260, %262 : vector<2x32xf32>
    %264 = math.tanh %263 : vector<2x32xf32>
    %cst_93 = arith.constant 1.000000e+00 : f32
    %265 = vector.broadcast %cst_93 : f32 to vector<2x32xf32>
    %266 = arith.subf %265, %259 : vector<2x32xf32>
    %267 = arith.mulf %266, %264 : vector<2x32xf32>
    %268 = arith.mulf %259, %245 : vector<2x32xf32>
    %269 = arith.addf %267, %268 : vector<2x32xf32>
    %c8 = arith.constant 8 : index
    %c0_94 = arith.constant 0 : index
    %270 = vector.load %arg30[%c8, %c0_94] : memref<16x96xf32, #tpu.memory_space<vmem>>, vector<2x96xf32>
    %cst_95 = arith.constant dense<0.000000e+00> : vector<2x96xf32>
    %271 = tpu.matmul %269, %171, %cst_95 {dimension_numbers = #tpu.dot_dimension_numbers<[1], [0], [0], [1], [0, 0, 1, 1], [], []>} : vector<2x32xf32>, vector<32x96xf32>, vector<2x96xf32> -> vector<2x96xf32>
    %272 = vector.broadcast %172 : vector<1x96xf32> to vector<2x96xf32>
    %273 = arith.addf %271, %272 : vector<2x96xf32>
    %274 = vector.extract_strided_slice %270 {offsets = [0, 0], sizes = [2, 64], strides = [1, 1]} : vector<2x96xf32> to vector<2x64xf32>
    %275 = vector.extract_strided_slice %273 {offsets = [0, 0], sizes = [2, 64], strides = [1, 1]} : vector<2x96xf32> to vector<2x64xf32>
    %276 = arith.addf %274, %275 : vector<2x64xf32>
    %277 = arith.negf %276 : vector<2x64xf32>
    %278 = math.exp %277 : vector<2x64xf32>
    %cst_96 = arith.constant 1.000000e+00 : f32
    %279 = vector.broadcast %cst_96 : f32 to vector<2x64xf32>
    %280 = arith.addf %279, %278 : vector<2x64xf32>
    %281 = arith.divf %279, %280 : vector<2x64xf32>
    %282 = vector.extract_strided_slice %281 {offsets = [0, 0], sizes = [2, 32], strides = [1, 1]} : vector<2x64xf32> to vector<2x32xf32>
    %283 = vector.extract_strided_slice %281 {offsets = [0, 32], sizes = [2, 32], strides = [1, 1]} : vector<2x64xf32> to vector<2x32xf32>
    %284 = vector.extract_strided_slice %270 {offsets = [0, 64], sizes = [2, 32], strides = [1, 1]} : vector<2x96xf32> to vector<2x32xf32>
    %285 = vector.extract_strided_slice %273 {offsets = [0, 64], sizes = [2, 32], strides = [1, 1]} : vector<2x96xf32> to vector<2x32xf32>
    %286 = arith.mulf %282, %285 : vector<2x32xf32>
    %287 = arith.addf %284, %286 : vector<2x32xf32>
    %288 = math.tanh %287 : vector<2x32xf32>
    %cst_97 = arith.constant 1.000000e+00 : f32
    %289 = vector.broadcast %cst_97 : f32 to vector<2x32xf32>
    %290 = arith.subf %289, %283 : vector<2x32xf32>
    %291 = arith.mulf %290, %288 : vector<2x32xf32>
    %292 = arith.mulf %283, %269 : vector<2x32xf32>
    %293 = arith.addf %291, %292 : vector<2x32xf32>
    %c10 = arith.constant 10 : index
    %c0_98 = arith.constant 0 : index
    %294 = vector.load %arg30[%c10, %c0_98] : memref<16x96xf32, #tpu.memory_space<vmem>>, vector<2x96xf32>
    %cst_99 = arith.constant dense<0.000000e+00> : vector<2x96xf32>
    %295 = tpu.matmul %293, %171, %cst_99 {dimension_numbers = #tpu.dot_dimension_numbers<[1], [0], [0], [1], [0, 0, 1, 1], [], []>} : vector<2x32xf32>, vector<32x96xf32>, vector<2x96xf32> -> vector<2x96xf32>
    %296 = vector.broadcast %172 : vector<1x96xf32> to vector<2x96xf32>
    %297 = arith.addf %295, %296 : vector<2x96xf32>
    %298 = vector.extract_strided_slice %294 {offsets = [0, 0], sizes = [2, 64], strides = [1, 1]} : vector<2x96xf32> to vector<2x64xf32>
    %299 = vector.extract_strided_slice %297 {offsets = [0, 0], sizes = [2, 64], strides = [1, 1]} : vector<2x96xf32> to vector<2x64xf32>
    %300 = arith.addf %298, %299 : vector<2x64xf32>
    %301 = arith.negf %300 : vector<2x64xf32>
    %302 = math.exp %301 : vector<2x64xf32>
    %cst_100 = arith.constant 1.000000e+00 : f32
    %303 = vector.broadcast %cst_100 : f32 to vector<2x64xf32>
    %304 = arith.addf %303, %302 : vector<2x64xf32>
    %305 = arith.divf %303, %304 : vector<2x64xf32>
    %306 = vector.extract_strided_slice %305 {offsets = [0, 0], sizes = [2, 32], strides = [1, 1]} : vector<2x64xf32> to vector<2x32xf32>
    %307 = vector.extract_strided_slice %305 {offsets = [0, 32], sizes = [2, 32], strides = [1, 1]} : vector<2x64xf32> to vector<2x32xf32>
    %308 = vector.extract_strided_slice %294 {offsets = [0, 64], sizes = [2, 32], strides = [1, 1]} : vector<2x96xf32> to vector<2x32xf32>
    %309 = vector.extract_strided_slice %297 {offsets = [0, 64], sizes = [2, 32], strides = [1, 1]} : vector<2x96xf32> to vector<2x32xf32>
    %310 = arith.mulf %306, %309 : vector<2x32xf32>
    %311 = arith.addf %308, %310 : vector<2x32xf32>
    %312 = math.tanh %311 : vector<2x32xf32>
    %cst_101 = arith.constant 1.000000e+00 : f32
    %313 = vector.broadcast %cst_101 : f32 to vector<2x32xf32>
    %314 = arith.subf %313, %307 : vector<2x32xf32>
    %315 = arith.mulf %314, %312 : vector<2x32xf32>
    %316 = arith.mulf %307, %293 : vector<2x32xf32>
    %317 = arith.addf %315, %316 : vector<2x32xf32>
    %c12 = arith.constant 12 : index
    %c0_102 = arith.constant 0 : index
    %318 = vector.load %arg30[%c12, %c0_102] : memref<16x96xf32, #tpu.memory_space<vmem>>, vector<2x96xf32>
    %cst_103 = arith.constant dense<0.000000e+00> : vector<2x96xf32>
    %319 = tpu.matmul %317, %171, %cst_103 {dimension_numbers = #tpu.dot_dimension_numbers<[1], [0], [0], [1], [0, 0, 1, 1], [], []>} : vector<2x32xf32>, vector<32x96xf32>, vector<2x96xf32> -> vector<2x96xf32>
    %320 = vector.broadcast %172 : vector<1x96xf32> to vector<2x96xf32>
    %321 = arith.addf %319, %320 : vector<2x96xf32>
    %322 = vector.extract_strided_slice %318 {offsets = [0, 0], sizes = [2, 64], strides = [1, 1]} : vector<2x96xf32> to vector<2x64xf32>
    %323 = vector.extract_strided_slice %321 {offsets = [0, 0], sizes = [2, 64], strides = [1, 1]} : vector<2x96xf32> to vector<2x64xf32>
    %324 = arith.addf %322, %323 : vector<2x64xf32>
    %325 = arith.negf %324 : vector<2x64xf32>
    %326 = math.exp %325 : vector<2x64xf32>
    %cst_104 = arith.constant 1.000000e+00 : f32
    %327 = vector.broadcast %cst_104 : f32 to vector<2x64xf32>
    %328 = arith.addf %327, %326 : vector<2x64xf32>
    %329 = arith.divf %327, %328 : vector<2x64xf32>
    %330 = vector.extract_strided_slice %329 {offsets = [0, 0], sizes = [2, 32], strides = [1, 1]} : vector<2x64xf32> to vector<2x32xf32>
    %331 = vector.extract_strided_slice %329 {offsets = [0, 32], sizes = [2, 32], strides = [1, 1]} : vector<2x64xf32> to vector<2x32xf32>
    %332 = vector.extract_strided_slice %318 {offsets = [0, 64], sizes = [2, 32], strides = [1, 1]} : vector<2x96xf32> to vector<2x32xf32>
    %333 = vector.extract_strided_slice %321 {offsets = [0, 64], sizes = [2, 32], strides = [1, 1]} : vector<2x96xf32> to vector<2x32xf32>
    %334 = arith.mulf %330, %333 : vector<2x32xf32>
    %335 = arith.addf %332, %334 : vector<2x32xf32>
    %336 = math.tanh %335 : vector<2x32xf32>
    %cst_105 = arith.constant 1.000000e+00 : f32
    %337 = vector.broadcast %cst_105 : f32 to vector<2x32xf32>
    %338 = arith.subf %337, %331 : vector<2x32xf32>
    %339 = arith.mulf %338, %336 : vector<2x32xf32>
    %340 = arith.mulf %331, %317 : vector<2x32xf32>
    %341 = arith.addf %339, %340 : vector<2x32xf32>
    %c14 = arith.constant 14 : index
    %c0_106 = arith.constant 0 : index
    %342 = vector.load %arg30[%c14, %c0_106] : memref<16x96xf32, #tpu.memory_space<vmem>>, vector<2x96xf32>
    %cst_107 = arith.constant dense<0.000000e+00> : vector<2x96xf32>
    %343 = tpu.matmul %341, %171, %cst_107 {dimension_numbers = #tpu.dot_dimension_numbers<[1], [0], [0], [1], [0, 0, 1, 1], [], []>} : vector<2x32xf32>, vector<32x96xf32>, vector<2x96xf32> -> vector<2x96xf32>
    %344 = vector.broadcast %172 : vector<1x96xf32> to vector<2x96xf32>
    %345 = arith.addf %343, %344 : vector<2x96xf32>
    %346 = vector.extract_strided_slice %342 {offsets = [0, 0], sizes = [2, 64], strides = [1, 1]} : vector<2x96xf32> to vector<2x64xf32>
    %347 = vector.extract_strided_slice %345 {offsets = [0, 0], sizes = [2, 64], strides = [1, 1]} : vector<2x96xf32> to vector<2x64xf32>
    %348 = arith.addf %346, %347 : vector<2x64xf32>
    %349 = arith.negf %348 : vector<2x64xf32>
    %350 = math.exp %349 : vector<2x64xf32>
    %cst_108 = arith.constant 1.000000e+00 : f32
    %351 = vector.broadcast %cst_108 : f32 to vector<2x64xf32>
    %352 = arith.addf %351, %350 : vector<2x64xf32>
    %353 = arith.divf %351, %352 : vector<2x64xf32>
    %354 = vector.extract_strided_slice %353 {offsets = [0, 0], sizes = [2, 32], strides = [1, 1]} : vector<2x64xf32> to vector<2x32xf32>
    %355 = vector.extract_strided_slice %353 {offsets = [0, 32], sizes = [2, 32], strides = [1, 1]} : vector<2x64xf32> to vector<2x32xf32>
    %356 = vector.extract_strided_slice %342 {offsets = [0, 64], sizes = [2, 32], strides = [1, 1]} : vector<2x96xf32> to vector<2x32xf32>
    %357 = vector.extract_strided_slice %345 {offsets = [0, 64], sizes = [2, 32], strides = [1, 1]} : vector<2x96xf32> to vector<2x32xf32>
    %358 = arith.mulf %354, %357 : vector<2x32xf32>
    %359 = arith.addf %356, %358 : vector<2x32xf32>
    %360 = math.tanh %359 : vector<2x32xf32>
    %cst_109 = arith.constant 1.000000e+00 : f32
    %361 = vector.broadcast %cst_109 : f32 to vector<2x32xf32>
    %362 = arith.subf %361, %355 : vector<2x32xf32>
    %363 = arith.mulf %362, %360 : vector<2x32xf32>
    %364 = arith.mulf %355, %341 : vector<2x32xf32>
    %365 = arith.addf %363, %364 : vector<2x32xf32>
    %c0_110 = arith.constant 0 : index
    %c0_111 = arith.constant 0 : index
    %c0_112 = arith.constant 0 : index
    %366 = vector.load %arg18[%c0_110, %c0_111, %c0_112] : memref<3x32x32xf32, #tpu.memory_space<vmem>>, vector<1x32x32xf32>
    %367 = vector.shape_cast %366 : vector<1x32x32xf32> to vector<32x32xf32>
    %cst_113 = arith.constant dense<0.000000e+00> : vector<2x32xf32>
    %368 = tpu.matmul %365, %367, %cst_113 {dimension_numbers = #tpu.dot_dimension_numbers<[1], [0], [0], [1], [0, 0, 1, 1], [], []>} : vector<2x32xf32>, vector<32x32xf32>, vector<2x32xf32> -> vector<2x32xf32>
    %c0_114 = arith.constant 0 : index
    %c0_115 = arith.constant 0 : index
    %c0_116 = arith.constant 0 : index
    %369 = vector.load %arg19[%c0_114, %c0_115, %c0_116] : memref<3x1x32xf32, #tpu.memory_space<vmem>>, vector<1x1x32xf32>
    %370 = vector.shape_cast %369 : vector<1x1x32xf32> to vector<1x32xf32>
    %371 = vector.broadcast %370 : vector<1x32xf32> to vector<2x32xf32>
    %372 = arith.addf %368, %371 : vector<2x32xf32>
    %cst_117 = arith.constant 0.000000e+00 : f32
    %373 = vector.broadcast %cst_117 : f32 to vector<2x32xf32>
    %374 = arith.maximumf %372, %373 : vector<2x32xf32>
    %c1 = arith.constant 1 : index
    %c0_118 = arith.constant 0 : index
    %c0_119 = arith.constant 0 : index
    %375 = vector.load %arg18[%c1, %c0_118, %c0_119] : memref<3x32x32xf32, #tpu.memory_space<vmem>>, vector<1x32x32xf32>
    %376 = vector.shape_cast %375 : vector<1x32x32xf32> to vector<32x32xf32>
    %cst_120 = arith.constant dense<0.000000e+00> : vector<2x32xf32>
    %377 = tpu.matmul %374, %376, %cst_120 {dimension_numbers = #tpu.dot_dimension_numbers<[1], [0], [0], [1], [0, 0, 1, 1], [], []>} : vector<2x32xf32>, vector<32x32xf32>, vector<2x32xf32> -> vector<2x32xf32>
    %c1_121 = arith.constant 1 : index
    %c0_122 = arith.constant 0 : index
    %c0_123 = arith.constant 0 : index
    %378 = vector.load %arg19[%c1_121, %c0_122, %c0_123] : memref<3x1x32xf32, #tpu.memory_space<vmem>>, vector<1x1x32xf32>
    %379 = vector.shape_cast %378 : vector<1x1x32xf32> to vector<1x32xf32>
    %380 = vector.broadcast %379 : vector<1x32xf32> to vector<2x32xf32>
    %381 = arith.addf %377, %380 : vector<2x32xf32>
    %cst_124 = arith.constant 0.000000e+00 : f32
    %382 = vector.broadcast %cst_124 : f32 to vector<2x32xf32>
    %383 = arith.maximumf %381, %382 : vector<2x32xf32>
    %c2_125 = arith.constant 2 : index
    %c0_126 = arith.constant 0 : index
    %c0_127 = arith.constant 0 : index
    %384 = vector.load %arg18[%c2_125, %c0_126, %c0_127] : memref<3x32x32xf32, #tpu.memory_space<vmem>>, vector<1x32x32xf32>
    %385 = vector.shape_cast %384 : vector<1x32x32xf32> to vector<32x32xf32>
    %cst_128 = arith.constant dense<0.000000e+00> : vector<2x32xf32>
    %386 = tpu.matmul %383, %385, %cst_128 {dimension_numbers = #tpu.dot_dimension_numbers<[1], [0], [0], [1], [0, 0, 1, 1], [], []>} : vector<2x32xf32>, vector<32x32xf32>, vector<2x32xf32> -> vector<2x32xf32>
    %c2_129 = arith.constant 2 : index
    %c0_130 = arith.constant 0 : index
    %c0_131 = arith.constant 0 : index
    %387 = vector.load %arg19[%c2_129, %c0_130, %c0_131] : memref<3x1x32xf32, #tpu.memory_space<vmem>>, vector<1x1x32xf32>
    %388 = vector.shape_cast %387 : vector<1x1x32xf32> to vector<1x32xf32>
    %389 = vector.broadcast %388 : vector<1x32xf32> to vector<2x32xf32>
    %390 = arith.addf %386, %389 : vector<2x32xf32>
    %cst_132 = arith.constant 0.000000e+00 : f32
    %391 = vector.broadcast %cst_132 : f32 to vector<2x32xf32>
    %392 = arith.maximumf %390, %391 : vector<2x32xf32>
    %c0_133 = arith.constant 0 : index
    %c0_134 = arith.constant 0 : index
    %393 = vector.load %arg20[%c0_133, %c0_134] : memref<32x4xf32, #tpu.memory_space<vmem>>, vector<32x4xf32>
    %cst_135 = arith.constant dense<0.000000e+00> : vector<2x4xf32>
    %394 = tpu.matmul %392, %393, %cst_135 {dimension_numbers = #tpu.dot_dimension_numbers<[1], [0], [0], [1], [0, 0, 1, 1], [], []>} : vector<2x32xf32>, vector<32x4xf32>, vector<2x4xf32> -> vector<2x4xf32>
    %c0_136 = arith.constant 0 : index
    %c0_137 = arith.constant 0 : index
    %395 = vector.load %arg21[%c0_136, %c0_137] : memref<1x4xf32, #tpu.memory_space<vmem>>, vector<1x4xf32>
    %396 = vector.broadcast %395 : vector<1x4xf32> to vector<2x4xf32>
    %397 = arith.addf %394, %396 : vector<2x4xf32>
    %c0_138 = arith.constant 0 : index
    %c0_139 = arith.constant 0 : index
    %398 = vector.load %arg28[%c0_138, %c0_139] : memref<2x4xf32, #tpu.memory_space<vmem>>, vector<2x4xf32>
    tpu.vector_store %arg28[%c0_138, %c0_139], %397 {strides = array<i32>} : memref<2x4xf32, #tpu.memory_space<vmem>>, vector<2x4xf32>,
    %c0_140 = arith.constant 0 : index
    %c0_141 = arith.constant 0 : index
    %399 = vector.load %arg22[%c0_140, %c0_141] : memref<32x1024xf32, #tpu.memory_space<vmem>>, vector<32x1024xf32>
    %cst_142 = arith.constant dense<0.000000e+00> : vector<2x1024xf32>
    %400 = tpu.matmul %365, %399, %cst_142 {dimension_numbers = #tpu.dot_dimension_numbers<[1], [0], [0], [1], [0, 0, 1, 1], [], []>} : vector<2x32xf32>, vector<32x1024xf32>, vector<2x1024xf32> -> vector<2x1024xf32>
    %c0_143 = arith.constant 0 : index
    %c0_144 = arith.constant 0 : index
    %401 = vector.load %arg23[%c0_143, %c0_144] : memref<1x1024xf32, #tpu.memory_space<vmem>>, vector<1x1024xf32>
    %402 = vector.broadcast %401 : vector<1x1024xf32> to vector<2x1024xf32>
    %403 = arith.addf %400, %402 : vector<2x1024xf32>
    %c0_145 = arith.constant 0 : index
    %c0_146 = arith.constant 0 : index
    %404 = vector.load %arg24[%c0_145, %c0_146] : memref<32x96xf32, #tpu.memory_space<vmem>>, vector<32x96xf32>
    %c0_147 = arith.constant 0 : index
    %c0_148 = arith.constant 0 : index
    %405 = vector.load %arg25[%c0_147, %c0_148] : memref<1x96xf32, #tpu.memory_space<vmem>>, vector<1x96xf32>
    %cst_149 = arith.constant 0.000000e+00 : f32
    %406 = vector.broadcast %cst_149 : f32 to vector<2x32xf32>
    %407 = vector.extract_strided_slice %403 {offsets = [0, 0], sizes = [2, 96], strides = [1, 1]} : vector<2x1024xf32> to vector<2x96xf32>
    %cst_150 = arith.constant dense<0.000000e+00> : vector<2x96xf32>
    %408 = tpu.matmul %406, %404, %cst_150 {dimension_numbers = #tpu.dot_dimension_numbers<[1], [0], [0], [1], [0, 0, 1, 1], [], []>} : vector<2x32xf32>, vector<32x96xf32>, vector<2x96xf32> -> vector<2x96xf32>
    %409 = vector.broadcast %405 : vector<1x96xf32> to vector<2x96xf32>
    %410 = arith.addf %408, %409 : vector<2x96xf32>
    %411 = vector.extract_strided_slice %407 {offsets = [0, 0], sizes = [2, 64], strides = [1, 1]} : vector<2x96xf32> to vector<2x64xf32>
    %412 = vector.extract_strided_slice %410 {offsets = [0, 0], sizes = [2, 64], strides = [1, 1]} : vector<2x96xf32> to vector<2x64xf32>
    %413 = arith.addf %411, %412 : vector<2x64xf32>
    %414 = arith.negf %413 : vector<2x64xf32>
    %415 = math.exp %414 : vector<2x64xf32>
    %cst_151 = arith.constant 1.000000e+00 : f32
    %416 = vector.broadcast %cst_151 : f32 to vector<2x64xf32>
    %417 = arith.addf %416, %415 : vector<2x64xf32>
    %418 = arith.divf %416, %417 : vector<2x64xf32>
    %419 = vector.extract_strided_slice %418 {offsets = [0, 0], sizes = [2, 32], strides = [1, 1]} : vector<2x64xf32> to vector<2x32xf32>
    %420 = vector.extract_strided_slice %418 {offsets = [0, 32], sizes = [2, 32], strides = [1, 1]} : vector<2x64xf32> to vector<2x32xf32>
    %421 = vector.extract_strided_slice %407 {offsets = [0, 64], sizes = [2, 32], strides = [1, 1]} : vector<2x96xf32> to vector<2x32xf32>
    %422 = vector.extract_strided_slice %410 {offsets = [0, 64], sizes = [2, 32], strides = [1, 1]} : vector<2x96xf32> to vector<2x32xf32>
    %423 = arith.mulf %419, %422 : vector<2x32xf32>
    %424 = arith.addf %421, %423 : vector<2x32xf32>
    %425 = math.tanh %424 : vector<2x32xf32>
    %cst_152 = arith.constant 1.000000e+00 : f32
    %426 = vector.broadcast %cst_152 : f32 to vector<2x32xf32>
    %427 = arith.subf %426, %420 : vector<2x32xf32>
    %428 = arith.mulf %427, %425 : vector<2x32xf32>
    %429 = arith.mulf %420, %406 : vector<2x32xf32>
    %430 = arith.addf %428, %429 : vector<2x32xf32>
    %431 = vector.extract_strided_slice %403 {offsets = [0, 128], sizes = [2, 96], strides = [1, 1]} : vector<2x1024xf32> to vector<2x96xf32>
    %cst_153 = arith.constant dense<0.000000e+00> : vector<2x96xf32>
    %432 = tpu.matmul %430, %404, %cst_153 {dimension_numbers = #tpu.dot_dimension_numbers<[1], [0], [0], [1], [0, 0, 1, 1], [], []>} : vector<2x32xf32>, vector<32x96xf32>, vector<2x96xf32> -> vector<2x96xf32>
    %433 = vector.broadcast %405 : vector<1x96xf32> to vector<2x96xf32>
    %434 = arith.addf %432, %433 : vector<2x96xf32>
    %435 = vector.extract_strided_slice %431 {offsets = [0, 0], sizes = [2, 64], strides = [1, 1]} : vector<2x96xf32> to vector<2x64xf32>
    %436 = vector.extract_strided_slice %434 {offsets = [0, 0], sizes = [2, 64], strides = [1, 1]} : vector<2x96xf32> to vector<2x64xf32>
    %437 = arith.addf %435, %436 : vector<2x64xf32>
    %438 = arith.negf %437 : vector<2x64xf32>
    %439 = math.exp %438 : vector<2x64xf32>
    %cst_154 = arith.constant 1.000000e+00 : f32
    %440 = vector.broadcast %cst_154 : f32 to vector<2x64xf32>
    %441 = arith.addf %440, %439 : vector<2x64xf32>
    %442 = arith.divf %440, %441 : vector<2x64xf32>
    %443 = vector.extract_strided_slice %442 {offsets = [0, 0], sizes = [2, 32], strides = [1, 1]} : vector<2x64xf32> to vector<2x32xf32>
    %444 = vector.extract_strided_slice %442 {offsets = [0, 32], sizes = [2, 32], strides = [1, 1]} : vector<2x64xf32> to vector<2x32xf32>
    %445 = vector.extract_strided_slice %431 {offsets = [0, 64], sizes = [2, 32], strides = [1, 1]} : vector<2x96xf32> to vector<2x32xf32>
    %446 = vector.extract_strided_slice %434 {offsets = [0, 64], sizes = [2, 32], strides = [1, 1]} : vector<2x96xf32> to vector<2x32xf32>
    %447 = arith.mulf %443, %446 : vector<2x32xf32>
    %448 = arith.addf %445, %447 : vector<2x32xf32>
    %449 = math.tanh %448 : vector<2x32xf32>
    %cst_155 = arith.constant 1.000000e+00 : f32
    %450 = vector.broadcast %cst_155 : f32 to vector<2x32xf32>
    %451 = arith.subf %450, %444 : vector<2x32xf32>
    %452 = arith.mulf %451, %449 : vector<2x32xf32>
    %453 = arith.mulf %444, %430 : vector<2x32xf32>
    %454 = arith.addf %452, %453 : vector<2x32xf32>
    %455 = vector.extract_strided_slice %403 {offsets = [0, 256], sizes = [2, 96], strides = [1, 1]} : vector<2x1024xf32> to vector<2x96xf32>
    %cst_156 = arith.constant dense<0.000000e+00> : vector<2x96xf32>
    %456 = tpu.matmul %454, %404, %cst_156 {dimension_numbers = #tpu.dot_dimension_numbers<[1], [0], [0], [1], [0, 0, 1, 1], [], []>} : vector<2x32xf32>, vector<32x96xf32>, vector<2x96xf32> -> vector<2x96xf32>
    %457 = vector.broadcast %405 : vector<1x96xf32> to vector<2x96xf32>
    %458 = arith.addf %456, %457 : vector<2x96xf32>
    %459 = vector.extract_strided_slice %455 {offsets = [0, 0], sizes = [2, 64], strides = [1, 1]} : vector<2x96xf32> to vector<2x64xf32>
    %460 = vector.extract_strided_slice %458 {offsets = [0, 0], sizes = [2, 64], strides = [1, 1]} : vector<2x96xf32> to vector<2x64xf32>
    %461 = arith.addf %459, %460 : vector<2x64xf32>
    %462 = arith.negf %461 : vector<2x64xf32>
    %463 = math.exp %462 : vector<2x64xf32>
    %cst_157 = arith.constant 1.000000e+00 : f32
    %464 = vector.broadcast %cst_157 : f32 to vector<2x64xf32>
    %465 = arith.addf %464, %463 : vector<2x64xf32>
    %466 = arith.divf %464, %465 : vector<2x64xf32>
    %467 = vector.extract_strided_slice %466 {offsets = [0, 0], sizes = [2, 32], strides = [1, 1]} : vector<2x64xf32> to vector<2x32xf32>
    %468 = vector.extract_strided_slice %466 {offsets = [0, 32], sizes = [2, 32], strides = [1, 1]} : vector<2x64xf32> to vector<2x32xf32>
    %469 = vector.extract_strided_slice %455 {offsets = [0, 64], sizes = [2, 32], strides = [1, 1]} : vector<2x96xf32> to vector<2x32xf32>
    %470 = vector.extract_strided_slice %458 {offsets = [0, 64], sizes = [2, 32], strides = [1, 1]} : vector<2x96xf32> to vector<2x32xf32>
    %471 = arith.mulf %467, %470 : vector<2x32xf32>
    %472 = arith.addf %469, %471 : vector<2x32xf32>
    %473 = math.tanh %472 : vector<2x32xf32>
    %cst_158 = arith.constant 1.000000e+00 : f32
    %474 = vector.broadcast %cst_158 : f32 to vector<2x32xf32>
    %475 = arith.subf %474, %468 : vector<2x32xf32>
    %476 = arith.mulf %475, %473 : vector<2x32xf32>
    %477 = arith.mulf %468, %454 : vector<2x32xf32>
    %478 = arith.addf %476, %477 : vector<2x32xf32>
    %479 = vector.extract_strided_slice %403 {offsets = [0, 384], sizes = [2, 96], strides = [1, 1]} : vector<2x1024xf32> to vector<2x96xf32>
    %cst_159 = arith.constant dense<0.000000e+00> : vector<2x96xf32>
    %480 = tpu.matmul %478, %404, %cst_159 {dimension_numbers = #tpu.dot_dimension_numbers<[1], [0], [0], [1], [0, 0, 1, 1], [], []>} : vector<2x32xf32>, vector<32x96xf32>, vector<2x96xf32> -> vector<2x96xf32>
    %481 = vector.broadcast %405 : vector<1x96xf32> to vector<2x96xf32>
    %482 = arith.addf %480, %481 : vector<2x96xf32>
    %483 = vector.extract_strided_slice %479 {offsets = [0, 0], sizes = [2, 64], strides = [1, 1]} : vector<2x96xf32> to vector<2x64xf32>
    %484 = vector.extract_strided_slice %482 {offsets = [0, 0], sizes = [2, 64], strides = [1, 1]} : vector<2x96xf32> to vector<2x64xf32>
    %485 = arith.addf %483, %484 : vector<2x64xf32>
    %486 = arith.negf %485 : vector<2x64xf32>
    %487 = math.exp %486 : vector<2x64xf32>
    %cst_160 = arith.constant 1.000000e+00 : f32
    %488 = vector.broadcast %cst_160 : f32 to vector<2x64xf32>
    %489 = arith.addf %488, %487 : vector<2x64xf32>
    %490 = arith.divf %488, %489 : vector<2x64xf32>
    %491 = vector.extract_strided_slice %490 {offsets = [0, 0], sizes = [2, 32], strides = [1, 1]} : vector<2x64xf32> to vector<2x32xf32>
    %492 = vector.extract_strided_slice %490 {offsets = [0, 32], sizes = [2, 32], strides = [1, 1]} : vector<2x64xf32> to vector<2x32xf32>
    %493 = vector.extract_strided_slice %479 {offsets = [0, 64], sizes = [2, 32], strides = [1, 1]} : vector<2x96xf32> to vector<2x32xf32>
    %494 = vector.extract_strided_slice %482 {offsets = [0, 64], sizes = [2, 32], strides = [1, 1]} : vector<2x96xf32> to vector<2x32xf32>
    %495 = arith.mulf %491, %494 : vector<2x32xf32>
    %496 = arith.addf %493, %495 : vector<2x32xf32>
    %497 = math.tanh %496 : vector<2x32xf32>
    %cst_161 = arith.constant 1.000000e+00 : f32
    %498 = vector.broadcast %cst_161 : f32 to vector<2x32xf32>
    %499 = arith.subf %498, %492 : vector<2x32xf32>
    %500 = arith.mulf %499, %497 : vector<2x32xf32>
    %501 = arith.mulf %492, %478 : vector<2x32xf32>
    %502 = arith.addf %500, %501 : vector<2x32xf32>
    %503 = vector.extract_strided_slice %403 {offsets = [0, 512], sizes = [2, 96], strides = [1, 1]} : vector<2x1024xf32> to vector<2x96xf32>
    %cst_162 = arith.constant dense<0.000000e+00> : vector<2x96xf32>
    %504 = tpu.matmul %502, %404, %cst_162 {dimension_numbers = #tpu.dot_dimension_numbers<[1], [0], [0], [1], [0, 0, 1, 1], [], []>} : vector<2x32xf32>, vector<32x96xf32>, vector<2x96xf32> -> vector<2x96xf32>
    %505 = vector.broadcast %405 : vector<1x96xf32> to vector<2x96xf32>
    %506 = arith.addf %504, %505 : vector<2x96xf32>
    %507 = vector.extract_strided_slice %503 {offsets = [0, 0], sizes = [2, 64], strides = [1, 1]} : vector<2x96xf32> to vector<2x64xf32>
    %508 = vector.extract_strided_slice %506 {offsets = [0, 0], sizes = [2, 64], strides = [1, 1]} : vector<2x96xf32> to vector<2x64xf32>
    %509 = arith.addf %507, %508 : vector<2x64xf32>
    %510 = arith.negf %509 : vector<2x64xf32>
    %511 = math.exp %510 : vector<2x64xf32>
    %cst_163 = arith.constant 1.000000e+00 : f32
    %512 = vector.broadcast %cst_163 : f32 to vector<2x64xf32>
    %513 = arith.addf %512, %511 : vector<2x64xf32>
    %514 = arith.divf %512, %513 : vector<2x64xf32>
    %515 = vector.extract_strided_slice %514 {offsets = [0, 0], sizes = [2, 32], strides = [1, 1]} : vector<2x64xf32> to vector<2x32xf32>
    %516 = vector.extract_strided_slice %514 {offsets = [0, 32], sizes = [2, 32], strides = [1, 1]} : vector<2x64xf32> to vector<2x32xf32>
    %517 = vector.extract_strided_slice %503 {offsets = [0, 64], sizes = [2, 32], strides = [1, 1]} : vector<2x96xf32> to vector<2x32xf32>
    %518 = vector.extract_strided_slice %506 {offsets = [0, 64], sizes = [2, 32], strides = [1, 1]} : vector<2x96xf32> to vector<2x32xf32>
    %519 = arith.mulf %515, %518 : vector<2x32xf32>
    %520 = arith.addf %517, %519 : vector<2x32xf32>
    %521 = math.tanh %520 : vector<2x32xf32>
    %cst_164 = arith.constant 1.000000e+00 : f32
    %522 = vector.broadcast %cst_164 : f32 to vector<2x32xf32>
    %523 = arith.subf %522, %516 : vector<2x32xf32>
    %524 = arith.mulf %523, %521 : vector<2x32xf32>
    %525 = arith.mulf %516, %502 : vector<2x32xf32>
    %526 = arith.addf %524, %525 : vector<2x32xf32>
    %527 = vector.extract_strided_slice %403 {offsets = [0, 640], sizes = [2, 96], strides = [1, 1]} : vector<2x1024xf32> to vector<2x96xf32>
    %cst_165 = arith.constant dense<0.000000e+00> : vector<2x96xf32>
    %528 = tpu.matmul %526, %404, %cst_165 {dimension_numbers = #tpu.dot_dimension_numbers<[1], [0], [0], [1], [0, 0, 1, 1], [], []>} : vector<2x32xf32>, vector<32x96xf32>, vector<2x96xf32> -> vector<2x96xf32>
    %529 = vector.broadcast %405 : vector<1x96xf32> to vector<2x96xf32>
    %530 = arith.addf %528, %529 : vector<2x96xf32>
    %531 = vector.extract_strided_slice %527 {offsets = [0, 0], sizes = [2, 64], strides = [1, 1]} : vector<2x96xf32> to vector<2x64xf32>
    %532 = vector.extract_strided_slice %530 {offsets = [0, 0], sizes = [2, 64], strides = [1, 1]} : vector<2x96xf32> to vector<2x64xf32>
    %533 = arith.addf %531, %532 : vector<2x64xf32>
    %534 = arith.negf %533 : vector<2x64xf32>
    %535 = math.exp %534 : vector<2x64xf32>
    %cst_166 = arith.constant 1.000000e+00 : f32
    %536 = vector.broadcast %cst_166 : f32 to vector<2x64xf32>
    %537 = arith.addf %536, %535 : vector<2x64xf32>
    %538 = arith.divf %536, %537 : vector<2x64xf32>
    %539 = vector.extract_strided_slice %538 {offsets = [0, 0], sizes = [2, 32], strides = [1, 1]} : vector<2x64xf32> to vector<2x32xf32>
    %540 = vector.extract_strided_slice %538 {offsets = [0, 32], sizes = [2, 32], strides = [1, 1]} : vector<2x64xf32> to vector<2x32xf32>
    %541 = vector.extract_strided_slice %527 {offsets = [0, 64], sizes = [2, 32], strides = [1, 1]} : vector<2x96xf32> to vector<2x32xf32>
    %542 = vector.extract_strided_slice %530 {offsets = [0, 64], sizes = [2, 32], strides = [1, 1]} : vector<2x96xf32> to vector<2x32xf32>
    %543 = arith.mulf %539, %542 : vector<2x32xf32>
    %544 = arith.addf %541, %543 : vector<2x32xf32>
    %545 = math.tanh %544 : vector<2x32xf32>
    %cst_167 = arith.constant 1.000000e+00 : f32
    %546 = vector.broadcast %cst_167 : f32 to vector<2x32xf32>
    %547 = arith.subf %546, %540 : vector<2x32xf32>
    %548 = arith.mulf %547, %545 : vector<2x32xf32>
    %549 = arith.mulf %540, %526 : vector<2x32xf32>
    %550 = arith.addf %548, %549 : vector<2x32xf32>
    %551 = vector.extract_strided_slice %403 {offsets = [0, 768], sizes = [2, 96], strides = [1, 1]} : vector<2x1024xf32> to vector<2x96xf32>
    %cst_168 = arith.constant dense<0.000000e+00> : vector<2x96xf32>
    %552 = tpu.matmul %550, %404, %cst_168 {dimension_numbers = #tpu.dot_dimension_numbers<[1], [0], [0], [1], [0, 0, 1, 1], [], []>} : vector<2x32xf32>, vector<32x96xf32>, vector<2x96xf32> -> vector<2x96xf32>
    %553 = vector.broadcast %405 : vector<1x96xf32> to vector<2x96xf32>
    %554 = arith.addf %552, %553 : vector<2x96xf32>
    %555 = vector.extract_strided_slice %551 {offsets = [0, 0], sizes = [2, 64], strides = [1, 1]} : vector<2x96xf32> to vector<2x64xf32>
    %556 = vector.extract_strided_slice %554 {offsets = [0, 0], sizes = [2, 64], strides = [1, 1]} : vector<2x96xf32> to vector<2x64xf32>
    %557 = arith.addf %555, %556 : vector<2x64xf32>
    %558 = arith.negf %557 : vector<2x64xf32>
    %559 = math.exp %558 : vector<2x64xf32>
    %cst_169 = arith.constant 1.000000e+00 : f32
    %560 = vector.broadcast %cst_169 : f32 to vector<2x64xf32>
    %561 = arith.addf %560, %559 : vector<2x64xf32>
    %562 = arith.divf %560, %561 : vector<2x64xf32>
    %563 = vector.extract_strided_slice %562 {offsets = [0, 0], sizes = [2, 32], strides = [1, 1]} : vector<2x64xf32> to vector<2x32xf32>
    %564 = vector.extract_strided_slice %562 {offsets = [0, 32], sizes = [2, 32], strides = [1, 1]} : vector<2x64xf32> to vector<2x32xf32>
    %565 = vector.extract_strided_slice %551 {offsets = [0, 64], sizes = [2, 32], strides = [1, 1]} : vector<2x96xf32> to vector<2x32xf32>
    %566 = vector.extract_strided_slice %554 {offsets = [0, 64], sizes = [2, 32], strides = [1, 1]} : vector<2x96xf32> to vector<2x32xf32>
    %567 = arith.mulf %563, %566 : vector<2x32xf32>
    %568 = arith.addf %565, %567 : vector<2x32xf32>
    %569 = math.tanh %568 : vector<2x32xf32>
    %cst_170 = arith.constant 1.000000e+00 : f32
    %570 = vector.broadcast %cst_170 : f32 to vector<2x32xf32>
    %571 = arith.subf %570, %564 : vector<2x32xf32>
    %572 = arith.mulf %571, %569 : vector<2x32xf32>
    %573 = arith.mulf %564, %550 : vector<2x32xf32>
    %574 = arith.addf %572, %573 : vector<2x32xf32>
    %575 = vector.extract_strided_slice %403 {offsets = [0, 896], sizes = [2, 96], strides = [1, 1]} : vector<2x1024xf32> to vector<2x96xf32>
    %cst_171 = arith.constant dense<0.000000e+00> : vector<2x96xf32>
    %576 = tpu.matmul %574, %404, %cst_171 {dimension_numbers = #tpu.dot_dimension_numbers<[1], [0], [0], [1], [0, 0, 1, 1], [], []>} : vector<2x32xf32>, vector<32x96xf32>, vector<2x96xf32> -> vector<2x96xf32>
    %577 = vector.broadcast %405 : vector<1x96xf32> to vector<2x96xf32>
    %578 = arith.addf %576, %577 : vector<2x96xf32>
    %579 = vector.extract_strided_slice %575 {offsets = [0, 0], sizes = [2, 64], strides = [1, 1]} : vector<2x96xf32> to vector<2x64xf32>
    %580 = vector.extract_strided_slice %578 {offsets = [0, 0], sizes = [2, 64], strides = [1, 1]} : vector<2x96xf32> to vector<2x64xf32>
    %581 = arith.addf %579, %580 : vector<2x64xf32>
    %582 = arith.negf %581 : vector<2x64xf32>
    %583 = math.exp %582 : vector<2x64xf32>
    %cst_172 = arith.constant 1.000000e+00 : f32
    %584 = vector.broadcast %cst_172 : f32 to vector<2x64xf32>
    %585 = arith.addf %584, %583 : vector<2x64xf32>
    %586 = arith.divf %584, %585 : vector<2x64xf32>
    %587 = vector.extract_strided_slice %586 {offsets = [0, 0], sizes = [2, 32], strides = [1, 1]} : vector<2x64xf32> to vector<2x32xf32>
    %588 = vector.extract_strided_slice %586 {offsets = [0, 32], sizes = [2, 32], strides = [1, 1]} : vector<2x64xf32> to vector<2x32xf32>
    %589 = vector.extract_strided_slice %575 {offsets = [0, 64], sizes = [2, 32], strides = [1, 1]} : vector<2x96xf32> to vector<2x32xf32>
    %590 = vector.extract_strided_slice %578 {offsets = [0, 64], sizes = [2, 32], strides = [1, 1]} : vector<2x96xf32> to vector<2x32xf32>
    %591 = arith.mulf %587, %590 : vector<2x32xf32>
    %592 = arith.addf %589, %591 : vector<2x32xf32>
    %593 = math.tanh %592 : vector<2x32xf32>
    %cst_173 = arith.constant 1.000000e+00 : f32
    %594 = vector.broadcast %cst_173 : f32 to vector<2x32xf32>
    %595 = arith.subf %594, %588 : vector<2x32xf32>
    %596 = arith.mulf %595, %593 : vector<2x32xf32>
    %597 = arith.mulf %588, %574 : vector<2x32xf32>
    %598 = arith.addf %596, %597 : vector<2x32xf32>
    %599 = tpu.concatenate %430, %454, %478, %502, %526, %550, %574, %598 in 0 : vector<2x32xf32>, vector<2x32xf32>, vector<2x32xf32>, vector<2x32xf32>, vector<2x32xf32>, vector<2x32xf32>, vector<2x32xf32>, vector<2x32xf32> -> vector<16x32xf32>
    %c0_174 = arith.constant 0 : index
    %c0_175 = arith.constant 0 : index
    %600 = vector.load %arg26[%c0_174, %c0_175] : memref<32x4xf32, #tpu.memory_space<vmem>>, vector<32x4xf32>
    %cst_176 = arith.constant dense<0.000000e+00> : vector<16x4xf32>
    %601 = tpu.matmul %599, %600, %cst_176 {dimension_numbers = #tpu.dot_dimension_numbers<[1], [0], [0], [1], [0, 0, 1, 1], [], []>} : vector<16x32xf32>, vector<32x4xf32>, vector<16x4xf32> -> vector<16x4xf32>
    %c0_177 = arith.constant 0 : index
    %c0_178 = arith.constant 0 : index
    %602 = vector.load %arg27[%c0_177, %c0_178] : memref<1x4xf32, #tpu.memory_space<vmem>>, vector<1x4xf32>
    %603 = vector.broadcast %602 : vector<1x4xf32> to vector<16x4xf32>
    %604 = arith.addf %601, %603 : vector<16x4xf32>
    %c0_179 = arith.constant 0 : index
    %c0_180 = arith.constant 0 : index
    %605 = vector.load %arg29[%c0_179, %c0_180] : memref<16x4xf32, #tpu.memory_space<vmem>>, vector<16x4xf32>
    tpu.vector_store %arg29[%c0_179, %c0_180], %604 {strides = array<i32>} : memref<16x4xf32, #tpu.memory_space<vmem>>, vector<16x4xf32>,
    return
  }
}

</mosaic_0001>

<bundles_post_ra>
// kernel: mtad_gat_forward.1
= control target key start
LH: loop header
LB: loop body
LE: loop exit
PB: predicated region body
PF: predicated region fallthrough
CT: control target
= control target key end

     0   :  { %s7142_s6 = smov 1   ;;  %s7143_s10 = smov 2   ;;  %s8393_s0 = inlined_call_operand.smem [shape: u32[30], index: -1, kind: input, shape index: {}] }
   0x1   :  { %s7206_s5 = sld [smem:[%s8393_s0]]   ;;  %s7144_s14 = smov 3  }
   0x2   :  { %s7211_s9 = sld [smem:[%s8393_s0 + %s7142_s6]]   ;;  %s7145_s18 = smov 4  }
   0x3   :  { %s7216_s13 = sld [smem:[%s8393_s0 + %s7143_s10]]   ;;  %s7146_s22 = smov 5  }
   0x4   :  { %s7221_s17 = sld [smem:[%s8393_s0 + %s7144_s14]]   ;;  %s7147_s26 = smov 6  }
   0x5   :  { %s7226_s21 = sld [smem:[%s8393_s0 + %s7145_s18]]   ;;  %s7148_s30 = smov 7  }
   0x6   :  { %s7231_s25 = sld [smem:[%s8393_s0 + %s7146_s22]]   ;;  %s7149_s4 = smov 8  }
   0x7   :  { %8405 = sst [smem:[#allocation36_spill]] %s7206_s5  ;;  %s7150_s10 = smov 9  }
   0x8   :  { %s7236_s29 = sld [smem:[%s8393_s0 + %s7147_s26]]   ;;  %s7151_s15 = smov 10  }
   0x9   :  { %8406 = sst [smem:[#allocation37_spill]] %s7216_s13  ;;  %s7152_s20 = smov 11  }
   0xa   :  { %8407 = sst [smem:[#allocation38_spill]] %s7221_s17  ;;  %s7153_s26 = smov 12  }
   0xb   :  { %8408 = sst [smem:[#allocation39_spill]] %s7226_s21  ;;  %s7154_s1 = smov 13  }
   0xc   :  { %8409 = sst [smem:[#allocation40_spill]] %s7231_s25  ;;  %s7155_s7 = smov 14  }
   0xd   :  { %s7241_s3 = sld [smem:[%s8393_s0 + %s7148_s30]]   ;;  %s7157_s22 = smov 16  }
   0xe   :  { %s7246_s8 = sld [smem:[%s8393_s0 + %s7149_s4]]   ;;  %s7158_s28 = smov 17  }
   0xf   :  { %s7251_s14 = sld [smem:[%s8393_s0 + %s7150_s10]]  }
  0x10   :  { %s7256_s19 = sld [smem:[%s8393_s0 + %s7151_s15]]   ;;  %s7156_s15 = smov 15  }
  0x11   :  { %s7261_s24 = sld [smem:[%s8393_s0 + %s7152_s20]]  }
  0x12   :  { %s7266_s30 = sld [smem:[%s8393_s0 + %s7153_s26]]  }
  0x13   :  { %s7271_s6 = sld [smem:[%s8393_s0 + %s7154_s1]]  }
  0x14   :  { %s7276_s12 = sld [smem:[%s8393_s0 + %s7155_s7]]   ;;  %s7159_s7 = smov 18  }
  0x15   :  { %s7281_s20 = sld [smem:[%s8393_s0 + %s7156_s15]]   ;;  %s7160_s15 = smov 19  }
  0x16   :  { %s7286_s27 = sld [smem:[%s8393_s0 + %s7157_s22]]   ;;  %s7161_s22 = smov 20  }
  0x17   :  { %s7291_s4 = sld [smem:[%s8393_s0 + %s7158_s28]]   ;;  %s7162_s28 = smov 21  }
  0x18   :  { %s7296_s17 = sld [smem:[%s8393_s0 + %s7159_s7]]   ;;  %s7163_s7 = smov 22  }
  0x19   :  { %8410 = sst [smem:[#allocation41_spill]] %s7271_s6 }
  0x1a   :  { %8411 = sst [smem:[#allocation42_spill]] %s7276_s12 }
  0x1b   :  { %s7301_s12 = sld [smem:[%s8393_s0 + %s7160_s15]]   ;;  %s7164_s15 = smov 23  }
  0x1c   :  { %8412 = sst [smem:[#allocation43_spill]] %s7286_s27 }
  0x1d   :  { %s7306_s27 = sld [smem:[%s8393_s0 + %s7161_s22]]   ;;  %s7165_s22 = smov 24  }
  0x1e   :  { %8413 = sst [smem:[#allocation44_spill]] %s7296_s17 }
  0x1f   :  { %s7311_s6 = sld [smem:[%s8393_s0 + %s7162_s28]]   ;;  %s7166_s28 = smov 25  }
  0x20   :  { %s7316_s17 = sld [smem:[%s8393_s0 + %s7163_s7]]   ;;  %s7167_s7 = smov 26  }
  0x21   :  { %s7321_s13 = sld [smem:[%s8393_s0 + %s7164_s15]]   ;;  %s7168_s15 = smov 27  }
  0x22   :  { %s7331_s25 = sld [smem:[%s8393_s0 + %s7166_s28]]   ;;  %s7170_s28 = smov 29  }
  0x23   :  { %8414 = sst [smem:[#allocation45_spill]] %s7306_s27 }
  0x24   :  { %s7326_s27 = sld [smem:[%s8393_s0 + %s7165_s22]]   ;;  %s7169_s22 = smov 28  }
  0x25   :  { %s7341_s21 = sld [smem:[%s8393_s0 + %s7168_s15]]  }
  0x26   :  { %8415 = sst [smem:[#allocation46_spill]] %s7316_s17 }
  0x27   :  { %s7336_s17 = sld [smem:[%s8393_s0 + %s7167_s7]]  }
  0x28   :  { %s7351_s5 = sld [smem:[%s8393_s0 + %s7170_s28]]  }
  0x2a   :  { %8416 = sst [smem:[#allocation47_spill]] %s7326_s27 }
  0x2b   :  { %s7346_s27 = sld [smem:[%s8393_s0 + %s7169_s22]]  }
  0x2c   :  { %65 = vsyncpa [#allocation4], 0 }
  0x2d   :  { %66 = vsyncpa [#allocation7], 0 }
  0x2e   :  { %67 = vsyncpa [#allocation10], 0 }
  0x2f   :  { %68 = vsyncpa [#allocation13], 0 }
  0x30   :  { %69 = vsyncpa [#allocation16], 0 }
  0x31   :  { %70 = vsyncpa [#allocation19], 0 }
  0x32   :  { %71 = vsyncpa [#allocation22], 0 }
  0x33   :  { %72 = vsyncpa [#allocation25], 0 }
  0x34   :  { %73 = vsyncpa [#allocation5], 0  ;;  %s7171_s7 = smov [#allocation6]   ;;  %s7172_s11 = smov [#allocation9]  }
  0x35   :  { %s102_s10 = sshll.u32 %s7171_s7, 4  ;;  %s122_s15 = sshll.u32 %s7172_s11, 4  ;;  %s103_s10 = int_to_ptr.vmem [resolvable:$true] %s102_s10  ;;  %s123_s15 = int_to_ptr.vmem [resolvable:$true] %s122_s15 }
  0x36   :  { %s6794_s0 = scalar_lea.hbm %s7241_s3, 16 }
  0x37   :  { %p6795_p0 = scmp.ne.s32.totalorder %s7241_s3, %s6794_s0  ;;  %p6798_p1 = scmp.lt.u32.totalorder %s6794_s0, %s7241_s3 }
  0x39   :  { %p6800_p2 = pnand %p6798_p1, %p6795_p0 }
  0x3b   :  { %6803 = shalt.err (!%p6800_p2)
}
  0x3c   :  { %s6804_s16 = scalar_lea.vmem %s103_s10, 16  ;;  %s6808_s18 = scalar_lea.vmem %s103_s10, 32 }
  0x3d   :  { %p6805_p3 = scmp.ne.s32.totalorder %s103_s10, %s6804_s16  ;;  %p6809_p4 = scmp.lt.s32.totalorder %s103_s10, %s103_s10 }
  0x3e   :  { %p6810_p5 = scmp.lt.s32.totalorder %s6808_s18, %s6804_s16 }
  0x40   :  { %p6811_p6 = por %p6810_p5, %p6809_p4 }
  0x42   :  { %p6812_p7 = pnand %p6811_p6, %p6805_p3 }
  0x44   :  { %6815 = shalt.err (!%p6812_p7)
}
  0x45   :  { %105 = dma.hbm_to_vmem [thread:$0]  %s7241_s3, 16, %s103_s10, [#allocation7]  }
  0x46   :  { %s6816_s22 = scalar_lea.hbm %s7251_s14, 64 }
  0x47   :  { %p6817_p8 = scmp.ne.s32.totalorder %s7251_s14, %s6816_s22  ;;  %p6820_p9 = scmp.lt.u32.totalorder %s6816_s22, %s7251_s14 }
  0x49   :  { %p6822_p10 = pnand %p6820_p9, %p6817_p8 }
  0x4b   :  { %6825 = shalt.err (!%p6822_p10)
}
  0x4c   :  { %s6826_s23 = scalar_lea.vmem %s123_s15, 64  ;;  %p6831_p12 = scmp.lt.s32.totalorder %s123_s15, %s123_s15 }
  0x4d   :  { %p6827_p11 = scmp.ne.s32.totalorder %s123_s15, %s6826_s23  ;;  %p6832_p13 = scmp.lt.s32.totalorder %s6826_s23, %s6826_s23 }
  0x4f   :  { %p6833_p0 = por %p6832_p13, %p6831_p12 }
  0x51   :  { %p6834_p1 = pnand %p6833_p0, %p6827_p11 }
  0x53   :  { %6837 = shalt.err (!%p6834_p1)
}
  0x54   :  { %125 = dma.hbm_to_vmem [thread:$0]  %s7251_s14, 64, %s123_s15, [#allocation10]  }
  0x55   :  { %s7173_s26 = smov [#allocation12]   ;;  %s7174_s3 = smov [#allocation15]  }
  0x56   :  { %s142_s28 = sshll.u32 %s7173_s26, 4  ;;  %s166_s1 = sshll.u32 %s7174_s3, 4  ;;  %s143_s28 = int_to_ptr.vmem [resolvable:$true] %s142_s28  ;;  %s167_s1 = int_to_ptr.vmem [resolvable:$true] %s166_s1 }
  0x57   :  { %s6838_s2 = scalar_lea.hbm %s7261_s24, 16 }
  0x58   :  { %p6839_p2 = scmp.ne.s32.totalorder %s7261_s24, %s6838_s2  ;;  %p6842_p3 = scmp.lt.u32.totalorder %s6838_s2, %s7261_s24 }
  0x5a   :  { %p6844_p4 = pnand %p6842_p3, %p6839_p2 }
  0x5c   :  { %6847 = shalt.err (!%p6844_p4)
}
  0x5d   :  { %s6848_s7 = scalar_lea.vmem %s143_s28, 16  ;;  %s6852_s10 = scalar_lea.vmem %s143_s28, 32 }
  0x5e   :  { %p6849_p5 = scmp.ne.s32.totalorder %s143_s28, %s6848_s7  ;;  %p6853_p6 = scmp.lt.s32.totalorder %s143_s28, %s143_s28 }
  0x5f   :  { %p6854_p7 = scmp.lt.s32.totalorder %s6852_s10, %s6848_s7 }
  0x61   :  { %p6855_p8 = por %p6854_p7, %p6853_p6 }
  0x63   :  { %p6856_p9 = pnand %p6855_p8, %p6849_p5 }
  0x65   :  { %6859 = shalt.err (!%p6856_p9)
}
  0x66   :  { %145 = dma.hbm_to_vmem [thread:$0]  %s7261_s24, 16, %s143_s28, [#allocation13]  }
  0x67   :  { %s6860_s14 = scalar_lea.hbm %s7281_s20, 16 }
  0x68   :  { %p6861_p10 = scmp.ne.s32.totalorder %s7281_s20, %s6860_s14  ;;  %p6864_p11 = scmp.lt.u32.totalorder %s6860_s14, %s7281_s20 }
  0x6a   :  { %p6866_p12 = pnand %p6864_p11, %p6861_p10 }
  0x6c   :  { %6869 = shalt.err (!%p6866_p12)
}
  0x6d   :  { %s6870_s11 = scalar_lea.vmem %s167_s1, 16  ;;  %s6874_s15 = scalar_lea.vmem %s167_s1, 32 }
  0x6e   :  { %p6871_p13 = scmp.ne.s32.totalorder %s167_s1, %s6870_s11  ;;  %p6875_p0 = scmp.lt.s32.totalorder %s167_s1, %s167_s1 }
  0x6f   :  { %p6876_p1 = scmp.lt.s32.totalorder %s6874_s15, %s6870_s11 }
  0x71   :  { %p6877_p2 = por %p6876_p1, %p6875_p0 }
  0x73   :  { %p6878_p3 = pnand %p6877_p2, %p6871_p13 }
  0x75   :  { %6881 = shalt.err (!%p6878_p3)
}
  0x76   :  { %169 = dma.hbm_to_vmem [thread:$0]  %s7281_s20, 16, %s167_s1, [#allocation16]  }
  0x77   :  { %s7175_s0 = smov [#allocation18]   ;;  %s6882_s16 = scalar_lea.hbm %s7301_s12, 48 }
  0x78   :  { %s189_s24 = sshll.u32 %s7175_s0, 4  ;;  %p6883_p4 = scmp.ne.s32.totalorder %s7301_s12, %s6882_s16  ;;  %s190_s24 = int_to_ptr.vmem [resolvable:$true] %s189_s24 }
  0x79   :  { %p6886_p5 = scmp.lt.u32.totalorder %s6882_s16, %s7301_s12 }
  0x7b   :  { %p6888_p6 = pnand %p6886_p5, %p6883_p4 }
  0x7d   :  { %6891 = shalt.err (!%p6888_p6)
}
  0x7e   :  { %s6892_s18 = scalar_lea.vmem %s190_s24, 48  ;;  %s6896_s22 = scalar_lea.vmem %s190_s24, 64 }
  0x7f   :  { %p6893_p7 = scmp.ne.s32.totalorder %s190_s24, %s6892_s18  ;;  %p6897_p8 = scmp.lt.s32.totalorder %s190_s24, %s190_s24 }
  0x80   :  { %p6898_p9 = scmp.lt.s32.totalorder %s6896_s22, %s6892_s18 }
  0x82   :  { %p6899_p10 = por %p6898_p9, %p6897_p8 }
  0x84   :  { %p6900_p11 = pnand %p6899_p10, %p6893_p7 }
  0x86   :  { %6903 = shalt.err (!%p6900_p11)
}
  0x87   :  { %s7176_s23 = smov 16   ;;  %s7177_s20 = smov 1  }
  0x88   :  { %195 = dma.hbm_to_vmem [thread:$0]  %s7301_s12, 48, %s190_s24, [#allocation19], %s7176_s23, %s7176_s23, %s7177_s20  }
  0x89   :  { %s7178_s26 = smov [#allocation21]   ;;  %s7179_s3 = smov [#allocation3]  }
  0x8a   :  { %s216_s28 = sshll.u32 %s7178_s26, 4  ;;  %s92_s1 = sshll.u32 %s7179_s3, 4  ;;  %s217_s28 = int_to_ptr.vmem [resolvable:$true] %s216_s28  ;;  %s93_s1 = int_to_ptr.vmem [resolvable:$true] %s92_s1 }
  0x8b   :  { %s6904_s2 = scalar_lea.hbm %s7321_s13, 128 }
  0x8c   :  { %p6905_p12 = scmp.ne.s32.totalorder %s7321_s13, %s6904_s2  ;;  %p6908_p13 = scmp.lt.u32.totalorder %s6904_s2, %s7321_s13 }
  0x8e   :  { %p6910_p0 = pnand %p6908_p13, %p6905_p12 }
  0x90   :  { %6913 = shalt.err (!%p6910_p0)
}
  0x91   :  { %s6914_s7 = scalar_lea.vmem %s217_s28, 128  ;;  %p6919_p2 = scmp.lt.s32.totalorder %s217_s28, %s217_s28 }
  0x92   :  { %p6915_p1 = scmp.ne.s32.totalorder %s217_s28, %s6914_s7  ;;  %p6920_p3 = scmp.lt.s32.totalorder %s6914_s7, %s6914_s7 }
  0x94   :  { %p6921_p4 = por %p6920_p3, %p6919_p2 }
  0x96   :  { %p6922_p5 = pnand %p6921_p4, %p6915_p1 }
  0x98   :  { %6925 = shalt.err (!%p6922_p5)
}
  0x99   :  { %219 = dma.hbm_to_vmem [thread:$0]  %s7321_s13, 128, %s217_s28, [#allocation22]  }
  0x9a   :  { %s6926_s12 = scalar_lea.hbm %s7236_s29, 16 }
  0x9b   :  { %p6927_p6 = scmp.ne.s32.totalorder %s7236_s29, %s6926_s12  ;;  %p6930_p7 = scmp.lt.u32.totalorder %s6926_s12, %s7236_s29 }
  0x9d   :  { %p6932_p8 = pnand %p6930_p7, %p6927_p6 }
  0x9f   :  { %6935 = shalt.err (!%p6932_p8)
}
  0xa0   :  { %s6936_s10 = scalar_lea.vmem %s93_s1, 16  ;;  %s6940_s14 = scalar_lea.vmem %s93_s1, 32 }
  0xa1   :  { %p6937_p9 = scmp.ne.s32.totalorder %s93_s1, %s6936_s10  ;;  %p6941_p10 = scmp.lt.s32.totalorder %s93_s1, %s93_s1 }
  0xa2   :  { %p6942_p11 = scmp.lt.s32.totalorder %s6940_s14, %s6936_s10 }
  0xa4   :  { %p6943_p12 = por %p6942_p11, %p6941_p10 }
  0xa6   :  { %p6944_p13 = pnand %p6943_p12, %p6937_p9 }
  0xa8   :  { %6947 = shalt.err (!%p6944_p13)
}
  0xa9   :  { %95 = dma.hbm_to_vmem [thread:$0]  %s7236_s29, 16, %s93_s1, [#allocation4]  }
  0xaa   :  { %s7180_s13 = smov [#allocation8]   ;;  %s7181_s15 = smov [#allocation11]  }
  0xab   :  { %s112_s11 = sshll.u32 %s7180_s13, 4  ;;  %s132_s0 = sshll.u32 %s7181_s15, 4  ;;  %s113_s11 = int_to_ptr.vmem [resolvable:$true] %s112_s11  ;;  %s133_s0 = int_to_ptr.vmem [resolvable:$true] %s132_s0 }
  0xac   :  { %s6948_s24 = scalar_lea.hbm %s7246_s8, 64 }
  0xad   :  { %p6949_p0 = scmp.ne.s32.totalorder %s7246_s8, %s6948_s24  ;;  %p6952_p1 = scmp.lt.u32.totalorder %s6948_s24, %s7246_s8 }
  0xaf   :  { %p6954_p2 = pnand %p6952_p1, %p6949_p0 }
  0xb1   :  { %6957 = shalt.err (!%p6954_p2)
}
  0xb2   :  { %s6958_s16 = scalar_lea.vmem %s113_s11, 64  ;;  %p6963_p4 = scmp.lt.s32.totalorder %s113_s11, %s113_s11 }
  0xb3   :  { %p6959_p3 = scmp.ne.s32.totalorder %s113_s11, %s6958_s16  ;;  %p6964_p5 = scmp.lt.s32.totalorder %s6958_s16, %s6958_s16 }
  0xb5   :  { %p6965_p6 = por %p6964_p5, %p6963_p4 }
  0xb7   :  { %p6966_p7 = pnand %p6965_p6, %p6959_p3 }
  0xb9   :  { %6969 = shalt.err (!%p6966_p7)
}
  0xba   :  { %115 = dma.hbm_to_vmem [thread:$0]  %s7246_s8, 64, %s113_s11, [#allocation7]  }
  0xbb   :  { %s6970_s29 = scalar_lea.hbm %s7256_s19, 64 }
  0xbc   :  { %p6971_p8 = scmp.ne.s32.totalorder %s7256_s19, %s6970_s29  ;;  %p6974_p9 = scmp.lt.u32.totalorder %s6970_s29, %s7256_s19 }
  0xbe   :  { %p6976_p10 = pnand %p6974_p9, %p6971_p8 }
  0xc0   :  { %6979 = shalt.err (!%p6976_p10)
}
  0xc1   :  { %s6980_s18 = scalar_lea.vmem %s133_s0, 64  ;;  %p6985_p12 = scmp.lt.s32.totalorder %s133_s0, %s133_s0 }
  0xc2   :  { %p6981_p11 = scmp.ne.s32.totalorder %s133_s0, %s6980_s18  ;;  %p6986_p13 = scmp.lt.s32.totalorder %s6980_s18, %s6980_s18 }
  0xc4   :  { %p6987_p0 = por %p6986_p13, %p6985_p12 }
  0xc6   :  { %p6988_p1 = pnand %p6987_p0, %p6981_p11 }
  0xc8   :  { %6991 = shalt.err (!%p6988_p1)
}
  0xc9   :  { %135 = dma.hbm_to_vmem [thread:$0]  %s7256_s19, 64, %s133_s0, [#allocation10]  }
  0xca   :  { %s7182_s22 = smov [#allocation14]   ;;  %s7183_s23 = smov [#allocation17]  }
  0xcb   :  { %s152_s8 = sshll.u32 %s7182_s22, 4  ;;  %s178_s20 = sshll.u32 %s7183_s23, 4  ;;  %s153_s8 = int_to_ptr.vmem [resolvable:$true] %s152_s8  ;;  %s179_s20 = int_to_ptr.vmem [resolvable:$true] %s178_s20 }
  0xcc   :  { %s6992_s26 = scalar_lea.hbm %s7266_s30, 16 }
  0xcd   :  { %p6993_p2 = scmp.ne.s32.totalorder %s7266_s30, %s6992_s26  ;;  %p6996_p3 = scmp.lt.u32.totalorder %s6992_s26, %s7266_s30 }
  0xcf   :  { %p6998_p4 = pnand %p6996_p3, %p6993_p2 }
  0xd1   :  { %7001 = shalt.err (!%p6998_p4)
}
  0xd2   :  { %s7002_s28 = scalar_lea.vmem %s153_s8, 16  ;;  %s7006_s3 = scalar_lea.vmem %s153_s8, 32 }
  0xd3   :  { %p7003_p5 = scmp.ne.s32.totalorder %s153_s8, %s7002_s28  ;;  %p7007_p6 = scmp.lt.s32.totalorder %s153_s8, %s153_s8 }
  0xd4   :  { %p7008_p7 = scmp.lt.s32.totalorder %s7006_s3, %s7002_s28 }
  0xd6   :  { %p7009_p8 = por %p7008_p7, %p7007_p6 }
  0xd8   :  { %p7010_p9 = pnand %p7009_p8, %p7003_p5 }
  0xda   :  { %7013 = shalt.err (!%p7010_p9)
}
  0xdb   :  { %155 = dma.hbm_to_vmem [thread:$0]  %s7266_s30, 16, %s153_s8, [#allocation13]  }
  0xdc   :  { %s7014_s19 = scalar_lea.hbm %s7291_s4, 16 }
  0xdd   :  { %p7015_p10 = scmp.ne.s32.totalorder %s7291_s4, %s7014_s19  ;;  %p7018_p11 = scmp.lt.u32.totalorder %s7014_s19, %s7291_s4 }
  0xdf   :  { %p7020_p12 = pnand %p7018_p11, %p7015_p10 }
  0xe1   :  { %7023 = shalt.err (!%p7020_p12)
}
  0xe2   :  { %s7024_s1 = scalar_lea.vmem %s179_s20, 16  ;;  %s7028_s2 = scalar_lea.vmem %s179_s20, 32 }
  0xe3   :  { %p7025_p13 = scmp.ne.s32.totalorder %s179_s20, %s7024_s1  ;;  %p7029_p0 = scmp.lt.s32.totalorder %s179_s20, %s179_s20 }
  0xe4   :  { %p7030_p1 = scmp.lt.s32.totalorder %s7028_s2, %s7024_s1 }
  0xe6   :  { %p7031_p2 = por %p7030_p1, %p7029_p0 }
  0xe8   :  { %p7032_p3 = pnand %p7031_p2, %p7025_p13 }
  0xea   :  { %7035 = shalt.err (!%p7032_p3)
}
  0xeb   :  { %181 = dma.hbm_to_vmem [thread:$0]  %s7291_s4, 16, %s179_s20, [#allocation16]  }
  0xec   :  { %s7184_s30 = smov [#allocation20]   ;;  %s7185_s12 = smov [#allocation23]  }
  0xed   :  { %s204_s7 = sshll.u32 %s7184_s30, 4  ;;  %s228_s10 = sshll.u32 %s7185_s12, 4  ;;  %s205_s7 = int_to_ptr.vmem [resolvable:$true] %s204_s7  ;;  %s229_s10 = int_to_ptr.vmem [resolvable:$true] %s228_s10 }
  0xee   :  { %s7036_s14 = scalar_lea.hbm %s7311_s6, 16 }
  0xef   :  { %p7037_p4 = scmp.ne.s32.totalorder %s7311_s6, %s7036_s14  ;;  %p7040_p5 = scmp.lt.u32.totalorder %s7036_s14, %s7311_s6 }
  0xf1   :  { %p7042_p6 = pnand %p7040_p5, %p7037_p4 }
  0xf3   :  { %7045 = shalt.err (!%p7042_p6)
}
  0xf4   :  { %s7046_s13 = scalar_lea.vmem %s205_s7, 16  ;;  %s7050_s11 = scalar_lea.vmem %s205_s7, 32 }
  0xf5   :  { %p7047_p7 = scmp.ne.s32.totalorder %s205_s7, %s7046_s13  ;;  %p7051_p8 = scmp.lt.s32.totalorder %s205_s7, %s205_s7 }
  0xf6   :  { %p7052_p9 = scmp.lt.s32.totalorder %s7050_s11, %s7046_s13 }
  0xf8   :  { %p7053_p10 = por %p7052_p9, %p7051_p8 }
  0xfa   :  { %p7054_p11 = pnand %p7053_p10, %p7047_p7 }
  0xfc   :  { %7057 = shalt.err (!%p7054_p11)
}
  0xfd   :  { %207 = dma.hbm_to_vmem [thread:$0]  %s7311_s6, 16, %s205_s7, [#allocation19]  }
  0xfe   :  { %s7058_s4 = scalar_lea.hbm %s7331_s25, 16 }
  0xff   :  { %p7059_p12 = scmp.ne.s32.totalorder %s7331_s25, %s7058_s4  ;;  %p7062_p13 = scmp.lt.u32.totalorder %s7058_s4, %s7331_s25 }
 0x101   :  { %p7064_p0 = pnand %p7062_p13, %p7059_p12 }
 0x103   :  { %7067 = shalt.err (!%p7064_p0)
}
 0x104   :  { %s7068_s15 = scalar_lea.vmem %s229_s10, 16  ;;  %s7072_s0 = scalar_lea.vmem %s229_s10, 32 }
 0x105   :  { %p7069_p1 = scmp.ne.s32.totalorder %s229_s10, %s7068_s15  ;;  %p7073_p2 = scmp.lt.s32.totalorder %s229_s10, %s229_s10 }
 0x106   :  { %p7074_p3 = scmp.lt.s32.totalorder %s7072_s0, %s7068_s15 }
 0x108   :  { %p7075_p4 = por %p7074_p3, %p7073_p2 }
 0x10a   :  { %p7076_p5 = pnand %p7075_p4, %p7069_p1 }
 0x10c   :  { %7079 = shalt.err (!%p7076_p5)
}
 0x10d   :  { %231 = dma.hbm_to_vmem [thread:$0]  %s7331_s25, 16, %s229_s10, [#allocation22]  }
 0x10e   :  { %s7186_s6 = smov [#allocation24]   ;;  %s7080_s16 = scalar_lea.hbm %s7341_s21, 16 }
 0x10f   :  { %s240_s24 = sshll.u32 %s7186_s6, 4  ;;  %p7081_p6 = scmp.ne.s32.totalorder %s7341_s21, %s7080_s16  ;;  %s241_s24 = int_to_ptr.vmem [resolvable:$true] %s240_s24 }
 0x110   :  { %p7084_p7 = scmp.lt.u32.totalorder %s7080_s16, %s7341_s21 }
 0x112   :  { %p7086_p8 = pnand %p7084_p7, %p7081_p6 }
 0x114   :  { %7089 = shalt.err (!%p7086_p8)
}
 0x115   :  { %s7090_s29 = scalar_lea.vmem %s241_s24, 16  ;;  %s7094_s18 = scalar_lea.vmem %s241_s24, 32 }
 0x116   :  { %p7091_p9 = scmp.ne.s32.totalorder %s241_s24, %s7090_s29  ;;  %p7095_p10 = scmp.lt.s32.totalorder %s241_s24, %s241_s24 }
 0x117   :  { %p7096_p11 = scmp.lt.s32.totalorder %s7094_s18, %s7090_s29 }
 0x119   :  { %p7097_p12 = por %p7096_p11, %p7095_p10 }
 0x11b   :  { %p7098_p13 = pnand %p7097_p12, %p7091_p9 }
 0x11d   :  { %7101 = shalt.err (!%p7098_p13)
}
 0x11e   :  { %243 = dma.hbm_to_vmem [thread:$0]  %s7341_s21, 16, %s241_s24, [#allocation25]  }
 0x11f   :  { %7124 = dma.done.wait [#allocation4], 16  }
 0x120   :  { %7125 = vsyncadd [#allocation4], 4294967280 }
 0x121   :  { %7126 = dma.done.wait [#allocation7], 80  }
 0x122   :  { %7127 = vsyncadd [#allocation7], 4294967216 }
 0x123   :  { %7128 = dma.done.wait [#allocation10], 128  }
 0x124   :  { %7129 = vsyncadd [#allocation10], 4294967168 }
 0x125   :  { %7130 = dma.done.wait [#allocation13], 32  }
 0x126   :  { %7131 = vsyncadd [#allocation13], 4294967264 }
 0x127   :  { %7132 = dma.done.wait [#allocation16], 32  }
 0x128   :  { %7133 = vsyncadd [#allocation16], 4294967264 }
 0x129   :  { %7134 = dma.done.wait [#allocation19], 64  }
 0x12a   :  { %7135 = vsyncadd [#allocation19], 4294967232 }
 0x12b   :  { %7136 = dma.done.wait [#allocation22], 144  }
 0x12c   :  { %7137 = vsyncadd [#allocation22], 4294967152 }
 0x12d   :  { %7138 = dma.done.wait [#allocation25], 16  }
 0x12e   :  { %7139 = vsyncadd [#allocation25], 4294967280  ;;  %s8417_s21 = sld [smem:[#allocation36_spill]]  ;;  %vm306_vm0 = vcmask 1043456   ;;  %vm299_vm1 = vcmask 228352   ;;  %v288_v0 = vld [vmem:[%s7211_s9] sm:$0xff]  ;;  %v583_v18 = vlaneseq }
 0x12f   :  { %s8418_s25 = sld [smem:[#allocation39_spill]]  ;;  %v289_v1 = vld [vmem:[%s7211_s9 + $0x8] sm:$0xff]  ;;  %s8419_s22 = sld [smem:[#allocation40_spill]]  ;;  %v290_v2 = vld [vmem:[%s7211_s9 + $0x10] sm:$0xff]  ;;  %v291_v4 = vld [vmem:[%s7211_s9 + $0x18] sm:$0xf] }
 0x130   :  { %v6347_v3 = vpack.c.bf16 %v289_v1, %v288_v0  ;;  %v6351_v6 = vpack.c.bf16 %v291_v4, %v290_v2  ;;  %vm7187_vm2 = vmmov 1   ;;  %s8422_s8 = sld [smem:[#allocation37_spill]]  ;;  %v7188_v11 = vmov 0.0   ;;  %v7448_v20 = vld [vmem:[#allocation8] sm:$0xf]  ;;  %s8423_s9 = sld [smem:[#allocation41_spill]] }
 0x131   :  { %vm7415_vm3 = vmpackc.low %vm306_vm0, %vm7187_vm2  ;;  %6047 = vmatprep.subr.mxu1 %v7188_v11  ;;  %vm7189_vm4 = vmmov 0   ;;  %v7446_v19 = vshrl.u32 %v583_v18, 7  ;;  %vm435_vm5 = vcmask 64512   ;;  %v7465_v27 = vld [vmem:[#allocation9] sm:$0xf]  ;;  %vm881_vm6 = vcmask 31744  }
 0x132   :  { %6348 = vmatprep.subr.bf16.mxu0 %v6347_v3  ;;  %6049 = vmatprep.mubr.msk.f32.mxu1 %vm7189_vm4, %v7188_v11  ;;  %v7190_v29 = vmov 1966171168   ;;  %v7484_v32 = vld [vmem:[#allocation3] ss:$0 sm:$0xff]  ;;  %v7499_v55 = vld [vmem:[#allocation6] ss:$0 sm:$0xff] }
 0x133   :  { %6350 = vmatpush3.bf16.msra.mxu0 %v6347_v3  ;;  %v7451_v21 = vsub.s32 0, %v7446_v19  ;;  %v7454_v22 = vsub.s32 1, %v7446_v19  ;;  %v7461_v25 = vsub.s32 2, %v7446_v19  ;;  %v581_v30 = vunpack.c.l.s4 %v7190_v29  ;;  %s7192_s23 = smov 8   ;;  %s8428_s20 = sld [smem:[#allocation42_spill]] }
 0x134   :  { %v286_v5 = vld [vmem:[%s8417_s21] sm:$0xff]  ;;  %6353 = vmatprep.subr.msk.bf16.mxu0 %vm7415_vm3, %v6351_v6  ;;  %v287_v8 = vld [vmem:[%s8417_s21 + $0x8] sm:$0xff]  ;;  %vm650_vm9 = vcmask 125952   ;;  %vm734_vm12 = vcmask 1041409   ;;  %vm736_vm13 = vcmask 1042434   ;;  %vm738_vm14 = vcmask 1043459  }
 0x135   :  { %6039 = vmatprep.mubr.msk.f32.mxu0 %vm299_vm1, %v286_v5  ;;  %v7427_v9 = vld [vmem:[%s8418_s25] sm:$0xff]  ;;  %v667_v23 = vrot.slane %v7448_v20, %v7451_v21  ;;  %v674_v24 = vrot.slane %v7448_v20, %v7454_v22  ;;  %v681_v26 = vrot.slane %v7448_v20, %v7461_v25  ;;  %v582_v31 = vunpack.c.0.s8 %v581_v30  ;;  %s7193_s26 = smov 4   ;;  %s8431_s28 = sld [smem:[#allocation43_spill]] }
 0x136   :  { %v388_v10 = vld [vmem:[%s8419_s22] sm:$0xff]  ;;  %vm741_vm15 = vcmask 27648   ;;  %s8432_s3 = sld [smem:[#allocation38_spill]]  ;;  %s7195_s19 = smov 64  }
 0x137   :  { %6356 = vmatpush3.bf16.msk.msra.mxu0 %vm7415_vm3, %v6351_v6  ;;  %6048 = vmatpush3.msra.mxu1 %v388_v10  ;;  %v5796_v12 = vld [vmem:[%s8422_s8] ss:$0 sm:$0xff]  ;;  %v7487_v33 = vsub.s32 %v582_v31, %v7446_v19  ;;  %v7191_v10 = vmov 0   ;;  %s7196_s1 = smov 96   ;;  %s8433_s2 = sld [smem:[#allocation44_spill]] }
 0x138   :  { %6042 = vmatprep.subr.mxu0 %v7188_v11  ;;  %6052 = vmatprep.subr.mxu1 %v7188_v11  ;;  %s8434_s30 = sld [smem:[#allocation46_spill]]  ;;  %s8435_s7 = sld [smem:[#allocation45_spill]] }
 0x139   :  { %669 = vbcast.lane.b32.xlu1 %v667_v23, 256  ;;  %s8436_s12 = sld [smem:[#allocation47_spill]] }
 0x13a   :  { %6040 = vmatmul.mubr.msk.f32.vlgmr.msra.gmra.mrb[0].mxu0 %vm299_vm1, %v287_v8  ;;  %6583 = vset.pattern.permute.xlu1 %v7191_v10 }
 0x13b   :  { %6043 = vmatpush3.msra.mxu0 %v7427_v9  ;;  %6044 = vmatprep.mubr.msk.f32.mxu0 %vm7189_vm4, %v7188_v11 }
 0x13c   :  { %6057 = vmatprep.subr.mxu0 %v7188_v11 }
 0x13d   :  { %676 = vbcast.lane.b32.xlu1 %v674_v24, 256 }
 0x141   :  { %683 = vbcast.lane.b32.xlu1 %v681_v26, 256 }
 0x20d   :  { %v6041_v13 = vpop.f32.mrb[0].mxu0 }
 0x20e   :  { %v7440_v14 = vadd.f32 %v6041_v13, %v5796_v12  ;;  %v376_v15 = vpop.f32.mrb[1].mxu0 }
 0x20f   :  { %v377_v16 = vadd.f32 %v5796_v12, %v376_v15  ;;  %v7510_v12 = vsub.s32 3, %v7446_v19  ;;  %v7514_v15 = vpop.permute.xlu1 %669 }
 0x211   :  { %v7442_v17 = vmax.f32 %v377_v16, 0.0  ;;  %v688_v13 = vrot.slane %v7448_v20, %v7510_v12 }
 0x213   :  { %397 = vxpose.xlu0.b32.start.end [1/1] (short) (narrow) %v7442_v17, 8  ;;  %v7516_v16 = vpop.permute.xlu1 %676 }
 0x217   :  { %v7518_v23 = vpop.permute.xlu1 %683 }
 0x23c   :  { %6584 = vset.pattern.permute.xlu0 %v7191_v10 }
 0x293   :  { %v413_v28 = vpop.trf.xlu0 }
 0x294   :  { %6045 = vmatmul.mubr.msk.f32.vlgmr.msra.gmra.mrb[2].mxu0 %vm435_vm5, %v413_v28  ;;  %6050 = vmatmul.mubr.msk.f32.vlgmr.msra.gmra.mrb[0].mxu1 %vm435_vm5, %v413_v28 }
 0x295   :  { %6053 = vmatpush3.msk.msra.mxu1 %vm306_vm0, %v413_v28  ;;  %6058 = vmatpush3.msk.msra.mxu0 %vm306_vm0, %v7465_v27 }
 0x296   :  { %6059 = vmatprep.mubr.msk.f32.mxu0 %vm7189_vm4, %v7188_v11  ;;  %6067 = vmatprep.subr.mxu0 %v7188_v11 }
 0x297   :  { %6054 = vmatprep.mubr.msk.f32.mxu1 %vm7189_vm4, %v7188_v11  ;;  %6062 = vmatprep.subr.mxu1 %v7188_v11 }
 0x298   :  { %6060 = vmatmul.mubr.msk.f32.vlgmr.msra.gmra.mrb[4].mxu0 %vm881_vm6, %v7442_v17 }
 0x299   :  { %6068 = vmatpush3.msra.mxu0 %v7442_v17  ;;  %6069 = vmatprep.mubr.msk.f32.mxu0 %vm7189_vm4, %v7188_v11 }
 0x29a   :  { %6077 = vmatprep.subr.mxu0 %v7188_v11 }
 0x367   :  { %v505_v34 = vpop.f32.mrb[2].mxu0  ;;  %v575_v35 = vpop.f32.mrb[0].mxu1 }
 0x368   :  { %v506_v36 = vadd.f32 %v7484_v32, %v505_v34  ;;  %v6046_v37 = vpop.f32.mrb[3].mxu0  ;;  %v6051_v38 = vpop.f32.mrb[1].mxu1 }
 0x369   :  { %v717_v37 = vand.u32 127, %v583_v18 }
 0x36a   :  { %v586_v39 = vrot.slane %v506_v36, %v7487_v33 }
 0x36b   :  { %v7491_v40 = vpop.f32.mrb[4].mxu0 }
 0x36c   :  { %v587_v41 = vcombine.high %v586_v39, %v586_v39  ;;  %v594_v42 = vrot.slane %v586_v39, %v7487_v33  ;;  %v6061_v43 = vpop.f32.mrb[5].mxu0  ;;  %v7528_v39 = vsub.s32 %v717_v37, %v7446_v19 }
 0x36e   :  { %v601_v44 = vrot.slane %v587_v41, %v7487_v33  ;;  %v602_v45 = vcombine.high %v594_v42, %v594_v42  ;;  %v607_v46 = vrot.slane %v594_v42, %v7451_v21 }
 0x370   :  { %v603_v47 = vcombine.high %v601_v44, %v601_v44  ;;  %v611_v48 = vrot.slane %v601_v44, %v7451_v21  ;;  %v615_v49 = vrot.slane %v602_v45, %v7451_v21  ;;  %v624_v50 = vadd.f32 %v607_v46, %v575_v35 }
 0x372   :  { %v619_v51 = vrot.slane %v603_v47, %v7451_v21  ;;  %v625_v52 = vadd.f32 %v611_v48, %v575_v35  ;;  %v626_v53 = vadd.f32 %v615_v49, %v575_v35  ;;  %vm628_vm7 = vcmp.ge.f32.partialorder %v624_v50, 0.0 }
 0x373   :  { %v632_v56 = vmul.f32 0.2, %v624_v50 }
 0x374   :  { %v627_v54 = vadd.f32 %v619_v51, %v575_v35  ;;  %vm629_vm8 = vcmp.ge.f32.partialorder %v625_v52, 0.0  ;;  %v633_v58 = vmul.f32 0.2, %v625_v52  ;;  %vm630_vm10 = vcmp.ge.f32.partialorder %v626_v53, 0.0 }
 0x375   :  { %v636_v57 = vsel %vm628_vm7, %v624_v50, %v632_v56  ;;  %v634_v60 = vmul.f32 0.2, %v626_v53 }
 0x376   :  { %v646_v59 = vmul.f32 %v7499_v55, %v636_v57  ;;  %v637_v61 = vsel %vm629_vm8, %v625_v52, %v633_v58  ;;  %v635_v62 = vmul.f32 0.2, %v627_v54  ;;  %vm631_vm11 = vcmp.ge.f32.partialorder %v627_v54, 0.0 }
 0x377   :  { %v647_v0 = vmul.f32 %v7499_v55, %v637_v61  ;;  %v638_v1 = vsel %vm630_vm10, %v626_v53, %v634_v60 }
 0x378   :  { %v651_v63 = vsel %vm650_vm9, %v646_v59, 0.0  ;;  %v648_v3 = vmul.f32 %v7499_v55, %v638_v1  ;;  %v639_v4 = vsel %vm631_vm11, %v627_v54, %v635_v62 }
 0x379   :  { %652 = vadd.xlane.f32.xlu0 %v651_v63  ;;  %v654_v2 = vsel %vm650_vm9, %v647_v0, 0.0  ;;  %v649_v6 = vmul.f32 %v7499_v55, %v639_v4 }
 0x37a   :  { %655 = vadd.xlane.f32.xlu1 %v654_v2  ;;  %v657_v5 = vsel %vm650_vm9, %v648_v3, 0.0 }
 0x37b   :  { %v660_v8 = vsel %vm650_vm9, %v649_v6, 0.0 }
 0x37e   :  { %658 = vadd.xlane.f32.xlu1 %v657_v5 }
 0x382   :  { %661 = vadd.xlane.f32.xlu1 %v660_v8 }
 0x393   :  { %690 = vbcast.lane.b32.xlu1 %v688_v13, 256 }
 0x406   :  { %v653_v24 = vpop.xlane.xlu0 %652 }
 0x407   :  { %v696_v26 = vadd.f32 %v7514_v15, %v653_v24  ;;  %v656_v28 = vpop.xlane.xlu1 %655 }
 0x408   :  { %v697_v29 = vadd.f32 %v7516_v16, %v656_v28 }
 0x409   :  { %705 = vperm.xlu1 %6583, %v696_v26  }
 0x40b   :  { %v659_v30 = vpop.xlane.xlu1 %658 }
 0x40c   :  { %v698_v31 = vadd.f32 %v7518_v23, %v659_v30 }
 0x40d   :  { %708 = vperm.xlu1 %6583, %v697_v29  }
 0x40e   :  { %711 = vperm.xlu0 %6584, %v698_v31  }
 0x40f   :  { %v662_v20 = vpop.xlane.xlu1 %661 }
 0x413   :  { %v7523_v34 = vpop.permute.xlu1 %690 }
 0x414   :  { %v699_v35 = vadd.f32 %v7523_v34, %v662_v20 }
 0x416   :  { %714 = vperm.xlu1 %6583, %v699_v35  }
 0x488   :  { %v706_v36 = vpop.permute.xlu1 %705 }
 0x489   :  { %v721_v43 = vrot.slane %v706_v36, %v7528_v39 }
 0x48c   :  { %v709_v38 = vpop.permute.xlu1 %708 }
 0x48d   :  { %v725_v41 = vrot.slane %v709_v38, %v7528_v39  ;;  %v712_v42 = vpop.permute.xlu0 %711 }
 0x48e   :  { %v729_v44 = vrot.slane %v712_v42, %v7528_v39 }
 0x48f   :  { %v735_v45 = vsel %vm734_vm12, %v725_v41, %v721_v43 }
 0x490   :  { %v737_v18 = vsel %vm736_vm13, %v729_v44, %v735_v45 }
 0x495   :  { %v715_v46 = vpop.permute.xlu1 %714 }
 0x496   :  { %v733_v47 = vrot.slane %v715_v46, %v7528_v39 }
 0x498   :  { %v739_v48 = vsel %vm738_vm14, %v733_v47, %v737_v18 }
 0x499   :  { %v742_v49 = vsel %vm741_vm15, %v739_v48, -inf  ;;  %v7555_v48 = vld [vmem:[%s8423_s9] sm:$0xff] }
 0x49a   :  { %743 = vmax.xlane.f32.xlu1 %v742_v49  ;;  %v1320_v49 = vrot.slane %v7555_v48, %v7454_v22 }
 0x527   :  { %v744_v50 = vpop.xlane.xlu1 %743 }
 0x528   :  { %v749_v51 = vrot.slane %v744_v50, %v7451_v21  ;;  %v753_v52 = vrot.slane %v744_v50, %v7454_v22  ;;  %v757_v53 = vrot.slane %v744_v50, %v7461_v25  ;;  %v761_v57 = vrot.slane %v744_v50, %v7510_v12 }
 0x529   :  { %v1313_v50 = vrot.slane %v7555_v48, %v7451_v21 }
 0x52a   :  { %v766_v54 = vsub.f32 %v696_v26, %v749_v51  ;;  %v767_v56 = vsub.f32 %v697_v29, %v753_v52  ;;  %v768_v58 = vsub.f32 %v698_v31, %v757_v53  ;;  %v769_v61 = vsub.f32 %v699_v35, %v761_v57 }
 0x52b   :  { %v1327_v51 = vrot.slane %v7555_v48, %v7461_v25  ;;  %v7564_v52 = vsub.s32 4, %v7446_v19  ;;  %v1334_v53 = vrot.slane %v7555_v48, %v7510_v12 }
 0x52c   :  { %v770_v59 = vmul.f32 1.442695, %v766_v54  ;;  %v772_v60 = vmul.f32 1.442695, %v767_v56  ;;  %v774_v62 = vmul.f32 1.442695, %v768_v58 }
 0x52d   :  { %v776_v63 = vmul.f32 1.442695, %v769_v61  ;;  %v7569_v54 = vsub.s32 5, %v7446_v19  ;;  %v1341_v56 = vrot.slane %v7555_v48, %v7564_v52 }
 0x52e   :  { %6585 = vpow2.f32 %v770_v59 }
 0x52f   :  { %6587 = vpow2.f32 %v772_v60  ;;  %v1348_v57 = vrot.slane %v7555_v48, %v7569_v54 }
 0x530   :  { %6589 = vpow2.f32 %v774_v62 }
 0x531   :  { %6591 = vpow2.f32 %v776_v63 }
 0x538   :  { %v6586_v0 = vpop.eup %6585 }
 0x539   :  { %v6588_v1 = vpop.eup %6587  ;;  %783 = vperm.xlu1 %6583, %v6586_v0  }
 0x53a   :  { %786 = vperm.xlu0 %6584, %v6588_v1   ;;  %v6590_v2 = vpop.eup %6589 }
 0x53b   :  { %v6592_v3 = vpop.eup %6591 }
 0x53e   :  { %789 = vperm.xlu0 %6584, %v6590_v2  }
 0x542   :  { %792 = vperm.xlu0 %6584, %v6592_v3  }
 0x5b8   :  { %v784_v5 = vpop.permute.xlu1 %783 }
 0x5b9   :  { %v787_v4 = vpop.permute.xlu0 %786  ;;  %v797_v10 = vrot.slane %v784_v5, %v7528_v39 }
 0x5ba   :  { %v801_v8 = vrot.slane %v787_v4, %v7528_v39  ;;  %v7581_v4 = vld [vmem:[#allocation11] sm:$0xf] }
 0x5bc   :  { %v810_v28 = vsel %vm734_vm12, %v801_v8, %v797_v10 }
 0x5bd   :  { %v790_v6 = vpop.permute.xlu0 %789 }
 0x5be   :  { %v805_v13 = vrot.slane %v790_v6, %v7528_v39  ;;  %v7596_v6 = vld [vmem:[#allocation12] ss:$0 sm:$0xff] }
 0x5bf   :  { %v1073_v8 = vadd.f32 %v7596_v6, %v7491_v40 }
 0x5c0   :  { %v811_v29 = vsel %vm736_vm13, %v805_v13, %v810_v28 }
 0x5c1   :  { %v793_v24 = vpop.permute.xlu0 %792  ;;  %v1150_v10 = vcombine.high %v1073_v8, %v1073_v8 }
 0x5c2   :  { %v809_v26 = vrot.slane %v793_v24, %v7528_v39  ;;  %v1157_v24 = vrot.slane %v1073_v8, %v7487_v33 }
 0x5c3   :  { %v1164_v13 = vrot.slane %v1150_v10, %v7487_v33 }
 0x5c4   :  { %v812_v30 = vsel %vm738_vm14, %v809_v26, %v811_v29  ;;  %v1165_v28 = vcombine.high %v1157_v24, %v1157_v24  ;;  %v1173_v29 = vrot.slane %v1157_v24, %v7487_v33 }
 0x5c5   :  { %v814_v31 = vsel %vm741_vm15, %v812_v30, 0.0  ;;  %v1166_v26 = vcombine.high %v1164_v13, %v1164_v13  ;;  %v1180_v30 = vrot.slane %v1164_v13, %v7487_v33 }
 0x5c6   :  { %815 = vadd.xlane.f32.xlu0 %v814_v31  ;;  %v1187_v31 = vrot.slane %v1165_v28, %v7487_v33 }
 0x5dc   :  { %1315 = vbcast.lane.b32.xlu0 %v1313_v50, 256 }
 0x5e0   :  { %1336 = vbcast.lane.b32.xlu0 %v1334_v53, 256 }
 0x5e4   :  { %1350 = vbcast.lane.b32.xlu0 %v1348_v57, 256 }
 0x653   :  { %v816_v20 = vpop.xlane.xlu0 %815 }
 0x654   :  { %v821_v35 = vrot.slane %v816_v20, %v7451_v21  ;;  %v825_v36 = vrot.slane %v816_v20, %v7454_v22  ;;  %v829_v37 = vrot.slane %v816_v20, %v7461_v25  ;;  %v833_v38 = vrot.slane %v816_v20, %v7510_v12 }
 0x655   :  { %v1195_v20 = vcombine.high %v1173_v29, %v1173_v29 }
 0x656   :  { %6593 = vrcp.f32 %v821_v35 }
 0x657   :  { %6595 = vrcp.f32 %v825_v36  ;;  %v1196_v36 = vcombine.high %v1180_v30, %v1180_v30 }
 0x658   :  { %6597 = vrcp.f32 %v829_v37  ;;  %v1197_v37 = vcombine.high %v1187_v31, %v1187_v31 }
 0x659   :  { %6599 = vrcp.f32 %v833_v38 }
 0x660   :  { %v6594_v41 = vpop.eup %6593 }
 0x661   :  { %v839_v42 = vmul.f32 %v6594_v41, %v6586_v0  ;;  %v6596_v43 = vpop.eup %6595  ;;  %v1202_v41 = vrot.slane %v1173_v29, %v7451_v21 }
 0x662   :  { %v841_v44 = vmul.f32 %v6596_v43, %v6588_v1  ;;  %v6598_v45 = vpop.eup %6597  ;;  %v1210_v43 = vrot.slane %v1195_v20, %v7451_v21 }
 0x663   :  { %851 = vperm.xlu1 %6583, %v839_v42   ;;  %v843_v46 = vmul.f32 %v6598_v45, %v6590_v2  ;;  %v6600_v47 = vpop.eup %6599  ;;  %v1206_v42 = vrot.slane %v1187_v31, %v7451_v21  ;;  %v1218_v45 = vrot.slane %v1180_v30, %v7451_v21 }
 0x664   :  { %v845_v18 = vmul.f32 %v6600_v47, %v6592_v3  ;;  %v1214_v47 = vrot.slane %v1197_v37, %v7451_v21 }
 0x667   :  { %854 = vperm.xlu1 %6583, %v841_v44  }
 0x66b   :  { %857 = vperm.xlu1 %6583, %v843_v46  }
 0x66f   :  { %860 = vperm.xlu1 %6583, %v845_v18  }
 0x673   :  { %1322 = vbcast.lane.b32.xlu1 %v1320_v49, 256  ;;  %v1226_v49 = vrot.slane %v1196_v36, %v7451_v21 }
 0x677   :  { %1329 = vbcast.lane.b32.xlu1 %v1327_v51, 256 }
 0x67b   :  { %1343 = vbcast.lane.b32.xlu1 %v1341_v56, 256 }
 0x6e2   :  { %v852_v58 = vpop.permute.xlu1 %851 }
 0x6e3   :  { %v865_v63 = vrot.slane %v852_v58, %v7528_v39  ;;  %v7616_v58 = vld [vmem:[#allocation14] ss:$0 sm:$0xff] }
 0x6e6   :  { %v855_v59 = vpop.permute.xlu1 %854 }
 0x6e7   :  { %v869_v61 = vrot.slane %v855_v59, %v7528_v39 }
 0x6e9   :  { %v878_v1 = vsel %vm734_vm12, %v869_v61, %v865_v63 }
 0x6ea   :  { %v858_v60 = vpop.permute.xlu1 %857 }
 0x6eb   :  { %v873_v62 = vrot.slane %v858_v60, %v7528_v39 }
 0x6ed   :  { %v879_v3 = vsel %vm736_vm13, %v873_v62, %v878_v1 }
 0x6ee   :  { %v861_v0 = vpop.permute.xlu1 %860 }
 0x6ef   :  { %v877_v2 = vrot.slane %v861_v0, %v7528_v39 }
 0x6f1   :  { %v880_v5 = vsel %vm738_vm14, %v877_v2, %v879_v3 }
 0x6f2   :  { %6055 = vmatmul.mubr.msk.f32.vlgmr.msra.gmra.mrb[2].mxu1 %vm881_vm6, %v880_v5 }
 0x6f3   :  { %6063 = vmatpush3.msk.msra.mxu1 %vm306_vm0, %v7581_v4  ;;  %6064 = vmatprep.mubr.msk.f32.mxu1 %vm7189_vm4, %v7188_v11 }
 0x6f4   :  { %6072 = vmatprep.subr.mxu1 %v7188_v11 }
 0x6f6   :  { %6065 = vmatmul.mubr.msk.f32.vlgmr.msra.gmra.mrb[4].mxu1 %vm881_vm6, %v7442_v17 }
 0x6f7   :  { %6073 = vmatpush3.msra.mxu1 %v7427_v9  ;;  %6074 = vmatprep.mubr.msk.f32.mxu1 %vm7189_vm4, %v7188_v11  ;;  %v1194_v9 = vrot.slane %v1166_v26, %v7487_v33 }
 0x6f8   :  { %6082 = vmatprep.subr.mxu1 %v7188_v11 }
 0x6f9   :  { %v1198_v35 = vcombine.high %v1194_v9, %v1194_v9  ;;  %v1222_v18 = vrot.slane %v1194_v9, %v7451_v21 }
 0x6fb   :  { %v1230_v44 = vrot.slane %v1198_v35, %v7451_v21 }
 0x7c5   :  { %v7606_v40 = vpop.f32.mrb[2].mxu1 }
 0x7c6   :  { %v6056_v38 = vpop.f32.mrb[3].mxu1 }
 0x7c9   :  { %v1145_v46 = vpop.f32.mrb[4].mxu1 }
 0x7ca   :  { %v6066_v50 = vpop.f32.mrb[5].mxu1  ;;  %v1239_v51 = vadd.f32 %v1202_v41, %v1145_v46  ;;  %v1240_v53 = vadd.f32 %v1206_v42, %v1145_v46  ;;  %v1241_v56 = vadd.f32 %v1210_v43, %v1145_v46  ;;  %v1246_v57 = vadd.f32 %v1230_v44, %v1145_v46 }
 0x7cb   :  { %v1242_v59 = vadd.f32 %v1214_v47, %v1145_v46  ;;  %v1243_v60 = vadd.f32 %v1218_v45, %v1145_v46  ;;  %v1244_v61 = vadd.f32 %v1222_v18, %v1145_v46  ;;  %v1245_v62 = vadd.f32 %v1226_v49, %v1145_v46 }
 0x7cc   :  { %vm1247_vm1 = vcmp.ge.f32.partialorder %v1239_v51, 0.0  ;;  %v1255_v63 = vmul.f32 0.2, %v1239_v51  ;;  %vm1248_vm2 = vcmp.ge.f32.partialorder %v1240_v53, 0.0  ;;  %v1256_v0 = vmul.f32 0.2, %v1240_v53 }
 0x7cd   :  { %vm1249_vm7 = vcmp.ge.f32.partialorder %v1241_v56, 0.0  ;;  %v1257_v1 = vmul.f32 0.2, %v1241_v56  ;;  %vm1254_vm8 = vcmp.ge.f32.partialorder %v1246_v57, 0.0  ;;  %v1262_v2 = vmul.f32 0.2, %v1246_v57 }
 0x7ce   :  { %v1263_v3 = vsel %vm1247_vm1, %v1239_v51, %v1255_v63  ;;  %v1264_v5 = vsel %vm1248_vm2, %v1240_v53, %v1256_v0  ;;  %vm1250_vm10 = vcmp.ge.f32.partialorder %v1242_v59, 0.0  ;;  %v1258_v8 = vmul.f32 0.2, %v1242_v59 }
 0x7cf   :  { %v1277_v10 = vmul.f32 %v7616_v58, %v1263_v3  ;;  %v1278_v13 = vmul.f32 %v7616_v58, %v1264_v5  ;;  %v1265_v24 = vsel %vm1249_vm7, %v1241_v56, %v1257_v1  ;;  %v1270_v26 = vsel %vm1254_vm8, %v1246_v57, %v1262_v2 }
 0x7d0   :  { %v1279_v9 = vmul.f32 %v7616_v58, %v1265_v24  ;;  %v1284_v30 = vmul.f32 %v7616_v58, %v1270_v26  ;;  %v1266_v31 = vsel %vm1250_vm10, %v1242_v59, %v1258_v8  ;;  %v1259_v20 = vmul.f32 0.2, %v1243_v60 }
 0x7d1   :  { %v1285_v28 = vsel %vm435_vm5, %v1277_v10, 0.0  ;;  %v1288_v29 = vsel %vm435_vm5, %v1278_v13, 0.0  ;;  %vm1251_vm11 = vcmp.ge.f32.partialorder %v1243_v60, 0.0  ;;  %v1280_v37 = vmul.f32 %v7616_v58, %v1266_v31 }
 0x7d2   :  { %1286 = vadd.xlane.f32.xlu1 %v1285_v28  ;;  %1289 = vadd.xlane.f32.xlu0 %v1288_v29  ;;  %v1291_v35 = vsel %vm435_vm5, %v1279_v9, 0.0  ;;  %v1306_v36 = vsel %vm435_vm5, %v1284_v30, 0.0  ;;  %v1267_v38 = vsel %vm1251_vm11, %v1243_v60, %v1259_v20  ;;  %v1260_v41 = vmul.f32 0.2, %v1244_v61  ;;  %v7644_v60 = vpop.permute.xlu0 %1315 }
 0x7d3   :  { %vm1252_vm1 = vcmp.ge.f32.partialorder %v1244_v61, 0.0  ;;  %v1294_v42 = vsel %vm435_vm5, %v1280_v37, 0.0  ;;  %v1281_v43 = vmul.f32 %v7616_v58, %v1267_v38  ;;  %v1261_v45 = vmul.f32 0.2, %v1245_v62 }
 0x7d4   :  { %v1268_v44 = vsel %vm1252_vm1, %v1244_v61, %v1260_v41  ;;  %vm1253_vm2 = vcmp.ge.f32.partialorder %v1245_v62, 0.0  ;;  %v7632_v49 = vsub.s32 6, %v7446_v19  ;;  %v7640_v57 = vsub.s32 7, %v7446_v19  ;;  %v7646_v61 = vpop.permute.xlu1 %1322 }
 0x7d5   :  { %v1297_v46 = vsel %vm435_vm5, %v1281_v43, 0.0  ;;  %v1282_v47 = vmul.f32 %v7616_v58, %v1268_v44  ;;  %v1269_v18 = vsel %vm1253_vm2, %v1245_v62, %v1261_v45  ;;  %vm1449_vm7 = vcmask 1044484  }
 0x7d6   :  { %1292 = vadd.xlane.f32.xlu0 %v1291_v35  ;;  %1307 = vadd.xlane.f32.xlu1 %v1306_v36  ;;  %v1283_v51 = vmul.f32 %v7616_v58, %v1269_v18  ;;  %v1355_v53 = vrot.slane %v7555_v48, %v7632_v49  ;;  %v1362_v59 = vrot.slane %v7555_v48, %v7640_v57  ;;  %v7648_v62 = vpop.permute.xlu0 %1336  ;;  %vm1451_vm8 = vcmask 1045509  }
 0x7d7   :  { %v1300_v50 = vsel %vm435_vm5, %v1282_v47, 0.0  ;;  %vm8404_vm10 = vcmask 1046534   ;;  %vm8403_vm11 = vcmask 1047559  }
 0x7d8   :  { %v1303_v56 = vsel %vm435_vm5, %v1283_v51, 0.0  ;;  %v7650_v63 = vpop.permute.xlu1 %1329 }
 0x7da   :  { %1295 = vadd.xlane.f32.xlu0 %v1294_v42  ;;  %v7652_v0 = vpop.permute.xlu0 %1350 }
 0x7dc   :  { %v7654_v1 = vpop.permute.xlu1 %1343 }
 0x7de   :  { %1298 = vadd.xlane.f32.xlu0 %v1297_v46 }
 0x7e2   :  { %1301 = vadd.xlane.f32.xlu0 %v1300_v50 }
 0x7e6   :  { %1304 = vadd.xlane.f32.xlu0 %v1303_v56 }
 0x7e7   :  { %1357 = vbcast.lane.b32.xlu1 %v1355_v53, 256 }
 0x7fc   :  { %1364 = vbcast.lane.b32.xlu0 %v1362_v59, 256 }
 0x85f   :  { %v1287_v2 = vpop.xlane.xlu1 %1286  ;;  %v1290_v3 = vpop.xlane.xlu0 %1289 }
 0x860   :  { %v1374_v19 = vadd.f32 %v7644_v60, %v1287_v2  ;;  %v1375_v5 = vadd.f32 %v7646_v61, %v1290_v3 }
 0x862   :  { %1394 = vperm.xlu0 %6584, %v1375_v5   ;;  %1391 = vperm.xlu1 %6583, %v1374_v19  }
 0x863   :  { %v1293_v48 = vpop.xlane.xlu0 %1292  ;;  %v1308_v28 = vpop.xlane.xlu1 %1307 }
 0x864   :  { %v1376_v8 = vadd.f32 %v7650_v63, %v1293_v48 }
 0x866   :  { %1397 = vperm.xlu1 %6583, %v1376_v8  }
 0x867   :  { %v1296_v10 = vpop.xlane.xlu0 %1295  ;;  %v7662_v30 = vpop.permute.xlu1 %1357 }
 0x868   :  { %v1377_v13 = vadd.f32 %v7648_v62, %v1296_v10 }
 0x86a   :  { %1400 = vperm.xlu0 %6584, %v1377_v13  }
 0x86b   :  { %v1299_v24 = vpop.xlane.xlu0 %1298 }
 0x86c   :  { %v1378_v26 = vadd.f32 %v7654_v1, %v1299_v24 }
 0x86e   :  { %1403 = vperm.xlu1 %6583, %v1378_v26  }
 0x86f   :  { %v1302_v29 = vpop.xlane.xlu0 %1301 }
 0x870   :  { %v1379_v9 = vadd.f32 %v7652_v0, %v1302_v29 }
 0x872   :  { %1406 = vperm.xlu0 %6584, %v1379_v9  }
 0x873   :  { %v1305_v31 = vpop.xlane.xlu0 %1304 }
 0x874   :  { %v7665_v20 = vadd.f32 %v7662_v30, %v1305_v31 }
 0x876   :  { %1409 = vperm.xlu1 %6583, %v7665_v20  }
 0x877   :  { %v7668_v35 = vpop.permute.xlu0 %1364 }
 0x878   :  { %v7671_v36 = vadd.f32 %v7668_v35, %v1308_v28 }
 0x87a   :  { %1412 = vperm.xlu0 %6584, %v7671_v36  }
 0x8e1   :  { %v1392_v37 = vpop.permute.xlu1 %1391  ;;  %v1395_v38 = vpop.permute.xlu0 %1394 }
 0x8e2   :  { %v1421_v44 = vrot.slane %v1395_v38, %v7528_v39  ;;  %v1417_v45 = vrot.slane %v1392_v37, %v7528_v39 }
 0x8e4   :  { %v1446_v53 = vsel %vm734_vm12, %v1421_v44, %v1417_v45 }
 0x8e5   :  { %v1398_v41 = vpop.permute.xlu1 %1397 }
 0x8e6   :  { %v1425_v46 = vrot.slane %v1398_v41, %v7528_v39 }
 0x8e8   :  { %v1447_v59 = vsel %vm736_vm13, %v1425_v46, %v1446_v53 }
 0x8e9   :  { %v1401_v42 = vpop.permute.xlu0 %1400 }
 0x8ea   :  { %v1429_v18 = vrot.slane %v1401_v42, %v7528_v39 }
 0x8ec   :  { %v1448_v3 = vsel %vm738_vm14, %v1429_v18, %v1447_v59 }
 0x8ed   :  { %v1404_v43 = vpop.permute.xlu1 %1403 }
 0x8ee   :  { %v1433_v50 = vrot.slane %v1404_v43, %v7528_v39 }
 0x8f0   :  { %v1450_v48 = vsel %vm1449_vm7, %v1433_v50, %v1448_v3 }
 0x8f1   :  { %v1407_v47 = vpop.permute.xlu0 %1406 }
 0x8f2   :  { %v1437_v56 = vrot.slane %v1407_v47, %v7528_v39 }
 0x8f4   :  { %v1452_v28 = vsel %vm1451_vm8, %v1437_v56, %v1450_v48 }
 0x8f5   :  { %v1410_v51 = vpop.permute.xlu1 %1409 }
 0x8f6   :  { %v1441_v2 = vrot.slane %v1410_v51, %v7528_v39 }
 0x8f8   :  { %v1454_v29 = vsel %vm8404_vm10, %v1441_v2, %v1452_v28 }
 0x8f9   :  { %v1413_v10 = vpop.permute.xlu0 %1412 }
 0x8fa   :  { %v1445_v24 = vrot.slane %v1413_v10, %v7528_v39 }
 0x8fc   :  { %v1456_v31 = vsel %vm8403_vm11, %v1445_v24, %v1454_v29 }
 0x8fd   :  { %v1458_v37 = vsel %vm435_vm5, %v1456_v31, -inf }
 0x8fe   :  { %1459 = vmax.xlane.f32.xlu1 %v1458_v37 }
 0x98b   :  { %v1460_v38 = vpop.xlane.xlu1 %1459 }
 0x98c   :  { %v1465_v41 = vrot.slane %v1460_v38, %v7451_v21  ;;  %v1469_v42 = vrot.slane %v1460_v38, %v7454_v22  ;;  %v1473_v43 = vrot.slane %v1460_v38, %v7461_v25  ;;  %v1477_v47 = vrot.slane %v1460_v38, %v7510_v12 }
 0x98d   :  { %v1481_v51 = vrot.slane %v1460_v38, %v7564_v52  ;;  %v1485_v59 = vrot.slane %v1460_v38, %v7569_v54 }
 0x98e   :  { %v1502_v44 = vsub.f32 %v1374_v19, %v1465_v41  ;;  %v1503_v45 = vsub.f32 %v1375_v5, %v1469_v42  ;;  %v1504_v50 = vsub.f32 %v1376_v8, %v1473_v43  ;;  %v1505_v56 = vsub.f32 %v1377_v13, %v1477_v47 }
 0x98f   :  { %v1506_v3 = vsub.f32 %v1378_v26, %v1481_v51  ;;  %v1489_v19 = vrot.slane %v1460_v38, %v7632_v49  ;;  %v1507_v10 = vsub.f32 %v1379_v9, %v1485_v59  ;;  %v1493_v13 = vrot.slane %v1460_v38, %v7640_v57 }
 0x990   :  { %v1510_v46 = vmul.f32 1.442695, %v1502_v44  ;;  %v1512_v18 = vmul.f32 1.442695, %v1503_v45  ;;  %v1514_v53 = vmul.f32 1.442695, %v1504_v50 }
 0x991   :  { %v1516_v2 = vmul.f32 1.442695, %v1505_v56  ;;  %v1518_v5 = vmul.f32 1.442695, %v1506_v3  ;;  %v1520_v24 = vmul.f32 1.442695, %v1507_v10  ;;  %v1508_v28 = vsub.f32 %v7665_v20, %v1489_v19 }
 0x992   :  { %6601 = vpow2.f32 %v1510_v46  ;;  %v1509_v31 = vsub.f32 %v7671_v36, %v1493_v13 }
 0x993   :  { %6603 = vpow2.f32 %v1512_v18  ;;  %v1522_v29 = vmul.f32 1.442695, %v1508_v28 }
 0x994   :  { %6605 = vpow2.f32 %v1514_v53  ;;  %v1524_v9 = vmul.f32 1.442695, %v1509_v31 }
 0x995   :  { %6607 = vpow2.f32 %v1516_v2 }
 0x996   :  { %6609 = vpow2.f32 %v1518_v5 }
 0x997   :  { %6611 = vpow2.f32 %v1520_v24 }
 0x998   :  { %6613 = vpow2.f32 %v1522_v29 }
 0x999   :  { %6615 = vpow2.f32 %v1524_v9 }
 0x99c   :  { %v7696_v48 = vpop.eup %6601 }
 0x99d   :  { %1535 = vperm.xlu0 %6584, %v7696_v48   ;;  %v7700_v8 = vpop.eup %6603 }
 0x99e   :  { %v7705_v26 = vpop.eup %6605 }
 0x99f   :  { %v7709_v37 = vpop.eup %6607 }
 0x9a0   :  { %v7712_v41 = vpop.eup %6609 }
 0x9a1   :  { %1538 = vperm.xlu0 %6584, %v7700_v8   ;;  %v6612_v20 = vpop.eup %6611 }
 0x9a2   :  { %v7715_v38 = vpop.eup %6613 }
 0x9a3   :  { %v7718_v42 = vpop.eup %6615 }
 0x9a5   :  { %1541 = vperm.xlu0 %6584, %v7705_v26  }
 0x9a9   :  { %1544 = vperm.xlu0 %6584, %v7709_v37  }
 0x9ad   :  { %1547 = vperm.xlu0 %6584, %v7712_v41  }
 0x9b1   :  { %1550 = vperm.xlu0 %6584, %v6612_v20  }
 0x9b5   :  { %1553 = vperm.xlu0 %6584, %v7715_v38  }
 0x9b9   :  { %1556 = vperm.xlu0 %6584, %v7718_v42  }
 0xa1c   :  { %v1536_v36 = vpop.permute.xlu0 %1535 }
 0xa1d   :  { %v1561_v51 = vrot.slane %v1536_v36, %v7528_v39 }
 0xa20   :  { %v1539_v43 = vpop.permute.xlu0 %1538 }
 0xa21   :  { %v1565_v18 = vrot.slane %v1539_v43, %v7528_v39 }
 0xa23   :  { %v1590_v2 = vsel %vm734_vm12, %v1565_v18, %v1561_v51 }
 0xa24   :  { %v1542_v44 = vpop.permute.xlu0 %1541 }
 0xa25   :  { %v1569_v50 = vrot.slane %v1542_v44, %v7528_v39 }
 0xa27   :  { %v1591_v19 = vsel %vm736_vm13, %v1569_v50, %v1590_v2 }
 0xa28   :  { %v1545_v45 = vpop.permute.xlu0 %1544 }
 0xa29   :  { %v1573_v53 = vrot.slane %v1545_v45, %v7528_v39 }
 0xa2b   :  { %v1592_v10 = vsel %vm738_vm14, %v1573_v53, %v1591_v19 }
 0xa2c   :  { %v1548_v46 = vpop.permute.xlu0 %1547 }
 0xa2d   :  { %v1577_v56 = vrot.slane %v1548_v46, %v7528_v39 }
 0xa2f   :  { %v1593_v13 = vsel %vm1449_vm7, %v1577_v56, %v1592_v10 }
 0xa30   :  { %v1551_v47 = vpop.permute.xlu0 %1550 }
 0xa31   :  { %v1581_v3 = vrot.slane %v1551_v47, %v7528_v39 }
 0xa33   :  { %v1594_v29 = vsel %vm1451_vm8, %v1581_v3, %v1593_v13 }
 0xa34   :  { %v1554_v59 = vpop.permute.xlu0 %1553 }
 0xa35   :  { %v1585_v5 = vrot.slane %v1554_v59, %v7528_v39 }
 0xa37   :  { %v1595_v31 = vsel %vm8404_vm10, %v1585_v5, %v1594_v29 }
 0xa38   :  { %v1557_v24 = vpop.permute.xlu0 %1556 }
 0xa39   :  { %v1589_v28 = vrot.slane %v1557_v24, %v7528_v39 }
 0xa3b   :  { %v1596_v9 = vsel %vm8403_vm11, %v1589_v28, %v1595_v31 }
 0xa3c   :  { %v1598_v36 = vsel %vm435_vm5, %v1596_v9, 0.0 }
 0xa3d   :  { %1599 = vadd.xlane.f32.xlu0 %v1598_v36 }
 0xaca   :  { %v1600_v43 = vpop.xlane.xlu0 %1599 }
 0xacb   :  { %v1625_v44 = vrot.slane %v1600_v43, %v7569_v54  ;;  %v1605_v45 = vrot.slane %v1600_v43, %v7451_v21  ;;  %v1609_v46 = vrot.slane %v1600_v43, %v7454_v22  ;;  %v1613_v47 = vrot.slane %v1600_v43, %v7461_v25 }
 0xacc   :  { %v1617_v18 = vrot.slane %v1600_v43, %v7510_v12  ;;  %v1621_v56 = vrot.slane %v1600_v43, %v7564_v52  ;;  %v1629_v3 = vrot.slane %v1600_v43, %v7632_v49  ;;  %v1633_v10 = vrot.slane %v1600_v43, %v7640_v57 }
 0xacd   :  { %6617 = vrcp.f32 %v1625_v44 }
 0xace   :  { %6619 = vrcp.f32 %v1605_v45 }
 0xacf   :  { %6621 = vrcp.f32 %v1609_v46 }
 0xad0   :  { %6623 = vrcp.f32 %v1613_v47 }
 0xad1   :  { %6625 = vrcp.f32 %v1617_v18 }
 0xad2   :  { %6627 = vrcp.f32 %v1621_v56 }
 0xad3   :  { %6629 = vrcp.f32 %v1629_v3 }
 0xad4   :  { %6631 = vrcp.f32 %v1633_v10 }
 0xad7   :  { %v6618_v50 = vpop.eup %6617 }
 0xad8   :  { %v6620_v51 = vpop.eup %6619  ;;  %v1653_v53 = vmul.f32 %v6618_v50, %v6612_v20 }
 0xad9   :  { %v1643_v59 = vmul.f32 %v6620_v51, %v7696_v48  ;;  %v6622_v2 = vpop.eup %6621 }
 0xada   :  { %1682 = vperm.xlu0 %6584, %v1653_v53   ;;  %v1645_v19 = vmul.f32 %v6622_v2, %v7700_v8  ;;  %v6624_v5 = vpop.eup %6623 }
 0xadb   :  { %1667 = vperm.xlu1 %6583, %v1643_v59   ;;  %v1647_v20 = vmul.f32 %v6624_v5, %v7705_v26  ;;  %v6626_v13 = vpop.eup %6625  ;;  %v7753_v26 = vmax.f32 %v7440_v14, 0.0 }
 0xadc   :  { %v1649_v48 = vmul.f32 %v6626_v13, %v7709_v37  ;;  %v6628_v24 = vpop.eup %6627  ;;  %v6793_v13 = vld [vmem:[%s8419_s22] sm:$0xff] }
 0xadd   :  { %v1651_v28 = vmul.f32 %v6628_v24, %v7712_v41  ;;  %v6630_v29 = vpop.eup %6629 }
 0xade   :  { %v1655_v8 = vmul.f32 %v6630_v29, %v7715_v38  ;;  %v6632_v31 = vpop.eup %6631 }
 0xadf   :  { %1670 = vperm.xlu1 %6583, %v1645_v19   ;;  %v1657_v9 = vmul.f32 %v6632_v31, %v7718_v42 }
 0xae3   :  { %1673 = vperm.xlu1 %6583, %v1647_v20  }
 0xae7   :  { %1676 = vperm.xlu1 %6583, %v1649_v48  }
 0xaeb   :  { %1679 = vperm.xlu1 %6583, %v1651_v28  }
 0xaef   :  { %1685 = vperm.xlu1 %6583, %v1655_v8  }
 0xaf3   :  { %1688 = vperm.xlu1 %6583, %v1657_v9  }
 0xb1c   :  { %1817 = vxpose.xlu1.b32.start.end [1/1] (short) (narrow) %v7753_v26, 8 }
 0xb59   :  { %v1683_v18 = vpop.permute.xlu0 %1682 }
 0xb5a   :  { %v1668_v36 = vpop.permute.xlu1 %1667  ;;  %v1713_v2 = vrot.slane %v1683_v18, %v7528_v39 }
 0xb5b   :  { %v1693_v38 = vrot.slane %v1668_v36, %v7528_v39 }
 0xb5e   :  { %v1671_v37 = vpop.permute.xlu1 %1670 }
 0xb5f   :  { %v1697_v41 = vrot.slane %v1671_v37, %v7528_v39 }
 0xb61   :  { %v1722_v14 = vsel %vm734_vm12, %v1697_v41, %v1693_v38 }
 0xb62   :  { %v1674_v43 = vpop.permute.xlu1 %1673 }
 0xb63   :  { %v1701_v45 = vrot.slane %v1674_v43, %v7528_v39 }
 0xb65   :  { %v1723_v50 = vsel %vm736_vm13, %v1701_v45, %v1722_v14 }
 0xb66   :  { %v1677_v44 = vpop.permute.xlu1 %1676 }
 0xb67   :  { %v1705_v47 = vrot.slane %v1677_v44, %v7528_v39 }
 0xb69   :  { %v1724_v53 = vsel %vm738_vm14, %v1705_v47, %v1723_v50 }
 0xb6a   :  { %v1680_v46 = vpop.permute.xlu1 %1679 }
 0xb6b   :  { %v1709_v42 = vrot.slane %v1680_v46, %v7528_v39 }
 0xb6d   :  { %v1725_v56 = vsel %vm1449_vm7, %v1709_v42, %v1724_v53 }
 0xb6e   :  { %v1686_v51 = vpop.permute.xlu1 %1685  ;;  %v1726_v19 = vsel %vm1451_vm8, %v1713_v2, %v1725_v56 }
 0xb6f   :  { %v1717_v59 = vrot.slane %v1686_v51, %v7528_v39 }
 0xb71   :  { %v1727_v10 = vsel %vm8404_vm10, %v1717_v59, %v1726_v19 }
 0xb72   :  { %v1689_v3 = vpop.permute.xlu1 %1688 }
 0xb73   :  { %v1721_v5 = vrot.slane %v1689_v3, %v7528_v39 }
 0xb75   :  { %v1728_v20 = vsel %vm8403_vm11, %v1721_v5, %v1727_v10 }
 0xb76   :  { %6070 = vmatmul.mubr.msk.f32.vlgmr.msra.gmra.mrb[6].mxu0 %vm435_vm5, %v1728_v20 }
 0xb77   :  { %6078 = vmatpush3.msra.mxu0 %v6793_v13  ;;  %6079 = vmatprep.mubr.msk.f32.mxu0 %vm7189_vm4, %v7188_v11 }
 0xb78   :  { %6087 = vmatprep.subr.mxu0 %v7188_v11 }
 0xb9c   :  { %v1833_v48 = vpop.trf.xlu1 }
 0xb9d   :  { %6075 = vmatmul.mubr.msk.f32.vlgmr.msra.gmra.mrb[6].mxu1 %vm435_vm5, %v1833_v48  ;;  %6080 = vmatmul.mubr.msk.f32.vlgmr.msra.gmra.mrb[8].mxu0 %vm435_vm5, %v1833_v48 }
 0xb9e   :  { %6083 = vmatpush3.msk.msra.mxu1 %vm306_vm0, %v1833_v48  ;;  %6088 = vmatpush3.msk.msra.mxu0 %vm306_vm0, %v7465_v27 }
 0xb9f   :  { %6089 = vmatprep.mubr.msk.f32.mxu0 %vm7189_vm4, %v7188_v11  ;;  %6097 = vmatprep.subr.mxu0 %v7188_v11 }
 0xba0   :  { %6084 = vmatprep.mubr.msk.f32.mxu1 %vm7189_vm4, %v7188_v11  ;;  %6092 = vmatprep.subr.mxu1 %v7188_v11 }
 0xba1   :  { %6090 = vmatmul.mubr.msk.f32.vlgmr.msra.gmra.mrb[10].mxu0 %vm881_vm6, %v7753_v26 }
 0xba2   :  { %6098 = vmatpush3.msra.mxu0 %v7753_v26  ;;  %6099 = vmatprep.mubr.msk.f32.mxu0 %vm7189_vm4, %v7188_v11 }
 0xc49   :  { %v7792_v24 = vpop.f32.mrb[6].mxu0 }
 0xc4a   :  { %v6071_v27 = vpop.f32.mrb[7].mxu0 }
 0xc70   :  { %v1918_v28 = vpop.f32.mrb[6].mxu1  ;;  %v1988_v29 = vpop.f32.mrb[8].mxu0 }
 0xc71   :  { %v1919_v8 = vadd.f32 %v7484_v32, %v1918_v28  ;;  %v6076_v31 = vpop.f32.mrb[7].mxu1  ;;  %v6081_v9 = vpop.f32.mrb[9].mxu0 }
 0xc73   :  { %v1999_v36 = vrot.slane %v1919_v8, %v7487_v33 }
 0xc74   :  { %v7796_v37 = vpop.f32.mrb[10].mxu0 }
 0xc75   :  { %v2000_v43 = vcombine.high %v1999_v36, %v1999_v36  ;;  %v2007_v44 = vrot.slane %v1999_v36, %v7487_v33  ;;  %v6091_v41 = vpop.f32.mrb[11].mxu0 }
 0xc77   :  { %v2014_v45 = vrot.slane %v2000_v43, %v7487_v33  ;;  %v2015_v46 = vcombine.high %v2007_v44, %v2007_v44  ;;  %v2020_v38 = vrot.slane %v2007_v44, %v7451_v21 }
 0xc79   :  { %v2016_v47 = vcombine.high %v2014_v45, %v2014_v45  ;;  %v2024_v42 = vrot.slane %v2014_v45, %v7451_v21  ;;  %v2028_v32 = vrot.slane %v2015_v46, %v7451_v21  ;;  %v2037_v14 = vadd.f32 %v2020_v38, %v1988_v29 }
 0xc7b   :  { %v2032_v18 = vrot.slane %v2016_v47, %v7451_v21  ;;  %v2038_v50 = vadd.f32 %v2024_v42, %v1988_v29  ;;  %v2039_v51 = vadd.f32 %v2028_v32, %v1988_v29  ;;  %vm2041_vm1 = vcmp.ge.f32.partialorder %v2037_v14, 0.0 }
 0xc7c   :  { %v2045_v56 = vmul.f32 0.2, %v2037_v14 }
 0xc7d   :  { %v2040_v53 = vadd.f32 %v2032_v18, %v1988_v29  ;;  %vm2042_vm2 = vcmp.ge.f32.partialorder %v2038_v50, 0.0  ;;  %v2046_v2 = vmul.f32 0.2, %v2038_v50  ;;  %vm2043_vm11 = vcmp.ge.f32.partialorder %v2039_v51, 0.0 }
 0xc7e   :  { %v2049_v59 = vsel %vm2041_vm1, %v2037_v14, %v2045_v56  ;;  %v2047_v19 = vmul.f32 0.2, %v2039_v51 }
 0xc7f   :  { %v2053_v3 = vmul.f32 %v7499_v55, %v2049_v59  ;;  %v2050_v5 = vsel %vm2042_vm2, %v2038_v50, %v2046_v2  ;;  %vm2044_vm10 = vcmp.ge.f32.partialorder %v2040_v53, 0.0  ;;  %v2048_v10 = vmul.f32 0.2, %v2040_v53 }
 0xc80   :  { %v2054_v13 = vmul.f32 %v7499_v55, %v2050_v5  ;;  %v2051_v48 = vsel %vm2043_vm11, %v2039_v51, %v2047_v19 }
 0xc81   :  { %v2057_v20 = vsel %vm650_vm9, %v2053_v3, 0.0  ;;  %v2055_v27 = vmul.f32 %v7499_v55, %v2051_v48  ;;  %v2052_v28 = vsel %vm2044_vm10, %v2040_v53, %v2048_v10 }
 0xc82   :  { %2058 = vadd.xlane.f32.xlu0 %v2057_v20  ;;  %v2060_v29 = vsel %vm650_vm9, %v2054_v13, 0.0  ;;  %v2056_v31 = vmul.f32 %v7499_v55, %v2052_v28 }
 0xc83   :  { %2061 = vadd.xlane.f32.xlu1 %v2060_v29  ;;  %v2063_v8 = vsel %vm650_vm9, %v2055_v27, 0.0 }
 0xc84   :  { %v2066_v9 = vsel %vm650_vm9, %v2056_v31, 0.0 }
 0xc86   :  { %2064 = vadd.xlane.f32.xlu0 %v2063_v8 }
 0xc8a   :  { %2067 = vadd.xlane.f32.xlu0 %v2066_v9 }
 0xd0f   :  { %v2059_v36 = vpop.xlane.xlu0 %2058 }
 0xd10   :  { %v2069_v43 = vadd.f32 %v2059_v36, %v7514_v15  ;;  %v2062_v44 = vpop.xlane.xlu1 %2061 }
 0xd11   :  { %v2070_v45 = vadd.f32 %v2062_v44, %v7516_v16 }
 0xd12   :  { %2078 = vperm.xlu0 %6584, %v2069_v43  }
 0xd13   :  { %v2065_v41 = vpop.xlane.xlu0 %2064 }
 0xd14   :  { %v2071_v46 = vadd.f32 %v2065_v41, %v7518_v23 }
 0xd16   :  { %2081 = vperm.xlu0 %6584, %v2070_v45  }
 0xd17   :  { %v2068_v38 = vpop.xlane.xlu0 %2067 }
 0xd18   :  { %v2072_v47 = vadd.f32 %v2068_v38, %v7523_v34 }
 0xd1a   :  { %2084 = vperm.xlu0 %6584, %v2071_v46  }
 0xd1e   :  { %2087 = vperm.xlu0 %6584, %v2072_v47  }
 0xd91   :  { %v2079_v55 = vpop.permute.xlu0 %2078 }
 0xd92   :  { %v2092_v18 = vrot.slane %v2079_v55, %v7528_v39 }
 0xd95   :  { %v2082_v42 = vpop.permute.xlu0 %2081 }
 0xd96   :  { %v2096_v14 = vrot.slane %v2082_v42, %v7528_v39 }
 0xd98   :  { %v2105_v51 = vsel %vm734_vm12, %v2096_v14, %v2092_v18 }
 0xd99   :  { %v2085_v32 = vpop.permute.xlu0 %2084 }
 0xd9a   :  { %v2100_v15 = vrot.slane %v2085_v32, %v7528_v39 }
 0xd9c   :  { %v2106_v23 = vsel %vm736_vm13, %v2100_v15, %v2105_v51 }
 0xd9d   :  { %v2088_v50 = vpop.permute.xlu0 %2087 }
 0xd9e   :  { %v2104_v16 = vrot.slane %v2088_v50, %v7528_v39 }
 0xda0   :  { %v2107_v53 = vsel %vm738_vm14, %v2104_v16, %v2106_v23 }
 0xda1   :  { %v2109_v34 = vsel %vm741_vm15, %v2107_v53, -inf }
 0xda2   :  { %2110 = vmax.xlane.f32.xlu1 %v2109_v34 }
 0xe2f   :  { %v2111_v56 = vpop.xlane.xlu1 %2110 }
 0xe30   :  { %v2116_v59 = vrot.slane %v2111_v56, %v7451_v21  ;;  %v2120_v2 = vrot.slane %v2111_v56, %v7454_v22  ;;  %v2124_v3 = vrot.slane %v2111_v56, %v7461_v25  ;;  %v2128_v19 = vrot.slane %v2111_v56, %v7510_v12 }
 0xe32   :  { %v2133_v5 = vsub.f32 %v2069_v43, %v2116_v59  ;;  %v2134_v10 = vsub.f32 %v2070_v45, %v2120_v2  ;;  %v2135_v20 = vsub.f32 %v2071_v46, %v2124_v3  ;;  %v2136_v27 = vsub.f32 %v2072_v47, %v2128_v19 }
 0xe34   :  { %v2137_v13 = vmul.f32 1.442695, %v2133_v5  ;;  %v2139_v48 = vmul.f32 1.442695, %v2134_v10  ;;  %v2141_v28 = vmul.f32 1.442695, %v2135_v20 }
 0xe35   :  { %v2143_v29 = vmul.f32 1.442695, %v2136_v27 }
 0xe36   :  { %6633 = vpow2.f32 %v2137_v13 }
 0xe37   :  { %6635 = vpow2.f32 %v2139_v48 }
 0xe38   :  { %6637 = vpow2.f32 %v2141_v28 }
 0xe39   :  { %6639 = vpow2.f32 %v2143_v29 }
 0xe40   :  { %v6634_v8 = vpop.eup %6633 }
 0xe41   :  { %v6636_v31 = vpop.eup %6635  ;;  %2150 = vperm.xlu0 %6584, %v6634_v8  }
 0xe42   :  { %2153 = vperm.xlu1 %6583, %v6636_v31   ;;  %v6638_v9 = vpop.eup %6637 }
 0xe43   :  { %v6640_v36 = vpop.eup %6639 }
 0xe45   :  { %2156 = vperm.xlu0 %6584, %v6638_v9  }
 0xe49   :  { %2159 = vperm.xlu0 %6584, %v6640_v36  }
 0xec0   :  { %v2151_v43 = vpop.permute.xlu0 %2150 }
 0xec1   :  { %v2154_v44 = vpop.permute.xlu1 %2153  ;;  %v2164_v46 = vrot.slane %v2151_v43, %v7528_v39 }
 0xec2   :  { %v2168_v45 = vrot.slane %v2154_v44, %v7528_v39 }
 0xec4   :  { %v2157_v41 = vpop.permute.xlu0 %2156  ;;  %v2177_v42 = vsel %vm734_vm12, %v2168_v45, %v2164_v46 }
 0xec5   :  { %v2172_v38 = vrot.slane %v2157_v41, %v7528_v39 }
 0xec7   :  { %v2178_v32 = vsel %vm736_vm13, %v2172_v38, %v2177_v42 }
 0xec8   :  { %v2160_v47 = vpop.permute.xlu0 %2159 }
 0xec9   :  { %v2176_v55 = vrot.slane %v2160_v47, %v7528_v39 }
 0xecb   :  { %v2179_v14 = vsel %vm738_vm14, %v2176_v55, %v2178_v32 }
 0xecc   :  { %v2181_v15 = vsel %vm741_vm15, %v2179_v14, 0.0 }
 0xecd   :  { %2182 = vadd.xlane.f32.xlu0 %v2181_v15 }
 0xf5a   :  { %v2183_v18 = vpop.xlane.xlu0 %2182 }
 0xf5b   :  { %v2188_v50 = vrot.slane %v2183_v18, %v7451_v21  ;;  %v2192_v16 = vrot.slane %v2183_v18, %v7454_v22  ;;  %v2196_v51 = vrot.slane %v2183_v18, %v7461_v25  ;;  %v2200_v23 = vrot.slane %v2183_v18, %v7510_v12 }
 0xf5d   :  { %6641 = vrcp.f32 %v2188_v50 }
 0xf5e   :  { %6643 = vrcp.f32 %v2192_v16 }
 0xf5f   :  { %6645 = vrcp.f32 %v2196_v51 }
 0xf60   :  { %6647 = vrcp.f32 %v2200_v23 }
 0xf67   :  { %v6642_v53 = vpop.eup %6641 }
 0xf68   :  { %v2206_v34 = vmul.f32 %v6642_v53, %v6634_v8  ;;  %v6644_v56 = vpop.eup %6643 }
 0xf69   :  { %v2208_v59 = vmul.f32 %v6644_v56, %v6636_v31  ;;  %v6646_v2 = vpop.eup %6645 }
 0xf6a   :  { %2218 = vperm.xlu1 %6583, %v2206_v34   ;;  %v2210_v3 = vmul.f32 %v6646_v2, %v6638_v9  ;;  %v6648_v19 = vpop.eup %6647 }
 0xf6b   :  { %v2212_v5 = vmul.f32 %v6648_v19, %v6640_v36  ;;  %v2430_v36 = vadd.f32 %v7596_v6, %v7796_v37 }
 0xf6d   :  { %v2504_v44 = vcombine.high %v2430_v36, %v2430_v36  ;;  %v2511_v41 = vrot.slane %v2430_v36, %v7487_v33 }
 0xf6e   :  { %2221 = vperm.xlu1 %6583, %v2208_v59  }
 0xf6f   :  { %v2518_v45 = vrot.slane %v2504_v44, %v7487_v33  ;;  %v2519_v46 = vcombine.high %v2511_v41, %v2511_v41  ;;  %v2527_v47 = vrot.slane %v2511_v41, %v7487_v33 }
 0xf71   :  { %v2520_v38 = vcombine.high %v2518_v45, %v2518_v45  ;;  %v2534_v55 = vrot.slane %v2518_v45, %v7487_v33  ;;  %v2549_v32 = vcombine.high %v2527_v47, %v2527_v47  ;;  %v2556_v50 = vrot.slane %v2527_v47, %v7451_v21 }
 0xf72   :  { %2224 = vperm.xlu1 %6583, %v2210_v3  }
 0xf73   :  { %v2548_v42 = vrot.slane %v2520_v38, %v7487_v33  ;;  %v2550_v15 = vcombine.high %v2534_v55, %v2534_v55  ;;  %v2564_v51 = vrot.slane %v2549_v32, %v7451_v21  ;;  %v2572_v53 = vrot.slane %v2534_v55, %v7451_v21 }
 0xf75   :  { %v2552_v18 = vcombine.high %v2548_v42, %v2548_v42  ;;  %v2580_v56 = vrot.slane %v2550_v15, %v7451_v21 }
 0xf76   :  { %2227 = vperm.xlu1 %6583, %v2212_v5  }
 0xf77   :  { %v2584_v59 = vrot.slane %v2552_v18, %v7451_v21 }
 0xfe9   :  { %v2219_v10 = vpop.permute.xlu1 %2218 }
 0xfea   :  { %v2232_v28 = vrot.slane %v2219_v10, %v7528_v39 }
 0xfed   :  { %v2222_v20 = vpop.permute.xlu1 %2221 }
 0xfee   :  { %v2236_v48 = vrot.slane %v2222_v20, %v7528_v39 }
 0xff0   :  { %v2245_v8 = vsel %vm734_vm12, %v2236_v48, %v2232_v28 }
 0xff1   :  { %v2225_v13 = vpop.permute.xlu1 %2224 }
 0xff2   :  { %v2240_v27 = vrot.slane %v2225_v13, %v7528_v39 }
 0xff4   :  { %v2246_v9 = vsel %vm736_vm13, %v2240_v27, %v2245_v8 }
 0xff5   :  { %v2228_v29 = vpop.permute.xlu1 %2227 }
 0xff6   :  { %v2244_v31 = vrot.slane %v2228_v29, %v7528_v39 }
 0xff8   :  { %v2247_v43 = vsel %vm738_vm14, %v2244_v31, %v2246_v9 }
 0xff9   :  { %6085 = vmatmul.mubr.msk.f32.vlgmr.msra.gmra.mrb[8].mxu1 %vm881_vm6, %v2247_v43 }
 0xffa   :  { %6093 = vmatpush3.msk.msra.mxu1 %vm306_vm0, %v7581_v4  ;;  %6094 = vmatprep.mubr.msk.f32.mxu1 %vm7189_vm4, %v7188_v11  ;;  %v2541_v4 = vrot.slane %v2519_v46, %v7487_v33  ;;  %v2576_v33 = vrot.slane %v2548_v42, %v7451_v21 }
 0xffc   :  { %v2551_v14 = vcombine.high %v2541_v4, %v2541_v4  ;;  %v2560_v16 = vrot.slane %v2541_v4, %v7451_v21 }
 0xffd   :  { %6095 = vmatmul.mubr.msk.f32.vlgmr.msra.gmra.mrb[10].mxu1 %vm881_vm6, %v7753_v26 }
 0xffe   :  { %v2568_v23 = vrot.slane %v2551_v14, %v7451_v21 }
0x10cc   :  { %v7862_v6 = vpop.f32.mrb[8].mxu1 }
0x10cd   :  { %v6086_v37 = vpop.f32.mrb[9].mxu1 }
0x10d0   :  { %v2499_v34 = vpop.f32.mrb[10].mxu1 }
0x10d1   :  { %v6096_v2 = vpop.f32.mrb[11].mxu1  ;;  %v2593_v3 = vadd.f32 %v2556_v50, %v2499_v34  ;;  %v2594_v19 = vadd.f32 %v2560_v16, %v2499_v34  ;;  %v2595_v5 = vadd.f32 %v2564_v51, %v2499_v34  ;;  %v2596_v10 = vadd.f32 %v2568_v23, %v2499_v34 }
0x10d2   :  { %v2597_v20 = vadd.f32 %v2572_v53, %v2499_v34  ;;  %v2598_v13 = vadd.f32 %v2576_v33, %v2499_v34  ;;  %v2599_v48 = vadd.f32 %v2580_v56, %v2499_v34  ;;  %v2600_v27 = vadd.f32 %v2584_v59, %v2499_v34 }
0x10d3   :  { %vm2601_vm9 = vcmp.ge.f32.partialorder %v2593_v3, 0.0  ;;  %v2609_v28 = vmul.f32 0.2, %v2593_v3  ;;  %vm2602_vm15 = vcmp.ge.f32.partialorder %v2594_v19, 0.0  ;;  %v2610_v29 = vmul.f32 0.2, %v2594_v19 }
0x10d4   :  { %vm2603_vm10 = vcmp.ge.f32.partialorder %v2595_v5, 0.0  ;;  %v2611_v8 = vmul.f32 0.2, %v2595_v5  ;;  %v2612_v43 = vmul.f32 0.2, %v2596_v10  ;;  %vm2604_vm11 = vcmp.ge.f32.partialorder %v2596_v10, 0.0 }
0x10d5   :  { %v2617_v31 = vsel %vm2601_vm9, %v2593_v3, %v2609_v28  ;;  %v2618_v9 = vsel %vm2602_vm15, %v2594_v19, %v2610_v29  ;;  %v2613_v4 = vmul.f32 0.2, %v2597_v20  ;;  %vm2605_vm1 = vcmp.ge.f32.partialorder %v2597_v20, 0.0 }
0x10d6   :  { %v2625_v36 = vmul.f32 %v7616_v58, %v2617_v31  ;;  %v2626_v44 = vmul.f32 %v7616_v58, %v2618_v9  ;;  %v2619_v41 = vsel %vm2603_vm10, %v2595_v5, %v2611_v8  ;;  %v2620_v47 = vsel %vm2604_vm11, %v2596_v10, %v2612_v43 }
0x10d7   :  { %v2627_v38 = vmul.f32 %v7616_v58, %v2619_v41  ;;  %v2628_v42 = vmul.f32 %v7616_v58, %v2620_v47  ;;  %v2621_v32 = vsel %vm2605_vm1, %v2597_v20, %v2613_v4  ;;  %v2614_v14 = vmul.f32 0.2, %v2598_v13 }
0x10d8   :  { %v2633_v45 = vsel %vm435_vm5, %v2625_v36, 0.0  ;;  %v2636_v46 = vsel %vm435_vm5, %v2626_v44, 0.0  ;;  %vm2606_vm2 = vcmp.ge.f32.partialorder %v2598_v13, 0.0  ;;  %v2629_v18 = vmul.f32 %v7616_v58, %v2621_v32 }
0x10d9   :  { %2634 = vadd.xlane.f32.xlu1 %v2633_v45  ;;  %2637 = vadd.xlane.f32.xlu0 %v2636_v46  ;;  %v2639_v55 = vsel %vm435_vm5, %v2627_v38, 0.0  ;;  %v2642_v15 = vsel %vm435_vm5, %v2628_v42, 0.0  ;;  %v2622_v37 = vsel %vm2606_vm2, %v2598_v13, %v2614_v14  ;;  %v2615_v50 = vmul.f32 0.2, %v2599_v48 }
0x10da   :  { %vm2607_vm9 = vcmp.ge.f32.partialorder %v2599_v48, 0.0  ;;  %v2645_v16 = vsel %vm435_vm5, %v2629_v18, 0.0  ;;  %v2630_v51 = vmul.f32 %v7616_v58, %v2622_v37  ;;  %v2616_v53 = vmul.f32 0.2, %v2600_v27 }
0x10db   :  { %v2623_v23 = vsel %vm2607_vm9, %v2599_v48, %v2615_v50  ;;  %vm2608_vm15 = vcmp.ge.f32.partialorder %v2600_v27, 0.0  ;;  %vm8424_vm10 = vcmask 1046534   ;;  %vm8425_vm11 = vcmask 1047559  }
0x10dc   :  { %v2648_v34 = vsel %vm435_vm5, %v2630_v51, 0.0  ;;  %v2631_v33 = vmul.f32 %v7616_v58, %v2623_v23  ;;  %v2624_v56 = vsel %vm2608_vm15, %v2600_v27, %v2616_v53  ;;  %vm8426_vm1 = vmmov %vm8424_vm10 }
0x10dd   :  { %2640 = vadd.xlane.f32.xlu0 %v2639_v55  ;;  %v2632_v2 = vmul.f32 %v7616_v58, %v2624_v56  ;;  %vm8427_vm2 = vmmov %vm8425_vm11 }
0x10de   :  { %v2651_v59 = vsel %vm435_vm5, %v2631_v33, 0.0  ;;  %vm8429_vm9 = vmmov %vm8426_vm1 }
0x10df   :  { %v2654_v3 = vsel %vm435_vm5, %v2632_v2, 0.0 }
0x10e1   :  { %2643 = vadd.xlane.f32.xlu0 %v2642_v15 }
0x10e5   :  { %2646 = vadd.xlane.f32.xlu0 %v2645_v16 }
0x10e9   :  { %2649 = vadd.xlane.f32.xlu0 %v2648_v34 }
0x10ed   :  { %2652 = vadd.xlane.f32.xlu0 %v2651_v59 }
0x10f1   :  { %2655 = vadd.xlane.f32.xlu0 %v2654_v3 }
0x1166   :  { %v2635_v19 = vpop.xlane.xlu1 %2634  ;;  %v2638_v5 = vpop.xlane.xlu0 %2637 }
0x1167   :  { %v2657_v10 = vadd.f32 %v2635_v19, %v7644_v60  ;;  %v2658_v20 = vadd.f32 %v2638_v5, %v7646_v61 }
0x1169   :  { %2674 = vperm.xlu1 %6583, %v2657_v10   ;;  %2677 = vperm.xlu0 %6584, %v2658_v20  }
0x116a   :  { %v2641_v13 = vpop.xlane.xlu0 %2640 }
0x116b   :  { %v2659_v48 = vadd.f32 %v2641_v13, %v7650_v63 }
0x116d   :  { %2680 = vperm.xlu1 %6583, %v2659_v48  }
0x116e   :  { %v2644_v27 = vpop.xlane.xlu0 %2643 }
0x116f   :  { %v2660_v28 = vadd.f32 %v2644_v27, %v7648_v62 }
0x1171   :  { %2683 = vperm.xlu1 %6583, %v2660_v28  }
0x1172   :  { %v2647_v58 = vpop.xlane.xlu0 %2646 }
0x1173   :  { %v2661_v29 = vadd.f32 %v2647_v58, %v7654_v1 }
0x1175   :  { %2686 = vperm.xlu0 %6584, %v2661_v29  }
0x1176   :  { %v2650_v8 = vpop.xlane.xlu0 %2649 }
0x1177   :  { %v2662_v31 = vadd.f32 %v2650_v8, %v7652_v0 }
0x1179   :  { %2689 = vperm.xlu1 %6583, %v2662_v31  }
0x117a   :  { %v2653_v60 = vpop.xlane.xlu0 %2652 }
0x117b   :  { %v2663_v61 = vadd.f32 %v2653_v60, %v7662_v30 }
0x117d   :  { %2692 = vperm.xlu0 %6584, %v2663_v61  }
0x117e   :  { %v2656_v9 = vpop.xlane.xlu0 %2655 }
0x117f   :  { %v2664_v63 = vadd.f32 %v2656_v9, %v7668_v35 }
0x1181   :  { %2695 = vperm.xlu1 %6583, %v2664_v63  }
0x11e8   :  { %v2675_v43 = vpop.permute.xlu1 %2674  ;;  %v2678_v62 = vpop.permute.xlu0 %2677 }
0x11e9   :  { %v2700_v1 = vrot.slane %v2675_v43, %v7528_v39  ;;  %v2704_v45 = vrot.slane %v2678_v62, %v7528_v39 }
0x11eb   :  { %v2729_v35 = vsel %vm734_vm12, %v2704_v45, %v2700_v1 }
0x11ec   :  { %v2681_v36 = vpop.permute.xlu1 %2680 }
0x11ed   :  { %v2708_v0 = vrot.slane %v2681_v36, %v7528_v39 }
0x11ef   :  { %v2730_v55 = vsel %vm736_vm13, %v2708_v0, %v2729_v35 }
0x11f0   :  { %v2684_v44 = vpop.permute.xlu1 %2683 }
0x11f1   :  { %v2712_v38 = vrot.slane %v2684_v44, %v7528_v39 }
0x11f3   :  { %v2731_v32 = vsel %vm738_vm14, %v2712_v38, %v2730_v55 }
0x11f4   :  { %v2687_v41 = vpop.permute.xlu0 %2686 }
0x11f5   :  { %v2716_v30 = vrot.slane %v2687_v41, %v7528_v39 }
0x11f7   :  { %v2732_v14 = vsel %vm1449_vm7, %v2716_v30, %v2731_v32 }
0x11f8   :  { %v2690_v46 = vpop.permute.xlu1 %2689 }
0x11f9   :  { %v2720_v4 = vrot.slane %v2690_v46, %v7528_v39 }
0x11fb   :  { %v2733_v18 = vsel %vm1451_vm8, %v2720_v4, %v2732_v14 }
0x11fc   :  { %v2693_v47 = vpop.permute.xlu0 %2692 }
0x11fd   :  { %v2724_v42 = vrot.slane %v2693_v47, %v7528_v39 }
0x11ff   :  { %v2734_v50 = vsel %vm8424_vm10, %v2724_v42, %v2733_v18 }
0x1200   :  { %v2696_v15 = vpop.permute.xlu1 %2695 }
0x1201   :  { %v2728_v37 = vrot.slane %v2696_v15, %v7528_v39 }
0x1203   :  { %v2735_v16 = vsel %vm8425_vm11, %v2728_v37, %v2734_v50 }
0x1204   :  { %v2737_v51 = vsel %vm435_vm5, %v2735_v16, -inf }
0x1205   :  { %2738 = vmax.xlane.f32.xlu0 %v2737_v51 }
0x1292   :  { %v2739_v23 = vpop.xlane.xlu0 %2738 }
0x1293   :  { %v2744_v53 = vrot.slane %v2739_v23, %v7451_v21  ;;  %v2748_v34 = vrot.slane %v2739_v23, %v7454_v22  ;;  %v2752_v33 = vrot.slane %v2739_v23, %v7461_v25  ;;  %v2756_v3 = vrot.slane %v2739_v23, %v7510_v12 }
0x1294   :  { %v2760_v13 = vrot.slane %v2739_v23, %v7564_v52  ;;  %v2764_v8 = vrot.slane %v2739_v23, %v7569_v54 }
0x1295   :  { %v2781_v56 = vsub.f32 %v2657_v10, %v2744_v53  ;;  %v2782_v59 = vsub.f32 %v2658_v20, %v2748_v34  ;;  %v2783_v19 = vsub.f32 %v2659_v48, %v2752_v33  ;;  %v2784_v27 = vsub.f32 %v2660_v28, %v2756_v3 }
0x1296   :  { %v2785_v60 = vsub.f32 %v2661_v29, %v2760_v13  ;;  %v2768_v10 = vrot.slane %v2739_v23, %v7632_v49  ;;  %v2786_v20 = vsub.f32 %v2662_v31, %v2764_v8  ;;  %v2772_v28 = vrot.slane %v2739_v23, %v7640_v57 }
0x1297   :  { %v2789_v2 = vmul.f32 1.442695, %v2781_v56  ;;  %v2791_v5 = vmul.f32 1.442695, %v2782_v59  ;;  %v2793_v58 = vmul.f32 1.442695, %v2783_v19 }
0x1298   :  { %v2795_v9 = vmul.f32 1.442695, %v2784_v27  ;;  %v2797_v48 = vmul.f32 1.442695, %v2785_v60  ;;  %v2787_v62 = vsub.f32 %v2663_v61, %v2768_v10  ;;  %v2799_v29 = vmul.f32 1.442695, %v2786_v20 }
0x1299   :  { %6649 = vpow2.f32 %v2789_v2  ;;  %v2788_v41 = vsub.f32 %v2664_v63, %v2772_v28 }
0x129a   :  { %6651 = vpow2.f32 %v2791_v5  ;;  %v2801_v1 = vmul.f32 1.442695, %v2787_v62 }
0x129b   :  { %6653 = vpow2.f32 %v2793_v58  ;;  %v2803_v31 = vmul.f32 1.442695, %v2788_v41 }
0x129c   :  { %6655 = vpow2.f32 %v2795_v9 }
0x129d   :  { %6657 = vpow2.f32 %v2797_v48 }
0x129e   :  { %6659 = vpow2.f32 %v2799_v29 }
0x129f   :  { %6661 = vpow2.f32 %v2801_v1  ;;  %v5819_v1 = vmul.f32 -1.442695, %v7862_v6 }
0x12a0   :  { %6663 = vpow2.f32 %v2803_v31 }
0x12a3   :  { %v7918_v43 = vpop.eup %6649 }
0x12a4   :  { %2814 = vperm.xlu1 %6583, %v7918_v43   ;;  %v7922_v36 = vpop.eup %6651 }
0x12a5   :  { %v7926_v44 = vpop.eup %6653 }
0x12a6   :  { %v7929_v45 = vpop.eup %6655 }
0x12a7   :  { %v7932_v0 = vpop.eup %6657 }
0x12a8   :  { %2817 = vperm.xlu1 %6583, %v7922_v36   ;;  %v7935_v61 = vpop.eup %6659 }
0x12a9   :  { %v7938_v46 = vpop.eup %6661 }
0x12aa   :  { %v6664_v63 = vpop.eup %6663 }
0x12ac   :  { %2820 = vperm.xlu1 %6583, %v7926_v44  }
0x12b0   :  { %2823 = vperm.xlu1 %6583, %v7929_v45  }
0x12b4   :  { %2826 = vperm.xlu1 %6583, %v7932_v0  }
0x12b8   :  { %2829 = vperm.xlu1 %6583, %v7935_v61  }
0x12bc   :  { %2832 = vperm.xlu1 %6583, %v7938_v46  }
0x12c0   :  { %2835 = vperm.xlu1 %6583, %v6664_v63  }
0x1323   :  { %v2815_v38 = vpop.permute.xlu1 %2814 }
0x1324   :  { %v2840_v14 = vrot.slane %v2815_v38, %v7528_v39 }
0x1327   :  { %v2818_v30 = vpop.permute.xlu1 %2817 }
0x1328   :  { %v2844_v42 = vrot.slane %v2818_v30, %v7528_v39 }
0x132a   :  { %v2869_v50 = vsel %vm734_vm12, %v2844_v42, %v2840_v14 }
0x132b   :  { %v2821_v47 = vpop.permute.xlu1 %2820 }
0x132c   :  { %v2848_v32 = vrot.slane %v2821_v47, %v7528_v39 }
0x132e   :  { %v2870_v51 = vsel %vm736_vm13, %v2848_v32, %v2869_v50  ;;  %v5806_v32 = vmul.f32 -1.442695, %v7606_v40 }
0x132f   :  { %v2824_v35 = vpop.permute.xlu1 %2823 }
0x1330   :  { %v2852_v15 = vrot.slane %v2824_v35, %v7528_v39 }
0x1332   :  { %v2871_v53 = vsel %vm738_vm14, %v2852_v15, %v2870_v51 }
0x1333   :  { %v2827_v4 = vpop.permute.xlu1 %2826 }
0x1334   :  { %v2856_v18 = vrot.slane %v2827_v4, %v7528_v39 }
0x1336   :  { %v2872_v34 = vsel %vm1449_vm7, %v2856_v18, %v2871_v53 }
0x1337   :  { %v2830_v55 = vpop.permute.xlu1 %2829 }
0x1338   :  { %v2860_v16 = vrot.slane %v2830_v55, %v7528_v39 }
0x133a   :  { %v2873_v56 = vsel %vm1451_vm8, %v2860_v16, %v2872_v34 }
0x133b   :  { %v2833_v37 = vpop.permute.xlu1 %2832 }
0x133c   :  { %v2864_v23 = vrot.slane %v2833_v37, %v7528_v39 }
0x133e   :  { %v2874_v2 = vsel %vm8426_vm1, %v2864_v23, %v2873_v56 }
0x133f   :  { %v2836_v33 = vpop.permute.xlu1 %2835 }
0x1340   :  { %v2868_v59 = vrot.slane %v2836_v33, %v7528_v39 }
0x1342   :  { %v2875_v3 = vsel %vm8427_vm2, %v2868_v59, %v2874_v2 }
0x1343   :  { %v2877_v19 = vsel %vm435_vm5, %v2875_v3, 0.0 }
0x1344   :  { %2878 = vadd.xlane.f32.xlu0 %v2877_v19 }
0x13d1   :  { %v2879_v5 = vpop.xlane.xlu0 %2878 }
0x13d2   :  { %v2888_v13 = vrot.slane %v2879_v5, %v7454_v22  ;;  %v2884_v27 = vrot.slane %v2879_v5, %v7451_v21  ;;  %v2912_v58 = vrot.slane %v2879_v5, %v7640_v57  ;;  %v2892_v8 = vrot.slane %v2879_v5, %v7461_v25 }
0x13d3   :  { %v2896_v60 = vrot.slane %v2879_v5, %v7510_v12  ;;  %v2900_v9 = vrot.slane %v2879_v5, %v7564_v52  ;;  %v2904_v28 = vrot.slane %v2879_v5, %v7569_v54  ;;  %v2908_v38 = vrot.slane %v2879_v5, %v7632_v49 }
0x13d4   :  { %6665 = vrcp.f32 %v2888_v13 }
0x13d5   :  { %6667 = vrcp.f32 %v2884_v27 }
0x13d6   :  { %6669 = vrcp.f32 %v2912_v58 }
0x13d7   :  { %6671 = vrcp.f32 %v2892_v8 }
0x13d8   :  { %6673 = vrcp.f32 %v2896_v60 }
0x13d9   :  { %6675 = vrcp.f32 %v2900_v9 }
0x13da   :  { %6677 = vrcp.f32 %v2904_v28 }
0x13db   :  { %6679 = vpow2.f32 %v5819_v1 }
0x13dc   :  { %6681 = vrcp.f32 %v2908_v38 }
0x13de   :  { %v6666_v10 = vpop.eup %6665 }
0x13df   :  { %v6668_v20 = vpop.eup %6667  ;;  %v2924_v48 = vmul.f32 %v6666_v10, %v7922_v36 }
0x13e0   :  { %v6670_v62 = vpop.eup %6669  ;;  %v2922_v29 = vmul.f32 %v6668_v20, %v7918_v43 }
0x13e1   :  { %v6672_v41 = vpop.eup %6671  ;;  %2949 = vperm.xlu0 %6584, %v2924_v48   ;;  %v2936_v31 = vmul.f32 %v6670_v62, %v6664_v63  ;;  %v3096_v62 = vld [vmem:[%s8428_s20] sm:$0xff] }
0x13e2   :  { %2946 = vperm.xlu1 %6583, %v2922_v29   ;;  %v2926_v30 = vmul.f32 %v6672_v41, %v7926_v44  ;;  %v6674_v47 = vpop.eup %6673  ;;  %v3097_v29 = vld [vmem:[%s8428_s20 + $0x8] sm:$0xf] }
0x13e3   :  { %v2928_v36 = vmul.f32 %v6674_v47, %v7929_v45  ;;  %v6676_v35 = vpop.eup %6675  ;;  %v6357_v41 = vpack.c.bf16 %v3097_v29, %v3096_v62 }
0x13e4   :  { %v2930_v43 = vmul.f32 %v6676_v35, %v7932_v0  ;;  %v6678_v4 = vpop.eup %6677  ;;  %v5814_v0 = vmul.f32 -1.442695, %v7792_v24 }
0x13e5   :  { %2967 = vperm.xlu0 %6584, %v2936_v31   ;;  %v6680_v6 = vpop.eup %6679  ;;  %v2932_v63 = vmul.f32 %v6678_v4, %v7935_v61  ;;  %6359 = vmatprep.subr.msk.bf16.mxu1 %vm7415_vm3, %v6357_v41 }
0x13e6   :  { %2952 = vperm.xlu1 %6583, %v2926_v30   ;;  %v6682_v55 = vpop.eup %6681  ;;  %v2325_v42 = vadd.f32 1.0, %v6680_v6  ;;  %6362 = vmatpush3.bf16.msk.msra.mxu1 %vm7415_vm3, %v6357_v41  ;;  %v3278_v6 = vld [vmem:[%s8431_s28 + $0x8] sm:$0xff]  ;;  %vm3192_vm3 = vcmask 130048  }
0x13e7   :  { %v2934_v44 = vmul.f32 %v6682_v55, %v7938_v46 }
0x13e8   :  { %6683 = vrcp.f32 %v2325_v42 }
0x13e9   :  { %6685 = vpow2.f32 %v5806_v32  ;;  %v3279_v32 = vld [vmem:[%s8431_s28 + $0x10] sm:$0xff] }
0x13ea   :  { %2955 = vperm.xlu1 %6583, %v2928_v36  }
0x13ee   :  { %2958 = vperm.xlu1 %6583, %v2930_v43   ;;  %v7194_v43 = vmov 0.0|0.0  }
0x13ef   :  { %6367 = vmatprep.subr.bf16.mxu1 %v7194_v43 }
0x13f2   :  { %2961 = vperm.xlu1 %6583, %v2932_v63   ;;  %v6684_v14 = vpop.eup %6683 }
0x13f3   :  { %v6686_v45 = vpop.eup %6685 }
0x13f4   :  { %v959_v15 = vadd.f32 1.0, %v6686_v45 }
0x13f6   :  { %2964 = vperm.xlu1 %6583, %v2934_v44   ;;  %6687 = vrcp.f32 %v959_v15 }
0x13f7   :  { %6689 = vpow2.f32 %v5814_v0  ;;  %v5826_v0 = vld [vmem:[#allocation15] ss:$0 sm:$0xff] }
0x1400   :  { %v6688_v18 = vpop.eup %6687 }
0x1401   :  { %v6690_v61 = vpop.eup %6689 }
0x1402   :  { %v1804_v37 = vadd.f32 1.0, %v6690_v61 }
0x1403   :  { %2328 = vxpose.xlu0.b32.start.end [1/1] (short) (narrow) %v6684_v14, 8  ;;  %v3280_v14 = vld [vmem:[%s8431_s28 + $0x18] sm:$0xff] }
0x1404   :  { %6691 = vrcp.f32 %v1804_v37  ;;  %v8015_v15 = vpack.c.bf16 %v3280_v14, %v3279_v32 }
0x140e   :  { %v6692_v50 = vpop.eup %6691 }
0x141f   :  { %962 = vxpose.xlu1.b32.start.end [1/1] (short) (narrow) %v6688_v18, 8 }
0x143d   :  { %1812 = vrot.lane.b32.xlu1 %v6692_v50, %s7192_s23 }
0x1460   :  { %v2950_v51 = vpop.permute.xlu0 %2949 }
0x1461   :  { %v2947_v46 = vpop.permute.xlu1 %2946  ;;  %v2976_v53 = vrot.slane %v2950_v51, %v7528_v39 }
0x1462   :  { %v2972_v34 = vrot.slane %v2947_v46, %v7528_v39 }
0x1464   :  { %v3001_v2 = vsel %vm734_vm12, %v2976_v53, %v2972_v34  ;;  %v2968_v19 = vpop.permute.xlu0 %2967  ;;  %vm8430_vm12 = vmmov %vm8427_vm2 }
0x1465   :  { %v2953_v40 = vpop.permute.xlu1 %2952  ;;  %v3000_v60 = vrot.slane %v2968_v19, %v7528_v39 }
0x1466   :  { %v2980_v24 = vrot.slane %v2953_v40, %v7528_v39  ;;  %v8031_v40 = vld [vmem:[#allocation17] ss:$0 sm:$0xff] }
0x1468   :  { %v3002_v5 = vsel %vm736_vm13, %v2980_v24, %v3001_v2  ;;  %vm3105_vm13 = vcmask 97280  }
0x1469   :  { %v2956_v16 = vpop.permute.xlu1 %2955 }
0x146a   :  { %v2984_v33 = vrot.slane %v2956_v16, %v7528_v39  ;;  %v3191_v16 = vld [vmem:[%s8432_s3 + $0x8] sm:$0xff] }
0x146c   :  { %v3003_v13 = vsel %vm738_vm14, %v2984_v33, %v3002_v5  ;;  %vm3289_vm14 = vcmask 261120  }
0x146d   :  { %v2959_v23 = vpop.permute.xlu1 %2958 }
0x146e   :  { %v2988_v59 = vrot.slane %v2959_v23, %v7528_v39 }
0x1470   :  { %v3004_v58 = vsel %vm1449_vm7, %v2988_v59, %v3003_v13  ;;  %vm4448_vm7 = vcmask 25600  }
0x1471   :  { %v2962_v56 = vpop.permute.xlu1 %2961 }
0x1472   :  { %v2992_v3 = vrot.slane %v2962_v56, %v7528_v39 }
0x1474   :  { %v3005_v9 = vsel %vm1451_vm8, %v2992_v3, %v3004_v58  ;;  %vm5638_vm8 = vcmask 1045504  }
0x1475   :  { %v2965_v27 = vpop.permute.xlu1 %2964 }
0x1476   :  { %v2996_v8 = vrot.slane %v2965_v27, %v7528_v39 }
0x1478   :  { %v3006_v10 = vsel %vm8429_vm9, %v2996_v8, %v3005_v9 }
0x1479   :  { %v3007_v20 = vsel %vm8430_vm12, %v3000_v60, %v3006_v10 }
0x147a   :  { %6100 = vmatmul.mubr.msk.f32.vlgmr.msra.gmra.mrb[12].mxu0 %vm435_vm5, %v3007_v20 }
0x1483   :  { %v2344_v48 = vpop.trf.xlu0 }
0x1484   :  { %3087 = vrot.lane.b32.xlu1 %v2344_v48, %s7193_s26 }
0x149f   :  { %v978_v28 = vpop.trf.xlu1 }
0x14a0   :  { %1808 = vrot.lane.b32.xlu0 %v978_v28, %s7193_s26 }
0x14af   :  { %v1813_v1 = vpop.permute.xlu1 %1812 }
0x14f6   :  { %v3088_v63 = vpop.permute.xlu1 %3087 }
0x14f7   :  { %v3094_v42 = vsel %vm881_vm6, %v7753_v26, %v3088_v63  ;;  %v3190_v26 = vld [vmem:[%s8432_s3] sm:$0xff] }
0x14f8   :  { %6113 = vmatprep.mubr.msk.f32.mxu0 %vm3192_vm3, %v3190_v26 }
0x1512   :  { %v1809_v39 = vpop.permute.xlu0 %1808 }
0x1513   :  { %v1815_v31 = vsel %vm881_vm6, %v7442_v17, %v1809_v39  ;;  %v3277_v17 = vld [vmem:[%s8431_s28] sm:$0xff] }
0x1514   :  { %v1816_v38 = vsel %vm435_vm5, %v1815_v31, %v1813_v1  ;;  %v8006_v55 = vpack.c.bf16 %v3278_v6, %v3277_v17 }
0x1515   :  { %6106 = vmatprep.mubr.msk.f32.mxu1 %vm3105_vm13, %v1816_v38 }
0x154d   :  { %v3076_v30 = vpop.f32.mrb[12].mxu0 }
0x154e   :  { %v5825_v47 = vmul.f32 -1.442695, %v3076_v30  ;;  %v6101_v36 = vpop.f32.mrb[13].mxu0 }
0x1550   :  { %6693 = vpow2.f32 %v5825_v47 }
0x155a   :  { %v6694_v7 = vpop.eup %6693 }
0x155b   :  { %v3083_v35 = vadd.f32 1.0, %v6694_v7 }
0x155d   :  { %6695 = vrcp.f32 %v3083_v35 }
0x1567   :  { %v6696_v4 = vpop.eup %6695 }
0x1568   :  { %3091 = vrot.lane.b32.xlu0 %v6696_v4, %s7192_s23 }
0x15da   :  { %v3092_v44 = vpop.permute.xlu0 %3091 }
0x15db   :  { %v3095_v45 = vsel %vm435_vm5, %v3094_v42, %v3092_v44  ;;  %vm3274_vm5 = vcmask 785408  }
0x15dc   :  { %6107 = vmatmul.mubr.msk.f32.vlgmr.msra.gmra.mrb[12].mxu1 %vm3105_vm13, %v3095_v45 }
0x15dd   :  { %6369 = vmatpush3.bf16.msra.mxu1 %v8006_v55  ;;  %6124 = vmatprep.mubr.msk.f32.mxu1 %vm7189_vm4, %v7188_v11 }
0x15de   :  { %6370 = vmatprep.subr.bf16.mxu1 %v7194_v43 }
0x15e1   :  { %6372 = vmatpush3.bf16.msra.mxu1 %v8015_v15 }
0x15e2   :  { %6379 = vmatprep.subr.bf16.mxu1 %v7194_v43 }
0x15e4   :  { %6125 = vmatmul.mubr.f32.vlgmr.msra.gmra.mrb[14].mxu1 %v7188_v11 }
0x15e5   :  { %6381 = vmatpush3.bf16.msra.mxu1 %v8006_v55  ;;  %6146 = vmatprep.mubr.msk.f32.mxu1 %vm7189_vm4, %v7188_v11 }
0x15e6   :  { %6382 = vmatprep.subr.bf16.mxu1 %v7194_v43 }
0x15e9   :  { %6384 = vmatpush3.bf16.msra.mxu1 %v8015_v15 }
0x15ea   :  { %6391 = vmatprep.subr.bf16.mxu1 %v7194_v43 }
0x16af   :  { %v6108_v18 = vpop.f32.mrb[12].mxu1 }
0x16b0   :  { %v3187_v61 = vadd.f32 %v6108_v18, %v5826_v0  ;;  %v3181_v37 = vpop.f32.mrb[13].mxu1 }
0x16b1   :  { %v3182_v50 = vadd.f32 %v5826_v0, %v3181_v37 }
0x16b3   :  { %v6363_v46 = vpack.c.bf16 %v3187_v61, %v3182_v50 }
0x16b5   :  { %6364 = vmatprep.subr.bf16.mxu0 %v6363_v46 }
0x16b6   :  { %6366 = vmatpush3.bf16.msra.mxu0 %v6363_v46 }
0x16b7   :  { %v3359_v51 = vpop.f32.mrb[14].mxu1  ;;  %6373 = vmatprep.subr.bf16.mxu0 %v7194_v43 }
0x16b8   :  { %v3360_v23 = vadd.f32 %v8031_v40, %v3359_v51  ;;  %v6126_v53 = vpop.f32.mrb[15].mxu1 }
0x16b9   :  { %6114 = vmatmul.mubr.msk.f32.vlgmr.msra.gmra.mrb[14].mxu0 %vm3192_vm3, %v3191_v16 }
0x16ba   :  { %3371 = vrot.lane.b32.xlu1 %v3360_v23, %s7195_s19  ;;  %6375 = vmatpush3.bf16.msra.mxu0 %v8006_v55 }
0x16bb   :  { %6376 = vmatprep.subr.bf16.mxu0 %v7194_v43  ;;  %6135 = vmatprep.mubr.msk.f32.mxu0 %vm7189_vm4, %v7188_v11 }
0x16be   :  { %6378 = vmatpush3.bf16.msra.mxu0 %v8015_v15 }
0x16bf   :  { %6385 = vmatprep.subr.bf16.mxu0 %v7194_v43 }
0x172c   :  { %v3372_v19 = vpop.permute.xlu1 %3371 }
0x178c   :  { %v6115_v34 = vpop.f32.mrb[14].mxu0 }
0x178d   :  { %3276 = vst.msk [vmem:[#allocation2 + $0x8] sm:$0xff] %vm3274_vm5, %v6115_v34  ;;  %v3265_v24 = vpop.f32.mrb[15].mxu0 }
0x178e   :  { %3275 = vst.msk [vmem:[#allocation2] sm:$0xff] %vm3274_vm5, %v3265_v24 }
0x1795   :  { %v3282_v33 = vld [vmem:[#allocation2] sm:$0x3]  ;;  %v3389_v39 = vld [vmem:[#allocation2 + $0x2] sm:$0x3]  ;;  %v3491_v18 = vld [vmem:[#allocation2 + $0x4] sm:$0x3] }
0x1796   :  { %v3363_v56 = vadd.f32 %v3360_v23, %v3282_v33 }
0x1798   :  { %v5833_v59 = vmul.f32 -1.442695, %v3363_v56 }
0x179a   :  { %6697 = vpow2.f32 %v5833_v59 }
0x17a4   :  { %v6698_v2 = vpop.eup %6697 }
0x17a5   :  { %v3367_v3 = vadd.f32 1.0, %v6698_v2 }
0x17a7   :  { %6699 = vrcp.f32 %v3367_v3 }
0x17b1   :  { %v6700_v5 = vpop.eup %6699 }
0x17b2   :  { %v3374_v13 = vmul.f32 %v6700_v5, %v3372_v19  ;;  %v3381_v60 = vsub.f32 1.0, %v6700_v5  ;;  %v3387_v10 = vmul.f32 0.0, %v6700_v5 }
0x17b4   :  { %3376 = vrot.lane.b32.xlu0 %v3374_v13, %s7195_s19 }
0x1826   :  { %v3377_v27 = vpop.permute.xlu0 %3376 }
0x1827   :  { %v3379_v58 = vadd.f32 %v3377_v27, %v3282_v33 }
0x1829   :  { %6701 = vtanh.f32 %v3379_v58  ;;  %v3593_v58 = vld [vmem:[#allocation2 + $0x6] sm:$0x3] }
0x1833   :  { %v6702_v8 = vpop.eup %6701 }
0x1834   :  { %3383 = vrot.lane.b32.xlu1 %v6702_v8, %s7196_s1 }
0x18a6   :  { %v3384_v9 = vpop.permute.xlu1 %3383 }
0x18a7   :  { %v3386_v20 = vmul.f32 %v3384_v9, %v3381_v60 }
0x18a9   :  { %v3388_v48 = vadd.f32 %v3387_v10, %v3386_v20 }
0x18ab   :  { %3391 = vrot.lane.b32.xlu0 %v3388_v48, %s7196_s1 }
0x191d   :  { %v3392_v28 = vpop.permute.xlu0 %3391 }
0x191e   :  { %6136 = vmatmul.mubr.msk.f32.vlgmr.msra.gmra.mrb[16].mxu0 %vm3289_vm14, %v3392_v28 }
0x191f   :  { %6387 = vmatpush3.bf16.msra.mxu0 %v8006_v55  ;;  %6157 = vmatprep.mubr.msk.f32.mxu0 %vm7189_vm4, %v7188_v11 }
0x1920   :  { %6388 = vmatprep.subr.bf16.mxu0 %v7194_v43 }
0x1923   :  { %6390 = vmatpush3.bf16.msra.mxu0 %v8015_v15 }
0x1924   :  { %6397 = vmatprep.subr.bf16.mxu0 %v7194_v43 }
0x19f1   :  { %v3461_v62 = vpop.f32.mrb[16].mxu0 }
0x19f2   :  { %v3462_v29 = vadd.f32 %v8031_v40, %v3461_v62  ;;  %v6137_v41 = vpop.f32.mrb[17].mxu0 }
0x19f4   :  { %3473 = vrot.lane.b32.xlu1 %v3462_v29, %s7195_s19  ;;  %v3465_v1 = vadd.f32 %v3462_v29, %v3389_v39 }
0x19f6   :  { %v5835_v31 = vmul.f32 -1.442695, %v3465_v1 }
0x19f8   :  { %6703 = vpow2.f32 %v5835_v31 }
0x1a02   :  { %v6704_v38 = vpop.eup %6703 }
0x1a03   :  { %v3469_v30 = vadd.f32 1.0, %v6704_v38 }
0x1a05   :  { %6705 = vrcp.f32 %v3469_v30 }
0x1a0f   :  { %v6706_v47 = vpop.eup %6705 }
0x1a10   :  { %v3483_v6 = vsub.f32 1.0, %v6706_v47  ;;  %v3489_v42 = vmul.f32 %v6706_v47, %v3388_v48 }
0x1a66   :  { %v3474_v36 = vpop.permute.xlu1 %3473 }
0x1a67   :  { %v3476_v7 = vmul.f32 %v6706_v47, %v3474_v36 }
0x1a69   :  { %3478 = vrot.lane.b32.xlu0 %v3476_v7, %s7195_s19 }
0x1adb   :  { %v3479_v35 = vpop.permute.xlu0 %3478 }
0x1adc   :  { %v3481_v4 = vadd.f32 %v3479_v35, %v3389_v39 }
0x1ade   :  { %6707 = vtanh.f32 %v3481_v4  ;;  %v3695_v4 = vld [vmem:[#allocation2 + $0x8] sm:$0x3] }
0x1ae8   :  { %v6708_v17 = vpop.eup %6707 }
0x1ae9   :  { %3485 = vrot.lane.b32.xlu1 %v6708_v17, %s7196_s1 }
0x1b5b   :  { %v3486_v63 = vpop.permute.xlu1 %3485 }
0x1b5c   :  { %v3488_v44 = vmul.f32 %v3486_v63, %v3483_v6 }
0x1b5e   :  { %v3490_v32 = vadd.f32 %v3489_v42, %v3488_v44 }
0x1b60   :  { %3493 = vrot.lane.b32.xlu0 %v3490_v32, %s7196_s1 }
0x1bd2   :  { %v3494_v14 = vpop.permute.xlu0 %3493 }
0x1bd3   :  { %6147 = vmatmul.mubr.msk.f32.vlgmr.msra.gmra.mrb[16].mxu1 %vm3289_vm14, %v3494_v14 }
0x1bd4   :  { %6393 = vmatpush3.bf16.msra.mxu1 %v8006_v55  ;;  %6168 = vmatprep.mubr.msk.f32.mxu1 %vm7189_vm4, %v7188_v11 }
0x1bd5   :  { %6394 = vmatprep.subr.bf16.mxu1 %v7194_v43 }
0x1bd8   :  { %6396 = vmatpush3.bf16.msra.mxu1 %v8015_v15 }
0x1bd9   :  { %6403 = vmatprep.subr.bf16.mxu1 %v7194_v43 }
0x1ca6   :  { %v3563_v45 = vpop.f32.mrb[16].mxu1 }
0x1ca7   :  { %v3564_v26 = vadd.f32 %v8031_v40, %v3563_v45  ;;  %v6148_v0 = vpop.f32.mrb[17].mxu1 }
0x1ca9   :  { %3575 = vrot.lane.b32.xlu1 %v3564_v26, %s7195_s19  ;;  %v3567_v61 = vadd.f32 %v3564_v26, %v3491_v18 }
0x1cab   :  { %v5837_v37 = vmul.f32 -1.442695, %v3567_v61 }
0x1cad   :  { %6709 = vpow2.f32 %v5837_v37 }
0x1cb7   :  { %v6710_v50 = vpop.eup %6709 }
0x1cb8   :  { %v3571_v46 = vadd.f32 1.0, %v6710_v50 }
0x1cba   :  { %6711 = vrcp.f32 %v3571_v46 }
0x1cc4   :  { %v6712_v16 = vpop.eup %6711 }
0x1cc5   :  { %v3585_v33 = vsub.f32 1.0, %v6712_v16  ;;  %v3591_v59 = vmul.f32 %v6712_v16, %v3490_v32 }
0x1d1b   :  { %v3576_v51 = vpop.permute.xlu1 %3575 }
0x1d1c   :  { %v3578_v23 = vmul.f32 %v6712_v16, %v3576_v51 }
0x1d1e   :  { %3580 = vrot.lane.b32.xlu0 %v3578_v23, %s7195_s19 }
0x1d90   :  { %v3581_v53 = vpop.permute.xlu0 %3580 }
0x1d91   :  { %v3583_v34 = vadd.f32 %v3581_v53, %v3491_v18 }
0x1d93   :  { %6713 = vtanh.f32 %v3583_v34  ;;  %v3797_v34 = vld [vmem:[#allocation2 + $0xa] sm:$0x3] }
0x1d9d   :  { %v6714_v24 = vpop.eup %6713 }
0x1d9e   :  { %3587 = vrot.lane.b32.xlu1 %v6714_v24, %s7196_s1 }
0x1e10   :  { %v3588_v56 = vpop.permute.xlu1 %3587 }
0x1e11   :  { %v3590_v2 = vmul.f32 %v3588_v56, %v3585_v33 }
0x1e13   :  { %v3592_v3 = vadd.f32 %v3591_v59, %v3590_v2 }
0x1e15   :  { %3595 = vrot.lane.b32.xlu0 %v3592_v3, %s7196_s1 }
0x1e87   :  { %v3596_v19 = vpop.permute.xlu0 %3595 }
0x1e88   :  { %6158 = vmatmul.mubr.msk.f32.vlgmr.msra.gmra.mrb[18].mxu0 %vm3289_vm14, %v3596_v19 }
0x1e89   :  { %6399 = vmatpush3.bf16.msra.mxu0 %v8006_v55  ;;  %6179 = vmatprep.mubr.msk.f32.mxu0 %vm7189_vm4, %v7188_v11 }
0x1e8a   :  { %6400 = vmatprep.subr.bf16.mxu0 %v7194_v43 }
0x1e8d   :  { %6402 = vmatpush3.bf16.msra.mxu0 %v8015_v15 }
0x1e8e   :  { %6409 = vmatprep.subr.bf16.mxu0 %v7194_v43 }
0x1f5b   :  { %v3665_v5 = vpop.f32.mrb[18].mxu0 }
0x1f5c   :  { %v3666_v13 = vadd.f32 %v8031_v40, %v3665_v5  ;;  %v6159_v27 = vpop.f32.mrb[19].mxu0 }
0x1f5e   :  { %3677 = vrot.lane.b32.xlu1 %v3666_v13, %s7195_s19  ;;  %v3669_v8 = vadd.f32 %v3666_v13, %v3593_v58 }
0x1f60   :  { %v5839_v60 = vmul.f32 -1.442695, %v3669_v8 }
0x1f62   :  { %6715 = vpow2.f32 %v5839_v60 }
0x1f6c   :  { %v6716_v9 = vpop.eup %6715 }
0x1f6d   :  { %v3673_v10 = vadd.f32 1.0, %v6716_v9 }
0x1f6f   :  { %6717 = vrcp.f32 %v3673_v10 }
0x1f79   :  { %v6718_v20 = vpop.eup %6717 }
0x1f7a   :  { %v3687_v39 = vsub.f32 1.0, %v6718_v20  ;;  %v3693_v31 = vmul.f32 %v6718_v20, %v3592_v3 }
0x1fd0   :  { %v3678_v48 = vpop.permute.xlu1 %3677 }
0x1fd1   :  { %v3680_v28 = vmul.f32 %v6718_v20, %v3678_v48 }
0x1fd3   :  { %3682 = vrot.lane.b32.xlu0 %v3680_v28, %s7195_s19  ;;  %v3899_v28 = vld [vmem:[#allocation2 + $0xc] sm:$0x3] }
0x2045   :  { %v3683_v62 = vpop.permute.xlu0 %3682 }
0x2046   :  { %v3685_v29 = vadd.f32 %v3683_v62, %v3593_v58 }
0x2048   :  { %6719 = vtanh.f32 %v3685_v29 }
0x2052   :  { %v6720_v41 = vpop.eup %6719 }
0x2053   :  { %3689 = vrot.lane.b32.xlu1 %v6720_v41, %s7196_s1 }
0x20c5   :  { %v3690_v1 = vpop.permute.xlu1 %3689 }
0x20c6   :  { %v3692_v38 = vmul.f32 %v3690_v1, %v3687_v39 }
0x20c8   :  { %v3694_v30 = vadd.f32 %v3693_v31, %v3692_v38 }
0x20ca   :  { %3697 = vrot.lane.b32.xlu0 %v3694_v30, %s7196_s1 }
0x213c   :  { %v3698_v47 = vpop.permute.xlu0 %3697 }
0x213d   :  { %6169 = vmatmul.mubr.msk.f32.vlgmr.msra.gmra.mrb[18].mxu1 %vm3289_vm14, %v3698_v47 }
0x213e   :  { %6405 = vmatpush3.bf16.msra.mxu1 %v8006_v55  ;;  %6190 = vmatprep.mubr.msk.f32.mxu1 %vm7189_vm4, %v7188_v11 }
0x213f   :  { %6406 = vmatprep.subr.bf16.mxu1 %v7194_v43 }
0x2142   :  { %6408 = vmatpush3.bf16.msra.mxu1 %v8015_v15 }
0x2143   :  { %6415 = vmatprep.subr.bf16.mxu1 %v7194_v43 }
0x2210   :  { %v3767_v36 = vpop.f32.mrb[18].mxu1 }
0x2211   :  { %v3768_v7 = vadd.f32 %v8031_v40, %v3767_v36  ;;  %v6170_v35 = vpop.f32.mrb[19].mxu1 }
0x2213   :  { %3779 = vrot.lane.b32.xlu1 %v3768_v7, %s7195_s19  ;;  %v3771_v17 = vadd.f32 %v3768_v7, %v3695_v4 }
0x2215   :  { %v5841_v6 = vmul.f32 -1.442695, %v3771_v17 }
0x2217   :  { %6721 = vpow2.f32 %v5841_v6 }
0x2221   :  { %v6722_v63 = vpop.eup %6721 }
0x2222   :  { %v3775_v42 = vadd.f32 1.0, %v6722_v63 }
0x2224   :  { %6723 = vrcp.f32 %v3775_v42 }
0x222e   :  { %v6724_v44 = vpop.eup %6723 }
0x222f   :  { %v3789_v18 = vsub.f32 1.0, %v6724_v44  ;;  %v3795_v37 = vmul.f32 %v6724_v44, %v3694_v30 }
0x2285   :  { %v3780_v32 = vpop.permute.xlu1 %3779 }
0x2286   :  { %v3782_v14 = vmul.f32 %v6724_v44, %v3780_v32 }
0x2288   :  { %3784 = vrot.lane.b32.xlu0 %v3782_v14, %s7195_s19  ;;  %v4001_v14 = vld [vmem:[#allocation2 + $0xe] sm:$0x3] }
0x22fa   :  { %v3785_v45 = vpop.permute.xlu0 %3784 }
0x22fb   :  { %v3787_v26 = vadd.f32 %v3785_v45, %v3695_v4 }
0x22fd   :  { %6725 = vtanh.f32 %v3787_v26 }
0x2307   :  { %v6726_v0 = vpop.eup %6725 }
0x2308   :  { %3791 = vrot.lane.b32.xlu1 %v6726_v0, %s7196_s1 }
0x237a   :  { %v3792_v61 = vpop.permute.xlu1 %3791 }
0x237b   :  { %v3794_v50 = vmul.f32 %v3792_v61, %v3789_v18 }
0x237d   :  { %v3796_v46 = vadd.f32 %v3795_v37, %v3794_v50 }
0x237f   :  { %3799 = vrot.lane.b32.xlu0 %v3796_v46, %s7196_s1 }
0x23f1   :  { %v3800_v16 = vpop.permute.xlu0 %3799 }
0x23f2   :  { %6180 = vmatmul.mubr.msk.f32.vlgmr.msra.gmra.mrb[20].mxu0 %vm3289_vm14, %v3800_v16  ;;  %v4103_v16 = vld [vmem:[%s8433_s2] sm:$0xff] }
0x23f3   :  { %6411 = vmatpush3.bf16.msra.mxu0 %v8006_v55  ;;  %6201 = vmatprep.mubr.msk.f32.mxu0 %vm7189_vm4, %v7188_v11 }
0x23f4   :  { %6412 = vmatprep.subr.bf16.mxu0 %v7194_v43 }
0x23f7   :  { %6414 = vmatpush3.bf16.msra.mxu0 %v8015_v15 }
0x23f8   :  { %6421 = vmatprep.subr.bf16.mxu0 %v7194_v43 }
0x24c5   :  { %v3869_v51 = vpop.f32.mrb[20].mxu0 }
0x24c6   :  { %v3870_v23 = vadd.f32 %v8031_v40, %v3869_v51  ;;  %v6181_v53 = vpop.f32.mrb[21].mxu0  ;;  %v4104_v51 = vld [vmem:[%s8433_s2 + $0x8] sm:$0xff] }
0x24c7   :  { %v6416_v53 = vpack.c.bf16 %v4104_v51, %v4103_v16  ;;  %v4462_v16 = vld [vmem:[%s8434_s30 + $0x60] sm:$0xff]  ;;  %v4471_v51 = vld [vmem:[%s8434_s30 + $0xa8] sm:$0xff] }
0x24c8   :  { %3881 = vrot.lane.b32.xlu1 %v3870_v23, %s7195_s19  ;;  %v3873_v24 = vadd.f32 %v3870_v23, %v3797_v34  ;;  %v4105_v23 = vld [vmem:[%s8433_s2 + $0x10] sm:$0xff] }
0x24ca   :  { %v5843_v33 = vmul.f32 -1.442695, %v3873_v24 }
0x24cc   :  { %6727 = vpow2.f32 %v5843_v33 }
0x24d6   :  { %v6728_v55 = vpop.eup %6727 }
0x24d7   :  { %v3877_v56 = vadd.f32 1.0, %v6728_v55  ;;  %v5850_v55 = vld [vmem:[%s8433_s2 + $0x20] sm:$0xff] }
0x24d9   :  { %6729 = vrcp.f32 %v3877_v56  ;;  %v5851_v56 = vld [vmem:[%s8433_s2 + $0x28] sm:$0xff] }
0x24e3   :  { %v6730_v59 = vpop.eup %6729 }
0x24e4   :  { %v3891_v13 = vsub.f32 1.0, %v6730_v59  ;;  %v3897_v58 = vmul.f32 %v6730_v59, %v3796_v46 }
0x253a   :  { %v3882_v2 = vpop.permute.xlu1 %3881 }
0x253b   :  { %v3884_v3 = vmul.f32 %v6730_v59, %v3882_v2  ;;  %v6422_v59 = vpack.c.bf16 %v5851_v56, %v5850_v55  ;;  %v4808_v56 = vld [vmem:[%s8436_s12] sm:$0xff] }
0x253d   :  { %3886 = vrot.lane.b32.xlu0 %v3884_v3, %s7195_s19 }
0x25af   :  { %v3887_v15 = vpop.permute.xlu0 %3886 }
0x25b0   :  { %v3889_v19 = vadd.f32 %v3887_v15, %v3797_v34  ;;  %v4106_v34 = vld [vmem:[%s8433_s2 + $0x18] sm:$0xff] }
0x25b1   :  { %v6419_v24 = vpack.c.bf16 %v4106_v34, %v4105_v23  ;;  %v4479_v23 = vld [vmem:[%s8434_s30 + $0xe8] sm:$0xff] }
0x25b2   :  { %6731 = vtanh.f32 %v3889_v19  ;;  %v6459_v34 = vpack.c.bf16 %v4479_v23, %v4471_v51 }
0x25bc   :  { %v6732_v5 = vpop.eup %6731 }
0x25bd   :  { %3893 = vrot.lane.b32.xlu1 %v6732_v5, %s7196_s1 }
0x262f   :  { %v3894_v27 = vpop.permute.xlu1 %3893 }
0x2630   :  { %v3896_v8 = vmul.f32 %v3894_v27, %v3891_v13  ;;  %v5852_v27 = vld [vmem:[%s8433_s2 + $0x30] sm:$0xff] }
0x2632   :  { %v3898_v60 = vadd.f32 %v3897_v58, %v3896_v8  ;;  %v5853_v58 = vld [vmem:[%s8433_s2 + $0x38] sm:$0xff] }
0x2633   :  { %v6425_v8 = vpack.c.bf16 %v5853_v58, %v5852_v27  ;;  %v4367_v27 = vld [vmem:[%s8435_s7 + $0x18] sm:$0xff] }
0x2634   :  { %3901 = vrot.lane.b32.xlu0 %v3898_v60, %s7196_s1  ;;  %v4453_v58 = vld [vmem:[%s8434_s30 + $0x18] sm:$0xff] }
0x26a6   :  { %v3902_v9 = vpop.permute.xlu0 %3901 }
0x26a7   :  { %6191 = vmatmul.mubr.msk.f32.vlgmr.msra.gmra.mrb[20].mxu1 %vm3289_vm14, %v3902_v9  ;;  %v5857_v9 = vld [vmem:[%s8433_s2 + $0x48] sm:$0xff] }
0x26a8   :  { %6212 = vmatprep.mubr.msk.f32.mxu1 %vm7189_vm4, %v7188_v11  ;;  %6417 = vmatpush3.bf16.msra.mxu1 %v6416_v53 }
0x26a9   :  { %6418 = vmatprep.subr.bf16.mxu1 %v7194_v43 }
0x26ac   :  { %6420 = vmatpush3.bf16.msra.mxu1 %v6419_v24  ;;  %v4470_v24 = vld [vmem:[%s8434_s30 + $0xa0] sm:$0xff] }
0x26ad   :  { %6427 = vmatprep.subr.bf16.mxu1 %v7194_v43 }
0x277a   :  { %v3971_v10 = vpop.f32.mrb[20].mxu1 }
0x277b   :  { %v3972_v20 = vadd.f32 %v8031_v40, %v3971_v10  ;;  %v6192_v48 = vpop.f32.mrb[21].mxu1 }
0x277d   :  { %3983 = vrot.lane.b32.xlu1 %v3972_v20, %s7195_s19  ;;  %v3975_v62 = vadd.f32 %v3972_v20, %v3899_v28  ;;  %v5848_v20 = vld [vmem:[#allocation18] ss:$0 sm:$0xff] }
0x277f   :  { %v5845_v29 = vmul.f32 -1.442695, %v3975_v62 }
0x2781   :  { %6733 = vpow2.f32 %v5845_v29 }
0x278b   :  { %v6734_v41 = vpop.eup %6733 }
0x278c   :  { %v3979_v39 = vadd.f32 1.0, %v6734_v41  ;;  %v5858_v41 = vld [vmem:[%s8433_s2 + $0x50] sm:$0xff] }
0x278e   :  { %6735 = vrcp.f32 %v3979_v39  ;;  %v5859_v39 = vld [vmem:[%s8433_s2 + $0x58] sm:$0xff] }
0x2798   :  { %v6736_v1 = vpop.eup %6735 }
0x2799   :  { %v3993_v7 = vsub.f32 1.0, %v6736_v1  ;;  %v3999_v4 = vmul.f32 %v6736_v1, %v3898_v60  ;;  %v5856_v60 = vld [vmem:[%s8433_s2 + $0x40] sm:$0xff] }
0x279a   :  { %v6428_v10 = vpack.c.bf16 %v5857_v9, %v5856_v60  ;;  %v4461_v60 = vld [vmem:[%s8434_s30 + $0x58] sm:$0xff] }
0x279b   :  { %v6447_v9 = vpack.c.bf16 %v4461_v60, %v4453_v58 }
0x27ef   :  { %v3984_v31 = vpop.permute.xlu1 %3983 }
0x27f0   :  { %v3986_v38 = vmul.f32 %v6736_v1, %v3984_v31  ;;  %v4451_v1 = vld [vmem:[%s8434_s30 + $0x8] sm:$0xff]  ;;  %v6431_v31 = vpack.c.bf16 %v5859_v39, %v5858_v41 }
0x27f2   :  { %3988 = vrot.lane.b32.xlu0 %v3986_v38, %s7195_s19  ;;  %v4459_v38 = vld [vmem:[%s8434_s30 + $0x48] sm:$0xff] }
0x2864   :  { %v3989_v30 = vpop.permute.xlu0 %3988 }
0x2865   :  { %v3991_v47 = vadd.f32 %v3989_v30, %v3899_v28  ;;  %v6439_v30 = vpack.c.bf16 %v4459_v38, %v4451_v1 }
0x2867   :  { %6737 = vtanh.f32 %v3991_v47  ;;  %v4364_v47 = vld [vmem:[%s8435_s7] sm:$0xff] }
0x2871   :  { %v6738_v36 = vpop.eup %6737 }
0x2872   :  { %3995 = vrot.lane.b32.xlu1 %v6738_v36, %s7196_s1  ;;  %v4365_v36 = vld [vmem:[%s8435_s7 + $0x8] sm:$0xff] }
0x28e4   :  { %v3996_v35 = vpop.permute.xlu1 %3995 }
0x28e5   :  { %v3998_v17 = vmul.f32 %v3996_v35, %v3993_v7  ;;  %v6434_v7 = vpack.c.bf16 %v4365_v36, %v4364_v47  ;;  %v5854_v35 = vld [vmem:[#allocation18 + $0x1] ss:$0 sm:$0xff]  ;;  %v4476_v47 = vld [vmem:[%s8434_s30 + $0xd0] sm:$0xff]  ;;  %v4457_v36 = vld [vmem:[%s8434_s30 + $0x38] sm:$0xff] }
0x28e7   :  { %v4000_v6 = vadd.f32 %v3999_v4, %v3998_v17  ;;  %v4450_v4 = vld [vmem:[%s8434_s30] sm:$0xff] }
0x28e8   :  { %v4458_v17 = vld [vmem:[%s8434_s30 + $0x40] sm:$0xff] }
0x28e9   :  { %4003 = vrot.lane.b32.xlu0 %v4000_v6, %s7196_s1 }
0x295b   :  { %v4004_v63 = vpop.permute.xlu0 %4003 }
0x295c   :  { %6202 = vmatmul.mubr.msk.f32.vlgmr.msra.gmra.mrb[22].mxu0 %vm3289_vm14, %v4004_v63  ;;  %v4467_v63 = vld [vmem:[%s8434_s30 + $0x88] sm:$0xff] }
0x295d   :  { %6223 = vmatprep.mubr.msk.f32.mxu0 %vm7189_vm4, %v7188_v11  ;;  %6423 = vmatpush3.bf16.msra.mxu0 %v6422_v59  ;;  %v4809_v59 = vld [vmem:[%s8436_s12 + $0x8] sm:$0xff] }
0x295e   :  { %6424 = vmatprep.subr.bf16.mxu0 %v7194_v43 }
0x2961   :  { %6426 = vmatpush3.bf16.msra.mxu0 %v6425_v8 }
0x2962   :  { %6433 = vmatprep.subr.bf16.mxu0 %v7194_v43 }
0x2a2f   :  { %v4073_v42 = vpop.f32.mrb[22].mxu0 }
0x2a30   :  { %v4074_v44 = vadd.f32 %v8031_v40, %v4073_v42  ;;  %v6203_v32 = vpop.f32.mrb[23].mxu0  ;;  %v4475_v42 = vld [vmem:[%s8434_s30 + $0xc8] sm:$0xff] }
0x2a32   :  { %4085 = vrot.lane.b32.xlu1 %v4074_v44, %s7195_s19  ;;  %v4077_v45 = vadd.f32 %v4074_v44, %v4001_v14 }
0x2a34   :  { %v5847_v26 = vmul.f32 -1.442695, %v4077_v45 }
0x2a36   :  { %6739 = vpow2.f32 %v5847_v26  ;;  %v6443_v26 = vpack.c.bf16 %v4475_v42, %v4467_v63  ;;  %v4473_v42 = vld [vmem:[%s8434_s30 + $0xb8] sm:$0xff] }
0x2a40   :  { %v6740_v0 = vpop.eup %6739 }
0x2a41   :  { %v4081_v18 = vadd.f32 1.0, %v6740_v0  ;;  %v4466_v0 = vld [vmem:[%s8434_s30 + $0x80] sm:$0xff] }
0x2a43   :  { %6741 = vrcp.f32 %v4081_v18  ;;  %v4474_v18 = vld [vmem:[%s8434_s30 + $0xc0] sm:$0xff] }
0x2a4d   :  { %v6742_v61 = vpop.eup %6741 }
0x2a4e   :  { %v4095_v2 = vsub.f32 1.0, %v6742_v61  ;;  %v4101_v15 = vmul.f32 %v6742_v61, %v4000_v6 }
0x2aa4   :  { %v4086_v37 = vpop.permute.xlu1 %4085 }
0x2aa5   :  { %v4088_v50 = vmul.f32 %v6742_v61, %v4086_v37  ;;  %v4455_v61 = vld [vmem:[%s8434_s30 + $0x28] sm:$0xff] }
0x2aa6   :  { %v4463_v37 = vld [vmem:[%s8434_s30 + $0x68] sm:$0xff] }
0x2aa7   :  { %4090 = vrot.lane.b32.xlu0 %v4088_v50, %s7195_s19  ;;  %v6445_v50 = vpack.c.bf16 %v4474_v18, %v4466_v0  ;;  %v4480_v0 = vld [vmem:[%s8434_s30 + $0xf0] sm:$0xff] }
0x2b19   :  { %v4091_v40 = vpop.permute.xlu0 %4090 }
0x2b1a   :  { %v4093_v46 = vadd.f32 %v4091_v40, %v4001_v14  ;;  %v6441_v14 = vpack.c.bf16 %v4458_v17, %v4450_v4  ;;  %v6455_v40 = vpack.c.bf16 %v4463_v37, %v4455_v61  ;;  %v4456_v17 = vld [vmem:[%s8434_s30 + $0x30] sm:$0xff] }
0x2b1c   :  { %6743 = vtanh.f32 %v4093_v46  ;;  %v4454_v46 = vld [vmem:[%s8434_s30 + $0x20] sm:$0xff] }
0x2b1d   :  { %v6457_v53 = vpack.c.bf16 %v4462_v16, %v4454_v46 }
0x2b26   :  { %v6744_v33 = vpop.eup %6743 }
0x2b27   :  { %4097 = vrot.lane.b32.xlu1 %v6744_v33, %s7196_s1  ;;  %v4478_v33 = vld [vmem:[%s8434_s30 + $0xe0] sm:$0xff] }
0x2b28   :  { %v6461_v55 = vpack.c.bf16 %v4478_v33, %v4470_v24 }
0x2b99   :  { %v4098_v3 = vpop.permute.xlu1 %4097 }
0x2b9a   :  { %v4100_v19 = vmul.f32 %v4098_v3, %v4095_v2  ;;  %v8175_v2 = vpack.c.bf16 %v4809_v59, %v4808_v56  ;;  %v4810_v3 = vld [vmem:[%s8436_s12 + $0x10] sm:$0xff] }
0x2b9c   :  { %v4102_v5 = vadd.f32 %v4101_v15, %v4100_v19  ;;  %v4811_v15 = vld [vmem:[%s8436_s12 + $0x18] sm:$0xff] }
0x2b9d   :  { %v8183_v19 = vpack.c.bf16 %v4811_v15, %v4810_v3  ;;  %v5862_v3 = vld [vmem:[#allocation20] ss:$0 sm:$0xff] }
0x2b9e   :  { %4115 = vrot.lane.b32.xlu0 %v4102_v5, %s7196_s1  ;;  %v4366_v5 = vld [vmem:[%s8435_s7 + $0x10] sm:$0xff] }
0x2b9f   :  { %v6437_v8 = vpack.c.bf16 %v4367_v27, %v4366_v5 }
0x2c10   :  { %v8132_v13 = vpop.permute.xlu0 %4115 }
0x2c11   :  { %6213 = vmatmul.mubr.msk.f32.vlgmr.msra.gmra.mrb[22].mxu1 %vm3289_vm14, %v8132_v13 }
0x2c12   :  { %6234 = vmatprep.mubr.msk.f32.mxu1 %vm7189_vm4, %v7188_v11  ;;  %6429 = vmatpush3.bf16.msra.mxu1 %v6428_v10  ;;  %v5860_v10 = vld [vmem:[#allocation18 + $0x2] ss:$0 sm:$0xff] }
0x2c13   :  { %6430 = vmatprep.subr.bf16.mxu1 %v7194_v43 }
0x2c16   :  { %6432 = vmatpush3.bf16.msra.mxu1 %v6431_v31 }
0x2c17   :  { %6440 = vmatprep.subr.bf16.mxu1 %v6439_v30  ;;  %v4468_v30 = vld [vmem:[%s8434_s30 + $0x90] sm:$0xff] }
0x2ce4   :  { %v4185_v48 = vpop.f32.mrb[22].mxu1 }
0x2ce5   :  { %v4186_v28 = vadd.f32 %v5848_v20, %v4185_v48  ;;  %v6214_v62 = vpop.f32.mrb[23].mxu1  ;;  %v4452_v20 = vld [vmem:[%s8434_s30 + $0x10] sm:$0xff] }
0x2ce6   :  { %v4460_v48 = vld [vmem:[%s8434_s30 + $0x50] sm:$0xff]  ;;  %v4469_v62 = vld [vmem:[%s8434_s30 + $0x98] sm:$0xff] }
0x2ce7   :  { %v4189_v29 = vmax.f32 %v4186_v28, 0.0  ;;  %v6449_v1 = vpack.c.bf16 %v4460_v48, %v4452_v20 }
0x2ce9   :  { %6224 = vmatmul.mubr.msk.f32.vlgmr.msra.gmra.mrb[24].mxu0 %vm3289_vm14, %v4189_v29  ;;  %v4477_v29 = vld [vmem:[%s8434_s30 + $0xd8] sm:$0xff] }
0x2cea   :  { %6245 = vmatprep.mubr.msk.f32.mxu0 %vm7189_vm4, %v7188_v11  ;;  %6435 = vmatpush3.bf16.msra.mxu0 %v6434_v7  ;;  %v6451_v38 = vpack.c.bf16 %v4477_v29, %v4469_v62  ;;  %v4465_v7 = vld [vmem:[%s8434_s30 + $0x78] sm:$0xff] }
0x2ceb   :  { %6436 = vmatprep.subr.bf16.mxu0 %v7194_v43  ;;  %v6463_v4 = vpack.c.bf16 %v4465_v7, %v4457_v36 }
0x2cee   :  { %6438 = vmatpush3.bf16.msra.mxu0 %v6437_v8 }
0x2cef   :  { %6448 = vmatprep.subr.bf16.mxu0 %v6447_v9 }
0x2dbc   :  { %v4272_v6 = vpop.f32.mrb[24].mxu0 }
0x2dbd   :  { %v4273_v44 = vadd.f32 %v5854_v35, %v4272_v6  ;;  %v6225_v32 = vpop.f32.mrb[25].mxu0  ;;  %v6453_v35 = vpack.c.bf16 %v4476_v47, %v4468_v30  ;;  %v4464_v6 = vld [vmem:[%s8434_s30 + $0x70] sm:$0xff] }
0x2dbf   :  { %v4276_v45 = vmax.f32 %v4273_v44, 0.0  ;;  %v4481_v44 = vld [vmem:[%s8434_s30 + $0xf8] sm:$0xff] }
0x2dc1   :  { %6235 = vmatmul.mubr.msk.f32.vlgmr.msra.gmra.mrb[24].mxu1 %vm3289_vm14, %v4276_v45  ;;  %v6467_v45 = vpack.c.bf16 %v4481_v44, %v4473_v42 }
0x2dc2   :  { %6442 = vmatpush1.bf16.msra.mxu1 %v6441_v14  ;;  %4588 = vmatprep.mubr.f32.mxu1 %v7188_v11  ;;  %v6465_v14 = vpack.c.bf16 %v4464_v6, %v4456_v17 }
0x2dc3   :  { %6444 = vmatprep.subr.bf16.mxu1 %v6443_v26  ;;  %v4472_v26 = vld [vmem:[%s8434_s30 + $0xb0] sm:$0xff] }
0x2dc4   :  { %v6469_v18 = vpack.c.bf16 %v4480_v0, %v4472_v26 }
0x2dc6   :  { %6446 = vmatpush1.bf16.msra.mxu1 %v6445_v50  ;;  %v8229_v50 = vld [vmem:[#allocation23] ss:$0 sm:$0xff] }
0x2dc7   :  { %6456 = vmatprep.subr.bf16.mxu1 %v6455_v40 }
0x2dc9   :  { %5864 = vmatmul.mubr.msk.f32.vlgmr.msra.gmra.mrb[26].mxu1 %vm3289_vm14, %v8132_v13 }
0x2dca   :  { %6458 = vmatpush1.bf16.msra.mxu1 %v6457_v53  ;;  %4730 = vmatprep.mubr.f32.mxu1 %v7188_v11 }
0x2dcb   :  { %6460 = vmatprep.subr.bf16.mxu1 %v6459_v34 }
0x2dce   :  { %6462 = vmatpush1.bf16.msra.mxu1 %v6461_v55 }
0x2dcf   :  { %6471 = vmatprep.subr.bf16.mxu1 %v7194_v43 }
0x2dd1   :  { %5866 = vmatmul.mubr.msk.f32.vlgmr.msra.gmra.mrb[28].mxu1 %vm3289_vm14, %v8132_v13 }
0x2dd2   :  { %6473 = vmatpush3.bf16.msra.mxu1 %v8175_v2  ;;  %6256 = vmatprep.mubr.msk.f32.mxu1 %vm7189_vm4, %v7188_v11 }
0x2dd3   :  { %6474 = vmatprep.subr.bf16.mxu1 %v7194_v43 }
0x2dd6   :  { %6476 = vmatpush3.bf16.msra.mxu1 %v8183_v19 }
0x2dd7   :  { %6483 = vmatprep.subr.bf16.mxu1 %v7194_v43 }
0x2dd9   :  { %6257 = vmatmul.mubr.f32.vlgmr.msra.gmra.mrb[30].mxu1 %v7188_v11 }
0x2dda   :  { %6485 = vmatpush3.bf16.msra.mxu1 %v8175_v2  ;;  %6278 = vmatprep.mubr.msk.f32.mxu1 %vm7189_vm4, %v7188_v11 }
0x2ddb   :  { %6486 = vmatprep.subr.bf16.mxu1 %v7194_v43 }
0x2dde   :  { %6488 = vmatpush3.bf16.msra.mxu1 %v8183_v19 }
0x2ddf   :  { %6495 = vmatprep.subr.bf16.mxu1 %v7194_v43 }
0x2e94   :  { %v4359_v28 = vpop.f32.mrb[24].mxu1 }
0x2e95   :  { %v4360_v41 = vadd.f32 %v5860_v10, %v4359_v28  ;;  %v6236_v39 = vpop.f32.mrb[25].mxu1 }
0x2e97   :  { %v4363_v31 = vmax.f32 %v4360_v41, 0.0 }
0x2e99   :  { %6246 = vmatmul.mubr.msk.f32.vlgmr.msra.gmra.mrb[26].mxu0 %vm3289_vm14, %v4363_v31 }
0x2e9a   :  { %6450 = vmatpush1.bf16.msra.mxu0 %v6449_v1  ;;  %4659 = vmatprep.mubr.f32.mxu0 %v7188_v11 }
0x2e9b   :  { %6452 = vmatprep.subr.bf16.mxu0 %v6451_v38 }
0x2e9c   :  { %v4590_v63 = vpop.f32.mrb[26].mxu1 }
0x2e9d   :  { %v8215_v32 = vpop.f32.mrb[27].mxu1 }
0x2e9e   :  { %6454 = vmatpush1.bf16.msra.mxu0 %v6453_v35 }
0x2e9f   :  { %6464 = vmatprep.subr.bf16.mxu0 %v6463_v4 }
0x2ea1   :  { %5865 = vmatmul.mubr.msk.f32.vlgmr.msra.gmra.mrb[28].mxu0 %vm3289_vm14, %v8132_v13 }
0x2ea2   :  { %6466 = vmatpush1.bf16.msra.mxu0 %v6465_v14  ;;  %4801 = vmatprep.mubr.f32.mxu0 %v7188_v11 }
0x2ea3   :  { %6468 = vmatprep.subr.bf16.mxu0 %v6467_v45 }
0x2ea4   :  { %v8222_v61 = vpop.f32.mrb[28].mxu1 }
0x2ea5   :  { %v8224_v37 = vpop.f32.mrb[29].mxu1 }
0x2ea6   :  { %6470 = vmatpush1.bf16.msra.mxu0 %v6469_v18 }
0x2ea7   :  { %6477 = vmatprep.subr.bf16.mxu0 %v7194_v43 }
0x2ea9   :  { %5867 = vmatmul.mubr.msk.f32.vlgmr.msra.gmra.mrb[30].mxu0 %vm3289_vm14, %v8132_v13  ;;  %v8239_v13 = vld [vmem:[#allocation21] sm:$0xff] }
0x2eaa   :  { %6479 = vmatpush3.bf16.msra.mxu0 %v8175_v2  ;;  %6267 = vmatprep.mubr.msk.f32.mxu0 %vm7189_vm4, %v7188_v11  ;;  %v4487_v51 = vrot.slane %v8239_v13, %v7451_v21  ;;  %v4491_v30 = vrot.slane %v8239_v13, %v7454_v22 }
0x2eab   :  { %6480 = vmatprep.subr.bf16.mxu0 %v7194_v43 }
0x2eac   :  { %v4885_v40 = vpop.f32.mrb[30].mxu1  ;;  %v4591_v23 = vadd.f32 %v4590_v63, %v4487_v51  ;;  %v4593_v47 = vadd.f32 %v8215_v32, %v4491_v30  ;;  %v4495_v51 = vrot.slane %v8239_v13, %v7461_v25 }
0x2ead   :  { %v4886_v46 = vadd.f32 %v8229_v50, %v4885_v40  ;;  %v6258_v16 = vpop.f32.mrb[31].mxu1 }
0x2eae   :  { %6482 = vmatpush3.bf16.msra.mxu0 %v8183_v19 }
0x2eaf   :  { %4897 = vrot.lane.b32.xlu1 %v4886_v46, %s7195_s19  ;;  %6489 = vmatprep.subr.bf16.mxu0 %v7194_v43  ;;  %v4889_v53 = vadd.f32 %v4886_v46, %v4591_v23 }
0x2eb1   :  { %v5869_v34 = vmul.f32 -1.442695, %v4889_v53 }
0x2eb3   :  { %6745 = vpow2.f32 %v5869_v34 }
0x2ebd   :  { %v6746_v24 = vpop.eup %6745 }
0x2ebe   :  { %v4893_v33 = vadd.f32 1.0, %v6746_v24 }
0x2ec0   :  { %6747 = vrcp.f32 %v4893_v33 }
0x2eca   :  { %v6748_v55 = vpop.eup %6747 }
0x2ecb   :  { %v4907_v48 = vsub.f32 1.0, %v6748_v55  ;;  %v4913_v62 = vmul.f32 0.0, %v6748_v55 }
0x2f21   :  { %v4898_v56 = vpop.permute.xlu1 %4897 }
0x2f22   :  { %v4900_v59 = vmul.f32 %v6748_v55, %v4898_v56 }
0x2f24   :  { %4902 = vrot.lane.b32.xlu0 %v4900_v59, %s7195_s19 }
0x2f6c   :  { %v4444_v15 = vpop.f32.mrb[26].mxu0 }
0x2f6d   :  { %v4445_v5 = vadd.f32 %v5862_v3, %v4444_v15  ;;  %v6247_v27 = vpop.f32.mrb[27].mxu0 }
0x2f6f   :  { %4449 = vst.msk [vmem:[#allocation26] sm:$0x3] %vm4448_vm7, %v4445_v5 }
0x2f74   :  { %v4661_v58 = vpop.f32.mrb[28].mxu0 }
0x2f75   :  { %v8244_v21 = vpop.f32.mrb[29].mxu0 }
0x2f7c   :  { %v8246_v8 = vpop.f32.mrb[30].mxu0 }
0x2f7d   :  { %v8248_v60 = vpop.f32.mrb[31].mxu0 }
0x2f96   :  { %v4903_v9 = vpop.permute.xlu0 %4902 }
0x2f97   :  { %v4905_v10 = vadd.f32 %v4903_v9, %v4591_v23  ;;  %v4662_v23 = vadd.f32 %v4661_v58, %v4495_v51 }
0x2f99   :  { %6749 = vtanh.f32 %v4905_v10 }
0x2fa3   :  { %v6750_v20 = vpop.eup %6749 }
0x2fa4   :  { %4909 = vrot.lane.b32.xlu1 %v6750_v20, %s7196_s1 }
0x3016   :  { %v4910_v28 = vpop.permute.xlu1 %4909 }
0x3017   :  { %v4912_v29 = vmul.f32 %v4910_v28, %v4907_v48 }
0x3019   :  { %v8251_v41 = vadd.f32 %v4913_v62, %v4912_v29  ;;  %v4499_v29 = vrot.slane %v8239_v13, %v7510_v12 }
0x301b   :  { %4916 = vrot.lane.b32.xlu0 %v8251_v41, %s7196_s1 }
0x308d   :  { %v4917_v39 = vpop.permute.xlu0 %4916 }
0x308e   :  { %6268 = vmatmul.mubr.msk.f32.vlgmr.msra.gmra.mrb[32].mxu0 %vm3289_vm14, %v4917_v39  ;;  %v4664_v39 = vadd.f32 %v8244_v21, %v4499_v29 }
0x308f   :  { %6491 = vmatpush3.bf16.msra.mxu0 %v8175_v2  ;;  %6289 = vmatprep.mubr.msk.f32.mxu0 %vm7189_vm4, %v7188_v11 }
0x3090   :  { %6492 = vmatprep.subr.bf16.mxu0 %v7194_v43 }
0x3093   :  { %6494 = vmatpush3.bf16.msra.mxu0 %v8183_v19 }
0x3094   :  { %6501 = vmatprep.subr.bf16.mxu0 %v7194_v43 }
0x3161   :  { %v4986_v1 = vpop.f32.mrb[32].mxu0 }
0x3162   :  { %v4987_v31 = vadd.f32 %v8229_v50, %v4986_v1  ;;  %v6269_v38 = vpop.f32.mrb[33].mxu0 }
0x3164   :  { %4998 = vrot.lane.b32.xlu1 %v4987_v31, %s7195_s19  ;;  %v4990_v36 = vadd.f32 %v4987_v31, %v4593_v47 }
0x3166   :  { %v5871_v7 = vmul.f32 -1.442695, %v4990_v36 }
0x3168   :  { %6751 = vpow2.f32 %v5871_v7 }
0x3172   :  { %v6752_v35 = vpop.eup %6751 }
0x3173   :  { %v4994_v4 = vadd.f32 1.0, %v6752_v35 }
0x3175   :  { %6753 = vrcp.f32 %v4994_v4 }
0x317f   :  { %v6754_v17 = vpop.eup %6753 }
0x3180   :  { %v5008_v22 = vsub.f32 1.0, %v6754_v17  ;;  %v5014_v32 = vmul.f32 %v6754_v17, %v8251_v41 }
0x31d6   :  { %v4999_v6 = vpop.permute.xlu1 %4998 }
0x31d7   :  { %v5001_v63 = vmul.f32 %v6754_v17, %v4999_v6 }
0x31d9   :  { %5003 = vrot.lane.b32.xlu0 %v5001_v63, %s7195_s19 }
0x324b   :  { %v5004_v42 = vpop.permute.xlu0 %5003 }
0x324c   :  { %v5006_v44 = vadd.f32 %v5004_v42, %v4593_v47 }
0x324e   :  { %6755 = vtanh.f32 %v5006_v44 }
0x3258   :  { %v6756_v14 = vpop.eup %6755 }
0x3259   :  { %5010 = vrot.lane.b32.xlu1 %v6756_v14, %s7196_s1 }
0x32cb   :  { %v5011_v45 = vpop.permute.xlu1 %5010 }
0x32cc   :  { %v5013_v26 = vmul.f32 %v5011_v45, %v5008_v22 }
0x32ce   :  { %v8270_v0 = vadd.f32 %v5014_v32, %v5013_v26  ;;  %v4503_v32 = vrot.slane %v8239_v13, %v7564_v52 }
0x32d0   :  { %5017 = vrot.lane.b32.xlu0 %v8270_v0, %s7196_s1  ;;  %v4733_v26 = vadd.f32 %v8222_v61, %v4503_v32 }
0x3342   :  { %v5018_v18 = vpop.permute.xlu0 %5017 }
0x3343   :  { %6279 = vmatmul.mubr.msk.f32.vlgmr.msra.gmra.mrb[32].mxu1 %vm3289_vm14, %v5018_v18 }
0x3344   :  { %6497 = vmatpush3.bf16.msra.mxu1 %v8175_v2  ;;  %6300 = vmatprep.mubr.msk.f32.mxu1 %vm7189_vm4, %v7188_v11 }
0x3345   :  { %6498 = vmatprep.subr.bf16.mxu1 %v7194_v43 }
0x3348   :  { %6500 = vmatpush3.bf16.msra.mxu1 %v8183_v19 }
0x3349   :  { %6507 = vmatprep.subr.bf16.mxu1 %v7194_v43 }
0x3416   :  { %v5087_v40 = vpop.f32.mrb[32].mxu1 }
0x3417   :  { %v5088_v46 = vadd.f32 %v8229_v50, %v5087_v40  ;;  %v6280_v16 = vpop.f32.mrb[33].mxu1 }
0x3419   :  { %5099 = vrot.lane.b32.xlu1 %v5088_v46, %s7195_s19  ;;  %v5091_v53 = vadd.f32 %v5088_v46, %v4662_v23 }
0x341b   :  { %v5873_v34 = vmul.f32 -1.442695, %v5091_v53 }
0x341d   :  { %6757 = vpow2.f32 %v5873_v34 }
0x3427   :  { %v6758_v24 = vpop.eup %6757 }
0x3428   :  { %v5095_v33 = vadd.f32 1.0, %v6758_v24 }
0x342a   :  { %6759 = vrcp.f32 %v5095_v33 }
0x3434   :  { %v6760_v55 = vpop.eup %6759 }
0x3435   :  { %v5109_v27 = vsub.f32 1.0, %v6760_v55  ;;  %v5115_v58 = vmul.f32 %v6760_v55, %v8270_v0 }
0x348b   :  { %v5100_v56 = vpop.permute.xlu1 %5099 }
0x348c   :  { %v5102_v59 = vmul.f32 %v6760_v55, %v5100_v56 }
0x348e   :  { %5104 = vrot.lane.b32.xlu0 %v5102_v59, %s7195_s19 }
0x3500   :  { %v5105_v3 = vpop.permute.xlu0 %5104 }
0x3501   :  { %v5107_v15 = vadd.f32 %v5105_v3, %v4662_v23 }
0x3503   :  { %6761 = vtanh.f32 %v5107_v15 }
0x350d   :  { %v6762_v5 = vpop.eup %6761 }
0x350e   :  { %5111 = vrot.lane.b32.xlu1 %v6762_v5, %s7196_s1 }
0x3580   :  { %v5112_v25 = vpop.permute.xlu1 %5111 }
0x3581   :  { %v5114_v9 = vmul.f32 %v5112_v25, %v5109_v27  ;;  %v4507_v25 = vrot.slane %v8239_v13, %v7569_v54 }
0x3583   :  { %v8288_v10 = vadd.f32 %v5115_v58, %v5114_v9  ;;  %v4735_v58 = vadd.f32 %v8224_v37, %v4507_v25  ;;  %v5645_v25 = vld [vmem:[%s7336_s17 + $0x10] sm:$0xff] }
0x3585   :  { %5118 = vrot.lane.b32.xlu0 %v8288_v10, %s7196_s1 }
0x35f7   :  { %v5119_v20 = vpop.permute.xlu0 %5118 }
0x35f8   :  { %6290 = vmatmul.mubr.msk.f32.vlgmr.msra.gmra.mrb[34].mxu0 %vm3289_vm14, %v5119_v20 }
0x35f9   :  { %6503 = vmatpush3.bf16.msra.mxu0 %v8175_v2  ;;  %6311 = vmatprep.mubr.msk.f32.mxu0 %vm7189_vm4, %v7188_v11 }
0x35fa   :  { %6504 = vmatprep.subr.bf16.mxu0 %v7194_v43 }
0x35fd   :  { %6506 = vmatpush3.bf16.msra.mxu0 %v8183_v19 }
0x35fe   :  { %6513 = vmatprep.subr.bf16.mxu0 %v7194_v43 }
0x36cb   :  { %v5188_v48 = vpop.f32.mrb[34].mxu0 }
0x36cc   :  { %v5189_v28 = vadd.f32 %v8229_v50, %v5188_v48  ;;  %v6291_v62 = vpop.f32.mrb[35].mxu0 }
0x36ce   :  { %5200 = vrot.lane.b32.xlu1 %v5189_v28, %s7195_s19  ;;  %v5192_v1 = vadd.f32 %v5189_v28, %v4664_v39 }
0x36d0   :  { %v5875_v31 = vmul.f32 -1.442695, %v5192_v1 }
0x36d2   :  { %6763 = vpow2.f32 %v5875_v31 }
0x36dc   :  { %v6764_v38 = vpop.eup %6763 }
0x36dd   :  { %v5196_v30 = vadd.f32 1.0, %v6764_v38 }
0x36df   :  { %6765 = vrcp.f32 %v5196_v30 }
0x36e9   :  { %v6766_v47 = vpop.eup %6765 }
0x36ea   :  { %v5210_v12 = vsub.f32 1.0, %v6766_v47  ;;  %v5216_v21 = vmul.f32 %v6766_v47, %v8288_v10 }
0x3740   :  { %v5201_v36 = vpop.permute.xlu1 %5200 }
0x3741   :  { %v5203_v7 = vmul.f32 %v6766_v47, %v5201_v36 }
0x3743   :  { %5205 = vrot.lane.b32.xlu0 %v5203_v7, %s7195_s19  ;;  %v4511_v7 = vrot.slane %v8239_v13, %v7632_v49 }
0x37b5   :  { %v5206_v35 = vpop.permute.xlu0 %5205 }
0x37b6   :  { %v5208_v4 = vadd.f32 %v5206_v35, %v4664_v39  ;;  %v4804_v35 = vadd.f32 %v8246_v8, %v4511_v7 }
0x37b8   :  { %6767 = vtanh.f32 %v5208_v4 }
0x37c2   :  { %v6768_v17 = vpop.eup %6767 }
0x37c3   :  { %5212 = vrot.lane.b32.xlu1 %v6768_v17, %s7196_s1 }
0x3835   :  { %v5213_v6 = vpop.permute.xlu1 %5212 }
0x3836   :  { %v5215_v63 = vmul.f32 %v5213_v6, %v5210_v12 }
0x3838   :  { %v8307_v42 = vadd.f32 %v5216_v21, %v5215_v63 }
0x383a   :  { %5219 = vrot.lane.b32.xlu0 %v8307_v42, %s7196_s1 }
0x38ac   :  { %v5220_v44 = vpop.permute.xlu0 %5219 }
0x38ad   :  { %6301 = vmatmul.mubr.msk.f32.vlgmr.msra.gmra.mrb[34].mxu1 %vm3289_vm14, %v5220_v44 }
0x38ae   :  { %6509 = vmatpush3.bf16.msra.mxu1 %v8175_v2  ;;  %6322 = vmatprep.mubr.msk.f32.mxu1 %vm7189_vm4, %v7188_v11 }
0x38af   :  { %6510 = vmatprep.subr.bf16.mxu1 %v7194_v43 }
0x38b2   :  { %6512 = vmatpush3.bf16.msra.mxu1 %v8183_v19 }
0x3980   :  { %v5289_v14 = vpop.f32.mrb[34].mxu1 }
0x3981   :  { %v5290_v22 = vadd.f32 %v8229_v50, %v5289_v14  ;;  %v6302_v45 = vpop.f32.mrb[35].mxu1 }
0x3983   :  { %5301 = vrot.lane.b32.xlu1 %v5290_v22, %s7195_s19  ;;  %v5293_v18 = vadd.f32 %v5290_v22, %v4733_v26 }
0x3985   :  { %v5877_v40 = vmul.f32 -1.442695, %v5293_v18 }
0x3987   :  { %6769 = vpow2.f32 %v5877_v40 }
0x3991   :  { %v6770_v46 = vpop.eup %6769 }
0x3992   :  { %v5297_v16 = vadd.f32 1.0, %v6770_v46 }
0x3994   :  { %6771 = vrcp.f32 %v5297_v16 }
0x399e   :  { %v6772_v51 = vpop.eup %6771 }
0x399f   :  { %v5311_v52 = vsub.f32 1.0, %v6772_v51  ;;  %v5317_v61 = vmul.f32 %v6772_v51, %v8307_v42 }
0x39f5   :  { %v5302_v23 = vpop.permute.xlu1 %5301 }
0x39f6   :  { %v5304_v53 = vmul.f32 %v6772_v51, %v5302_v23  ;;  %v4515_v23 = vrot.slane %v8239_v13, %v7640_v57  ;;  %v5626_v57 = vrot.slane %v8307_v42, 2  ;;  %v5643_v42 = vld [vmem:[%s7336_s17] sm:$0xff] }
0x39f8   :  { %5306 = vrot.lane.b32.xlu0 %v5304_v53, %s7195_s19  ;;  %v4806_v53 = vadd.f32 %v8248_v60, %v4515_v23 }
0x3a6a   :  { %v5307_v34 = vpop.permute.xlu0 %5306 }
0x3a6b   :  { %v5309_v24 = vadd.f32 %v5307_v34, %v4733_v26 }
0x3a6d   :  { %6773 = vtanh.f32 %v5309_v24 }
0x3a77   :  { %v6774_v33 = vpop.eup %6773 }
0x3a78   :  { %5313 = vrot.lane.b32.xlu1 %v6774_v33, %s7196_s1 }
0x3aea   :  { %v5314_v55 = vpop.permute.xlu1 %5313 }
0x3aeb   :  { %v5316_v56 = vmul.f32 %v5314_v55, %v5311_v52 }
0x3aed   :  { %v8325_v59 = vadd.f32 %v5317_v61, %v5316_v56  ;;  %v5622_v61 = vrot.slane %v8270_v0, 6 }
0x3aef   :  { %5320 = vrot.lane.b32.xlu0 %v8325_v59, %s7196_s1 }
0x3b61   :  { %v5321_v3 = vpop.permute.xlu0 %5320 }
0x3b62   :  { %6312 = vmatmul.mubr.msk.f32.vlgmr.msra.gmra.mrb[36].mxu0 %vm3289_vm14, %v5321_v3 }
0x3b63   :  { %6515 = vmatpush3.bf16.msra.mxu0 %v8175_v2  ;;  %6333 = vmatprep.mubr.msk.f32.mxu0 %vm7189_vm4, %v7188_v11  ;;  %vm5635_vm4 = vcmask 1041408  }
0x3b64   :  { %6516 = vmatprep.subr.bf16.mxu0 %v7194_v43  ;;  %v5636_v13 = vsel %vm5635_vm4, %v8251_v41, %v5622_v61 }
0x3b67   :  { %6518 = vmatpush3.bf16.msra.mxu0 %v8183_v19 }
0x3c35   :  { %v5390_v15 = vpop.f32.mrb[36].mxu0 }
0x3c36   :  { %v5391_v5 = vadd.f32 %v8229_v50, %v5390_v15  ;;  %v6313_v27 = vpop.f32.mrb[37].mxu0 }
0x3c37   :  { %v5644_v27 = vld [vmem:[%s7336_s17 + $0x8] sm:$0xff] }
0x3c38   :  { %5402 = vrot.lane.b32.xlu1 %v5391_v5, %s7195_s19  ;;  %v5394_v9 = vadd.f32 %v5391_v5, %v4735_v58 }
0x3c3a   :  { %v5879_v2 = vmul.f32 -1.442695, %v5394_v9  ;;  %v5646_v9 = vld [vmem:[%s7336_s17 + $0x18] sm:$0xff]  ;;  %s7197_s17 = smov [#allocation26]  }
0x3c3b   :  { %s5747_s10 = sshll.u32 %s7197_s17, 4  ;;  %s5748_s10 = int_to_ptr.vmem [resolvable:$true] %s5747_s10 }
0x3c3c   :  { %6775 = vpow2.f32 %v5879_v2  ;;  %v6523_v2 = vpack.c.bf16 %v5646_v9, %v5645_v25  ;;  %s7102_s14 = scalar_lea.vmem %s5748_s10, 32  ;;  %p7107_p1 = scmp.lt.s32.totalorder %s5748_s10, %s5748_s10 }
0x3c3d   :  { %p7103_p0 = scmp.ne.s32.totalorder %s5748_s10, %s7102_s14  ;;  %p7108_p2 = scmp.lt.s32.totalorder %s7102_s14, %s7102_s14 }
0x3c3f   :  { %p7109_p3 = por %p7108_p2, %p7107_p1 }
0x3c41   :  { %p7110_p4 = pnand %p7109_p3, %p7103_p0 }
0x3c46   :  { %v6776_v20 = vpop.eup %6775 }
0x3c47   :  { %v5398_v11 = vadd.f32 1.0, %v6776_v20 }
0x3c49   :  { %6777 = vrcp.f32 %v5398_v11 }
0x3c53   :  { %v6778_v43 = vpop.eup %6777 }
0x3c54   :  { %v5412_v54 = vsub.f32 1.0, %v6778_v43  ;;  %v5418_v37 = vmul.f32 %v6778_v43, %v8325_v59 }
0x3caa   :  { %v5403_v48 = vpop.permute.xlu1 %5402 }
0x3cab   :  { %v5405_v19 = vmul.f32 %v6778_v43, %v5403_v48 }
0x3cad   :  { %5407 = vrot.lane.b32.xlu0 %v5405_v19, %s7195_s19 }
0x3d1f   :  { %v5408_v28 = vpop.permute.xlu0 %5407 }
0x3d20   :  { %v5410_v62 = vadd.f32 %v5408_v28, %v4735_v58  ;;  %v6519_v58 = vpack.c.bf16 %v5644_v27, %v5643_v42 }
0x3d22   :  { %6779 = vtanh.f32 %v5410_v62  ;;  %6520 = vmatprep.subr.bf16.mxu1 %v6519_v58 }
0x3d2c   :  { %v6780_v29 = vpop.eup %6779 }
0x3d2d   :  { %5414 = vrot.lane.b32.xlu1 %v6780_v29, %s7196_s1 }
0x3d9f   :  { %v5415_v39 = vpop.permute.xlu1 %5414 }
0x3da0   :  { %v5417_v1 = vmul.f32 %v5415_v39, %v5412_v54 }
0x3da2   :  { %v8343_v31 = vadd.f32 %v5418_v37, %v5417_v1 }
0x3da4   :  { %5421 = vrot.lane.b32.xlu0 %v8343_v31, %s7196_s1  ;;  %v5628_v43 = vrot.slane %v8343_v31, 6 }
0x3da6   :  { %v5640_v54 = vsel %vm5635_vm4, %v8325_v59, %v5628_v43 }
0x3e16   :  { %v5422_v38 = vpop.permute.xlu0 %5421 }
0x3e17   :  { %6323 = vmatmul.mubr.msk.f32.vlgmr.msra.gmra.mrb[36].mxu1 %vm3289_vm14, %v5422_v38 }
0x3e18   :  { %6522 = vmatpush3.bf16.msra.mxu1 %v6519_v58 }
0x3e19   :  { %6524 = vmatprep.subr.bf16.mxu1 %v6523_v2 }
0x3e1c   :  { %6526 = vmatpush3.bf16.msra.mxu1 %v6523_v2 }
0x3eea   :  { %v5491_v30 = vpop.f32.mrb[36].mxu1 }
0x3eeb   :  { %v5492_v47 = vadd.f32 %v8229_v50, %v5491_v30  ;;  %v6324_v36 = vpop.f32.mrb[37].mxu1 }
0x3eed   :  { %5503 = vrot.lane.b32.xlu1 %v5492_v47, %s7195_s19  ;;  %v5495_v4 = vadd.f32 %v5492_v47, %v4804_v35 }
0x3eef   :  { %v5881_v17 = vmul.f32 -1.442695, %v5495_v4 }
0x3ef1   :  { %6781 = vpow2.f32 %v5881_v17 }
0x3efb   :  { %v6782_v12 = vpop.eup %6781 }
0x3efc   :  { %v5499_v6 = vadd.f32 1.0, %v6782_v12 }
0x3efe   :  { %6783 = vrcp.f32 %v5499_v6 }
0x3f08   :  { %v6784_v21 = vpop.eup %6783 }
0x3f09   :  { %v5513_v49 = vsub.f32 1.0, %v6784_v21  ;;  %v5519_v8 = vmul.f32 %v6784_v21, %v8343_v31 }
0x3f5f   :  { %v5504_v63 = vpop.permute.xlu1 %5503 }
0x3f60   :  { %v5506_v44 = vmul.f32 %v6784_v21, %v5504_v63 }
0x3f62   :  { %5508 = vrot.lane.b32.xlu0 %v5506_v44, %s7195_s19 }
0x3fd4   :  { %v5509_v14 = vpop.permute.xlu0 %5508 }
0x3fd5   :  { %v5511_v22 = vadd.f32 %v5509_v14, %v4804_v35 }
0x3fd7   :  { %6785 = vtanh.f32 %v5511_v22 }
0x3fe1   :  { %v6786_v45 = vpop.eup %6785 }
0x3fe2   :  { %5515 = vrot.lane.b32.xlu1 %v6786_v45, %s7196_s1 }
0x4054   :  { %v5516_v32 = vpop.permute.xlu1 %5515 }
0x4055   :  { %v5518_v26 = vmul.f32 %v5516_v32, %v5513_v49 }
0x4057   :  { %v5520_v18 = vadd.f32 %v5519_v8, %v5518_v26 }
0x4059   :  { %5522 = vrot.lane.b32.xlu0 %v5520_v18, %s7196_s1  ;;  %v5630_v28 = vrot.slane %v5520_v18, 4 }
0x405b   :  { %v5641_v39 = vsel %vm306_vm0, %v5640_v54, %v5630_v28 }
0x40cb   :  { %v5523_v40 = vpop.permute.xlu0 %5522 }
0x40cc   :  { %6334 = vmatmul.mubr.msk.f32.vlgmr.msra.gmra.mrb[38].mxu0 %vm3289_vm14, %v5523_v40 }
0x419f   :  { %v5592_v46 = vpop.f32.mrb[38].mxu0 }
0x41a0   :  { %v5593_v16 = vadd.f32 %v8229_v50, %v5592_v46  ;;  %v6335_v51 = vpop.f32.mrb[39].mxu0  ;;  %v5624_v50 = vrot.slane %v8288_v10, 4 }
0x41a2   :  { %5604 = vrot.lane.b32.xlu1 %v5593_v16, %s7195_s19  ;;  %v5596_v34 = vadd.f32 %v5593_v16, %v4806_v53  ;;  %v5637_v60 = vsel %vm306_vm0, %v5636_v13, %v5624_v50 }
0x41a3   :  { %v5639_v0 = vsel %vm5638_vm8, %v5637_v60, %v5626_v57 }
0x41a4   :  { %v5883_v24 = vmul.f32 -1.442695, %v5596_v34 }
0x41a6   :  { %6787 = vpow2.f32 %v5883_v24 }
0x41b0   :  { %v6788_v33 = vpop.eup %6787 }
0x41b1   :  { %v5600_v52 = vadd.f32 1.0, %v6788_v33 }
0x41b3   :  { %6789 = vrcp.f32 %v5600_v52 }
0x41bd   :  { %v6790_v55 = vpop.eup %6789 }
0x41be   :  { %v5614_v20 = vsub.f32 1.0, %v6790_v55  ;;  %v5620_v48 = vmul.f32 %v6790_v55, %v5520_v18 }
0x4214   :  { %v5605_v56 = vpop.permute.xlu1 %5604 }
0x4215   :  { %v5607_v3 = vmul.f32 %v6790_v55, %v5605_v56 }
0x4217   :  { %5609 = vrot.lane.b32.xlu0 %v5607_v3, %s7195_s19 }
0x421b   :  { %5656 = vrot.lane.b32.xlu0 %v5639_v0, %s7196_s1 }
0x4289   :  { %v5610_v10 = vpop.permute.xlu0 %5609 }
0x428a   :  { %v5612_v15 = vadd.f32 %v5610_v10, %v4806_v53 }
0x428c   :  { %6791 = vtanh.f32 %v5612_v15 }
0x428d   :  { %v5657_v5 = vpop.permute.xlu0 %5656 }
0x428e   :  { %6344 = vmatprep.mubr.msk.f32.mxu1 %vm3289_vm14, %v5657_v5 }
0x4296   :  { %v6792_v41 = vpop.eup %6791 }
0x4297   :  { %5616 = vrot.lane.b32.xlu1 %v6792_v41, %s7196_s1 }
0x4309   :  { %v5617_v11 = vpop.permute.xlu1 %5616 }
0x430a   :  { %v5619_v19 = vmul.f32 %v5617_v11, %v5614_v20 }
0x430c   :  { %v5621_v62 = vadd.f32 %v5620_v48, %v5619_v19 }
0x430e   :  { %v5633_v29 = vrot.slane %v5621_v62, 2 }
0x4310   :  { %v5642_v37 = vsel %vm5638_vm8, %v5641_v39, %v5633_v29 }
0x4311   :  { %5658 = vrot.lane.b32.xlu1 %v5642_v37, %s7196_s1 }
0x4383   :  { %v5659_v1 = vpop.permute.xlu1 %5658 }
0x4384   :  { %6345 = vmatmul.mubr.msk.f32.vlgmr.msra.gmra.mrb[38].mxu1 %vm3289_vm14, %v5659_v1 }
0x4385   :  { %7113 = shalt.err (!%p7110_p4)
}
0x4386   :  { %s7114_s13 = scalar_lea.hbm %s7346_s27, 32 }
0x4387   :  { %p7115_p5 = scmp.ne.s32.totalorder %s7346_s27, %s7114_s13  ;;  %p7118_p6 = scmp.lt.u32.totalorder %s7114_s13, %s7346_s27 }
0x4389   :  { %p7120_p7 = pnand %p7118_p6, %p7115_p5 }
0x438b   :  { %7123 = shalt.err (!%p7120_p7)
}
0x438c   :  { %5750 = dma.vmem_to_hbm [thread:$0]  %s5748_s10, 32, %s7346_s27, [#allocation5]   ;;  %v5884_v59 = vld [vmem:[#allocation24] ss:$0 sm:$0xff] }
0x4457   :  { %v6346_v31 = vpop.f32.mrb[38].mxu1 }
0x4458   :  { %v5736_v38 = vadd.f32 %v6346_v31, %v5884_v59  ;;  %v5730_v30 = vpop.f32.mrb[39].mxu1 }
0x4459   :  { %v5731_v47 = vadd.f32 %v5884_v59, %v5730_v30 }
0x445a   :  { %5740 = vst.msk [vmem:[%s7351_s5 + $0x8] sm:$0xff] %vm881_vm6, %v5736_v38 }
0x445b   :  { %5739 = vst.msk [vmem:[%s7351_s5] sm:$0xff] %vm881_vm6, %v5731_v47 }
0x445c   :  { %7140 = dma.done.wait [#allocation5], 32  }
0x445d   :  { %7141 = vsyncadd [#allocation5], 4294967264 }
0x445e   :  { %5758 = vsyncpa [#allocation4], 1 }
0x445f   :  { %5759 = vsyncpa [#allocation7], 1 }
0x4460   :  { %5760 = vsyncpa [#allocation10], 1 }
0x4461   :  { %5761 = vsyncpa [#allocation13], 1 }
0x4462   :  { %5762 = vsyncpa [#allocation16], 1 }
0x4463   :  { %5763 = vsyncpa [#allocation19], 1 }
0x4464   :  { %5764 = vsyncpa [#allocation22], 1 }
0x4465   :  { %5765 = vsyncpa [#allocation25], 1 }
0x4466   :  { %5766 = vsyncpa [#allocation5], 1 }

</bundles_post_ra>
